<compile_context>
chip_gen: v7x
topology: tpu7x:2x2x1
jax: 0.10.0
libtpu: 0.0.40
codegen_flags: <defaults>
</compile_context>

<pallas_src>
import functools

import jax
import jax.numpy as jnp
from jax.experimental import pallas as pl
from jax.experimental.pallas import tpu as pltpu


NODE_N = 66
IN_CHANNELS = 15          # dct_n
BN_EPS = 1e-5
LEAKY_SLOPE = 0.01        # PyTorch nn.LeakyReLU() default
MXU_TILE = 128            # cap: group * max(hidden, dct_n) <= one MXU tile
LANE = 128                # lane-dense granularity
SUBLANE = 8


def _round_up(v, m):
    return (v + m - 1) // m * m


# ----------------------------------------------------------------------------
# Fused Pallas kernel: the entire Multi_GCN forward for one batch group
# ----------------------------------------------------------------------------
def _make_fused_kernel(num_stage):
    """Kernel closure over the (static) per-segment block counts."""

    def gc(x, w, att, scale, shift, act):
        # y = att @ (x @ W); matmul inputs bf16, accumulation f32.
        s = jnp.dot(x.astype(jnp.bfloat16), w,
                    preferred_element_type=jnp.float32)
        y = jnp.dot(att, s.astype(jnp.bfloat16),
                    preferred_element_type=jnp.float32)
        if scale is None:
            y = y + shift                       # decoder: bias only
        else:
            y = y * scale + shift               # folded BN (gc bias folded in)
        if act == "leaky":
            y = jnp.where(y > 0, y, LEAKY_SLOPE * y)
        elif act == "tanh":
            y = jnp.tanh(y)
        return y

    def kernel(x_ref, ew_ref, ea_ref, es_ref, eh_ref,
               bw_ref, ba_ref, bs_ref, bh_ref,
               dw_ref, da_ref, db_ref, o_ref):
        x = x_ref[0]                                      # [N_PAD, LANE_IO] f32

        # gc1 -> bn1 -> LeakyReLU (dropout = identity, eval-mode BN folded).
        y = gc(x, ew_ref[...], ea_ref[...], es_ref[...], eh_ref[...], "leaky")

        def block(y, li):
            h = gc(y, bw_ref[li], ba_ref[li], bs_ref[li], bh_ref[li], "tanh")
            h = gc(h, bw_ref[li + 1], ba_ref[li + 1],
                   bs_ref[li + 1], bh_ref[li + 1], "tanh")
            return h + y                                  # residual

        li = 0
        for _ in range(num_stage[0]):
            y = block(y, li)
            li += 2
        y1 = y
        o_ref[0, 0] = gc(y1, dw_ref[0], da_ref[0], None, db_ref[0], "none") + x

        for _ in range(num_stage[1]):
            y = block(y, li)
            li += 2
        y2 = y1 + y
        o_ref[0, 1] = gc(y2, dw_ref[1], da_ref[1], None, db_ref[1], "none") + x

        for _ in range(num_stage[2]):
            y = block(y, li)
            li += 2
        y3 = y2 + y
        o_ref[0, 2] = gc(y3, dw_ref[2], da_ref[2], None, db_ref[2], "none") + x

    return kernel


def _invariant_spec(shape):
    """BlockSpec for a grid-invariant operand (whole array, same every step)."""
    zeros = (0,) * len(shape)
    return pl.BlockSpec(shape, lambda g: zeros)


# ----------------------------------------------------------------------------
# One-time parameter packing (hoisted out of the per-call forward)
# ----------------------------------------------------------------------------
def _fold_bias_into_bn(bias, bn):
    """(att@xW + b)*scale + shift == att@xW*scale + (shift + b*scale)."""
    scale, shift = bn
    return scale, shift + bias[None, :] * scale


def prepare_multi_gcn_params(params, num_stage, batch):
    """Builds the lane-dense, bf16 block-diagonal operand set once."""
    fin, hidden = params["gc1"]["w"].shape
    node_n = params["gc1"]["att"].shape[0]
    n_blocks = sum(num_stage)
    assert n_blocks >= 1

    # Batch group capped so group * feature fits one MXU tile (O(B) cost).
    group = max(1, min(batch, MXU_TILE // max(hidden, fin)))

    n_pad = _round_up(node_n, SUBLANE)
    lane_h = _round_up(group * hidden, LANE)
    lane_io = _round_up(group * fin, LANE)

    def bd(w, lane_in, lane_out):
        # batch-block-diagonal weight, zero-padded to lane-dense, bf16.
        k = jnp.kron(jnp.eye(group, dtype=jnp.float32), w.astype(jnp.float32))
        out = jnp.zeros((lane_in, lane_out), jnp.float32)
        out = out.at[:k.shape[0], :k.shape[1]].set(k)
        return out.astype(jnp.bfloat16)

    def att_pad(a):
        out = jnp.zeros((n_pad, n_pad), jnp.float32)
        out = out.at[:a.shape[0], :a.shape[1]].set(a)
        return out.astype(jnp.bfloat16)

    def affine_pad(scale, shift, lane):
        s = jnp.tile(scale, (1, group))
        t = jnp.tile(shift, (1, group))
        sp = jnp.zeros((n_pad, lane), jnp.float32).at[:node_n, :s.shape[1]].set(s)
        tp = jnp.zeros((n_pad, lane), jnp.float32).at[:node_n, :t.shape[1]].set(t)
        return sp, tp

    # --- encoder gc1 + bn1 (gc bias folded into the BN shift) ---------------
    ew = bd(params["gc1"]["w"], lane_io, lane_h)
    ea = att_pad(params["gc1"]["att"])
    s1, t1 = _fold_bias_into_bn(params["gc1"]["b"], params["bn1"])
    es, eh = affine_pad(s1, t1, lane_h)

    # --- residual GC_Blocks: stack the 2*n_blocks inner gc layers ------------
    bw, ba, bs, bh = [], [], [], []
    for blk in params["gcbs"][:n_blocks]:
        for gname, bname in (("gc1", "bn1"), ("gc2", "bn2")):
            bw.append(bd(blk[gname]["w"], lane_h, lane_h))
            ba.append(att_pad(blk[gname]["att"]))
            s, t = _fold_bias_into_bn(blk[gname]["b"], blk[bname])
            sp, tp = affine_pad(s, t, lane_h)
            bs.append(sp)
            bh.append(tp)
    bw = jnp.stack(bw)                       # [2nb, lane_h, lane_h]  bf16
    ba = jnp.stack(ba)                       # [2nb, n_pad, n_pad]    bf16
    bs = jnp.stack(bs)                       # [2nb, n_pad, lane_h]   f32
    bh = jnp.stack(bh)                       # [2nb, n_pad, lane_h]   f32

    # --- decoders gc2/gc3/gc4 (no BN; bias only) -----------------------------
    dw = jnp.stack([bd(params[k]["w"], lane_h, lane_io)
                    for k in ("gc2", "gc3", "gc4")])
    da = jnp.stack([att_pad(params[k]["att"]) for k in ("gc2", "gc3", "gc4")])

    def dec_bias(b):
        bb = jnp.tile(b, group)
        row = jnp.zeros((lane_io,), jnp.float32).at[:bb.shape[0]].set(bb)
        return jnp.broadcast_to(row[None, :], (n_pad, lane_io))
    db = jnp.stack([dec_bias(params[k]["b"]) for k in ("gc2", "gc3", "gc4")])

    packed = (ew, ea, es, eh, bw, ba, bs, bh, dw, da, db)
    return group, packed


# ----------------------------------------------------------------------------
# Forward pass: single jit, single pallas_call (batch groups on a parallel grid)
# ----------------------------------------------------------------------------
@functools.partial(jax.jit, static_argnames=("num_stage", "group"))
def multi_gcn_forward(x, packed, num_stage, group):
    ew, ea, es, eh, bw, ba, bs, bh, dw, da, db = packed
    B, N, Fin = x.shape
    n_pad = ea.shape[0]
    lane_h = ew.shape[1]
    lane_io = dw.shape[2]
    L = bw.shape[0]
    G = -(-B // group)                       # number of batch groups

    # Pack x lane-dense: [B, N, Fin] -> [G, n_pad, lane_io].
    xb = jnp.zeros((G * group, N, Fin), jnp.float32).at[:B].set(
        x.astype(jnp.float32))
    xp = xb.reshape(G, group, N, Fin).transpose(0, 2, 1, 3).reshape(
        G, N, group * Fin)
    xpad = jnp.zeros((G, n_pad, lane_io), jnp.float32)
    xpad = xpad.at[:, :N, :group * Fin].set(xp)

    operands = (xpad, ew, ea, es, eh, bw, ba, bs, bh, dw, da, db)

    # Advisory cost estimate.
    flops_g = (2 * n_pad * lane_io * lane_h + 2 * n_pad * n_pad * lane_h
               + L * (2 * n_pad * lane_h * lane_h + 2 * n_pad * n_pad * lane_h)
               + 3 * (2 * n_pad * lane_h * lane_io + 2 * n_pad * n_pad * lane_io))
    flops = int(G * flops_g)
    transcendentals = int(G * L * n_pad * lane_h)
    bytes_accessed = int(sum(int(a.size) * a.dtype.itemsize for a in operands)
                         + G * 3 * n_pad * lane_io * 4)

    in_specs = ([pl.BlockSpec((1, n_pad, lane_io), lambda g: (g, 0, 0))]
                + [_invariant_spec(a.shape) for a in operands[1:]])

    out = pl.pallas_call(
        _make_fused_kernel(num_stage),
        out_shape=jax.ShapeDtypeStruct((G, 3, n_pad, lane_io), jnp.float32),
        grid=(G,),
        in_specs=in_specs,
        out_specs=pl.BlockSpec((1, 3, n_pad, lane_io),
                               lambda g: (g, 0, 0, 0)),
        compiler_params=pltpu.CompilerParams(
            dimension_semantics=("parallel",)),
        cost_estimate=pl.CostEstimate(flops=flops,
                                      transcendentals=transcendentals,
                                      bytes_accessed=bytes_accessed),
    )(*operands)

    # Unpack: [G, 3, n_pad, lane_io] -> 3 x [B, N, Fin].
    out = out[:, :, :N, :group * Fin].reshape(G, 3, N, group, Fin)
    out = out.transpose(1, 0, 3, 2, 4).reshape(3, G * group, N, Fin)[:, :B]
    return out[0], out[1], out[2]


# ----------------------------------------------------------------------------
# Parameter construction (deterministic, synthetic — no checkpoint loading)
# ----------------------------------------------------------------------------
def _init_gc(key, fin, fout, node_n=NODE_N):
    kw, ka, kb = jax.random.split(key, 3)
    stdv = 1.0 / jnp.sqrt(jnp.float32(fout))
    w = jax.random.uniform(kw, (fin, fout), jnp.float32, -stdv, stdv)
    att = jax.random.uniform(ka, (node_n, node_n), jnp.float32, -stdv, stdv)
    b = jax.random.uniform(kb, (fout,), jnp.float32, -stdv, stdv)
    return {"w": w, "att": att, "b": b}


def _init_bn(key, node_n, feat):
    # BatchNorm1d over node_n*feat flattened features, folded (eval mode) into
    # a per-(node, feature) scale/shift.
    kg, kb, km, kv = jax.random.split(key, 4)
    n = node_n * feat
    gamma = 1.0 + 0.1 * jax.random.normal(kg, (n,), jnp.float32)
    beta = 0.1 * jax.random.normal(kb, (n,), jnp.float32)
    mean = 0.1 * jax.random.normal(km, (n,), jnp.float32)
    var = 1.0 + 0.1 * jax.random.uniform(kv, (n,), jnp.float32)
    scale = gamma / jnp.sqrt(var + BN_EPS)
    shift = beta - mean * scale
    return scale.reshape(node_n, feat), shift.reshape(node_n, feat)


def init_multi_gcn_params(key, hidden_feature, num_stage):
    keys = jax.random.split(key, 16 + 8 * sum(num_stage))
    ki = iter(keys)
    p = {}
    p["gc1"] = _init_gc(next(ki), IN_CHANNELS, hidden_feature)
    p["gc2"] = _init_gc(next(ki), hidden_feature, IN_CHANNELS)
    p["gc3"] = _init_gc(next(ki), hidden_feature, IN_CHANNELS)
    p["gc4"] = _init_gc(next(ki), hidden_feature, IN_CHANNELS)
    p["bn1"] = _init_bn(next(ki), NODE_N, hidden_feature)
    blocks = []
    for _ in range(sum(num_stage)):
        blk = {
            "gc1": _init_gc(next(ki), hidden_feature, hidden_feature),
            "bn1": _init_bn(next(ki), NODE_N, hidden_feature),
            "gc2": _init_gc(next(ki), hidden_feature, hidden_feature),
            "bn2": _init_bn(next(ki), NODE_N, hidden_feature),
        }
        blocks.append(blk)
    p["gcbs"] = blocks
    return p


# ----------------------------------------------------------------------------
# Pure-JAX reference (layer-by-layer, unpacked) for correctness checks
# ----------------------------------------------------------------------------
def _reference_forward(x, params, num_stage, mm_dtype=jnp.float32):
    hp = jax.lax.Precision.HIGHEST

    def mm1(a, w):
        return jnp.einsum("bnf,fg->bng", a.astype(mm_dtype), w.astype(mm_dtype),
                          precision=hp, preferred_element_type=jnp.float32)

    def mm2(att, s):
        return jnp.einsum("nm,bmg->bng", att.astype(mm_dtype),
                          s.astype(mm_dtype),
                          precision=hp, preferred_element_type=jnp.float32)

    def gc(a, layer, bn=None, act=None):
        s = mm1(a, layer["w"])
        y = mm2(layer["att"], s) + layer["b"]
        if bn is not None:
            scale, shift = bn
            y = y * scale[None] + shift[None]
        if act == "leaky":
            y = jnp.where(y > 0, y, LEAKY_SLOPE * y)
        elif act == "tanh":
            y = jnp.tanh(y)
        return y

    def block(y, blk):
        h = gc(y, blk["gc1"], blk["bn1"], "tanh")
        h = gc(h, blk["gc2"], blk["bn2"], "tanh")
        return h + y

    y = gc(x, params["gc1"], params["bn1"], "leaky")
    idx = 0
    for _ in range(num_stage[0]):
        y = block(y, params["gcbs"][idx]); idx += 1
    y1 = y
    y1a = gc(y1, params["gc2"])
    for _ in range(num_stage[1]):
        y = block(y, params["gcbs"][idx]); idx += 1
    y2 = y1 + y
    y2a = gc(y2, params["gc3"])
    for _ in range(num_stage[2]):
        y = block(y, params["gcbs"][idx]); idx += 1
    y3 = y2 + y
    y3a = gc(y3, params["gc4"])
    return y1a + x, y2a + x, y3a + x


if __name__ == "__main__":
    key = jax.random.PRNGKey(0)
    kx, kp = jax.random.split(key)

    batch = 2
    hidden_feature = 32
    num_stage = (1, 1, 1)

    x = jax.random.normal(kx, (batch, NODE_N, IN_CHANNELS), jnp.float32)
    params = init_multi_gcn_params(kp, hidden_feature, num_stage)

    # One-time packing (kron block-diagonals, BN/bias folding, bf16 cast).
    group, packed = prepare_multi_gcn_params(params, num_stage, batch)
    jax.block_until_ready(packed)

    y1a, y2a, y3a = multi_gcn_forward(x, packed, num_stage=num_stage,
                                      group=group)
    jax.block_until_ready((y1a, y2a, y3a))

    assert y1a.shape == (batch, NODE_N, IN_CHANNELS)
    assert y2a.shape == (batch, NODE_N, IN_CHANNELS)
    assert y3a.shape == (batch, NODE_N, IN_CHANNELS)

    # Tight check vs a bf16-matmul reference (validates packing/layout), plus
    # a loose check vs the pure-f32 reference (validates overall semantics).
    refs_bf16 = _reference_forward(x, params, num_stage, mm_dtype=jnp.bfloat16)
    refs_f32 = _reference_forward(x, params, num_stage, mm_dtype=jnp.float32)
    for got, rb, rf in zip((y1a, y2a, y3a), refs_bf16, refs_f32):
        err_b = float(jnp.max(jnp.abs(got - rb)))
        assert jnp.allclose(got, rb, atol=2e-2, rtol=2e-2), err_b
        err_f = float(jnp.max(jnp.abs(got - rf)))
        assert jnp.allclose(got, rf, atol=1.5e-1, rtol=1.5e-1), err_f

    print("KERNEL_OK")
</pallas_src>

<mosaic_0001>
module attributes {stable_mosaic.version = 11 : i64} {
  func.func @kernel(%arg0: i32, %arg1: memref<1x72x128xf32, #tpu.memory_space<vmem>>, %arg2: memref<128x128xbf16, #tpu.memory_space<vmem>>, %arg3: memref<72x72xbf16, #tpu.memory_space<vmem>>, %arg4: memref<72x128xf32, #tpu.memory_space<vmem>>, %arg5: memref<72x128xf32, #tpu.memory_space<vmem>>, %arg6: memref<6x128x128xbf16, #tpu.memory_space<vmem>>, %arg7: memref<6x72x72xbf16, #tpu.memory_space<vmem>>, %arg8: memref<6x72x128xf32, #tpu.memory_space<vmem>>, %arg9: memref<6x72x128xf32, #tpu.memory_space<vmem>>, %arg10: memref<3x128x128xbf16, #tpu.memory_space<vmem>>, %arg11: memref<3x72x72xbf16, #tpu.memory_space<vmem>>, %arg12: memref<3x72x128xf32, #tpu.memory_space<vmem>>, %arg13: memref<1x3x72x128xf32, #tpu.memory_space<vmem>>) attributes {dimension_semantics = [#tpu.dimension_semantics<parallel>], iteration_bounds = array<i64: 1>, scalar_prefetch = 0 : i64, scratch_operands = 0 : i64, tpu.core_type = #tpu.core_type<tc>, window_params = [{transform_indices = @transform_0, window_bounds = array<i64: 1, 72, 128>}, {pipeline_mode = #tpu.pipeline_mode<synchronous>, transform_indices = @transform_1, window_bounds = array<i64: 128, 128>}, {pipeline_mode = #tpu.pipeline_mode<synchronous>, transform_indices = @transform_2, window_bounds = array<i64: 72, 72>}, {pipeline_mode = #tpu.pipeline_mode<synchronous>, transform_indices = @transform_3, window_bounds = array<i64: 72, 128>}, {pipeline_mode = #tpu.pipeline_mode<synchronous>, transform_indices = @transform_4, window_bounds = array<i64: 72, 128>}, {pipeline_mode = #tpu.pipeline_mode<synchronous>, transform_indices = @transform_5, window_bounds = array<i64: 6, 128, 128>}, {pipeline_mode = #tpu.pipeline_mode<synchronous>, transform_indices = @transform_6, window_bounds = array<i64: 6, 72, 72>}, {pipeline_mode = #tpu.pipeline_mode<synchronous>, transform_indices = @transform_7, window_bounds = array<i64: 6, 72, 128>}, {pipeline_mode = #tpu.pipeline_mode<synchronous>, transform_indices = @transform_8, window_bounds = array<i64: 6, 72, 128>}, {pipeline_mode = #tpu.pipeline_mode<synchronous>, transform_indices = @transform_9, window_bounds = array<i64: 3, 128, 128>}, {pipeline_mode = #tpu.pipeline_mode<synchronous>, transform_indices = @transform_10, window_bounds = array<i64: 3, 72, 72>}, {pipeline_mode = #tpu.pipeline_mode<synchronous>, transform_indices = @transform_11, window_bounds = array<i64: 3, 72, 128>}, {transform_indices = @transform_12, window_bounds = array<i64: 1, 3, 72, 128>}]} {
    %c0 = arith.constant 0 : index
    %c0_0 = arith.constant 0 : index
    %c0_1 = arith.constant 0 : index
    %0 = vector.load %arg1[%c0, %c0_0, %c0_1] : memref<1x72x128xf32, #tpu.memory_space<vmem>>, vector<1x72x128xf32>
    %1 = vector.shape_cast %0 : vector<1x72x128xf32> to vector<72x128xf32>
    %c0_2 = arith.constant 0 : index
    %c0_3 = arith.constant 0 : index
    %2 = vector.load %arg2[%c0_2, %c0_3] : memref<128x128xbf16, #tpu.memory_space<vmem>>, vector<128x128xbf16>
    %c0_4 = arith.constant 0 : index
    %c0_5 = arith.constant 0 : index
    %3 = vector.load %arg3[%c0_4, %c0_5] : memref<72x72xbf16, #tpu.memory_space<vmem>>, vector<72x72xbf16>
    %c0_6 = arith.constant 0 : index
    %c0_7 = arith.constant 0 : index
    %4 = vector.load %arg4[%c0_6, %c0_7] : memref<72x128xf32, #tpu.memory_space<vmem>>, vector<72x128xf32>
    %c0_8 = arith.constant 0 : index
    %c0_9 = arith.constant 0 : index
    %5 = vector.load %arg5[%c0_8, %c0_9] : memref<72x128xf32, #tpu.memory_space<vmem>>, vector<72x128xf32>
    %6 = arith.truncf %1 : vector<72x128xf32> to vector<72x128xbf16>
    %cst = arith.constant dense<0.000000e+00> : vector<72x128xf32>
    %7 = tpu.matmul %6, %2, %cst {dimension_numbers = #tpu.dot_dimension_numbers<[1], [0], [0], [1], [0, 0, 1, 1], [], []>} : vector<72x128xbf16>, vector<128x128xbf16>, vector<72x128xf32> -> vector<72x128xf32>
    %8 = arith.truncf %7 : vector<72x128xf32> to vector<72x128xbf16>
    %cst_10 = arith.constant dense<0.000000e+00> : vector<72x128xf32>
    %9 = tpu.matmul %3, %8, %cst_10 {dimension_numbers = #tpu.dot_dimension_numbers<[1], [0], [0], [1], [0, 0, 1, 1], [], []>} : vector<72x72xbf16>, vector<72x128xbf16>, vector<72x128xf32> -> vector<72x128xf32>
    %10 = arith.mulf %9, %4 : vector<72x128xf32>
    %11 = arith.addf %10, %5 : vector<72x128xf32>
    %cst_11 = arith.constant 0.000000e+00 : f32
    %12 = vector.broadcast %cst_11 : f32 to vector<72x128xf32>
    %13 = arith.cmpf ogt, %11, %12 : vector<72x128xf32>
    %cst_12 = arith.constant 0.00999999977 : f32
    %14 = vector.broadcast %cst_12 : f32 to vector<72x128xf32>
    %15 = arith.mulf %14, %11 : vector<72x128xf32>
    %16 = arith.select %13, %11, %15 : vector<72x128xi1>, vector<72x128xf32>
    %c0_13 = arith.constant 0 : index
    %c0_14 = arith.constant 0 : index
    %c0_15 = arith.constant 0 : index
    %17 = vector.load %arg6[%c0_13, %c0_14, %c0_15] : memref<6x128x128xbf16, #tpu.memory_space<vmem>>, vector<1x128x128xbf16>
    %18 = vector.shape_cast %17 : vector<1x128x128xbf16> to vector<128x128xbf16>
    %c0_16 = arith.constant 0 : index
    %c0_17 = arith.constant 0 : index
    %c0_18 = arith.constant 0 : index
    %19 = vector.load %arg7[%c0_16, %c0_17, %c0_18] : memref<6x72x72xbf16, #tpu.memory_space<vmem>>, vector<1x72x72xbf16>
    %20 = vector.shape_cast %19 : vector<1x72x72xbf16> to vector<72x72xbf16>
    %c0_19 = arith.constant 0 : index
    %c0_20 = arith.constant 0 : index
    %c0_21 = arith.constant 0 : index
    %21 = vector.load %arg8[%c0_19, %c0_20, %c0_21] : memref<6x72x128xf32, #tpu.memory_space<vmem>>, vector<1x72x128xf32>
    %22 = vector.shape_cast %21 : vector<1x72x128xf32> to vector<72x128xf32>
    %c0_22 = arith.constant 0 : index
    %c0_23 = arith.constant 0 : index
    %c0_24 = arith.constant 0 : index
    %23 = vector.load %arg9[%c0_22, %c0_23, %c0_24] : memref<6x72x128xf32, #tpu.memory_space<vmem>>, vector<1x72x128xf32>
    %24 = vector.shape_cast %23 : vector<1x72x128xf32> to vector<72x128xf32>
    %25 = arith.truncf %16 : vector<72x128xf32> to vector<72x128xbf16>
    %cst_25 = arith.constant dense<0.000000e+00> : vector<72x128xf32>
    %26 = tpu.matmul %25, %18, %cst_25 {dimension_numbers = #tpu.dot_dimension_numbers<[1], [0], [0], [1], [0, 0, 1, 1], [], []>} : vector<72x128xbf16>, vector<128x128xbf16>, vector<72x128xf32> -> vector<72x128xf32>
    %27 = arith.truncf %26 : vector<72x128xf32> to vector<72x128xbf16>
    %cst_26 = arith.constant dense<0.000000e+00> : vector<72x128xf32>
    %28 = tpu.matmul %20, %27, %cst_26 {dimension_numbers = #tpu.dot_dimension_numbers<[1], [0], [0], [1], [0, 0, 1, 1], [], []>} : vector<72x72xbf16>, vector<72x128xbf16>, vector<72x128xf32> -> vector<72x128xf32>
    %29 = arith.mulf %28, %22 : vector<72x128xf32>
    %30 = arith.addf %29, %24 : vector<72x128xf32>
    %31 = math.tanh %30 : vector<72x128xf32>
    %c1 = arith.constant 1 : index
    %c0_27 = arith.constant 0 : index
    %c0_28 = arith.constant 0 : index
    %32 = vector.load %arg6[%c1, %c0_27, %c0_28] : memref<6x128x128xbf16, #tpu.memory_space<vmem>>, vector<1x128x128xbf16>
    %33 = vector.shape_cast %32 : vector<1x128x128xbf16> to vector<128x128xbf16>
    %c1_29 = arith.constant 1 : index
    %c0_30 = arith.constant 0 : index
    %c0_31 = arith.constant 0 : index
    %34 = vector.load %arg7[%c1_29, %c0_30, %c0_31] : memref<6x72x72xbf16, #tpu.memory_space<vmem>>, vector<1x72x72xbf16>
    %35 = vector.shape_cast %34 : vector<1x72x72xbf16> to vector<72x72xbf16>
    %c1_32 = arith.constant 1 : index
    %c0_33 = arith.constant 0 : index
    %c0_34 = arith.constant 0 : index
    %36 = vector.load %arg8[%c1_32, %c0_33, %c0_34] : memref<6x72x128xf32, #tpu.memory_space<vmem>>, vector<1x72x128xf32>
    %37 = vector.shape_cast %36 : vector<1x72x128xf32> to vector<72x128xf32>
    %c1_35 = arith.constant 1 : index
    %c0_36 = arith.constant 0 : index
    %c0_37 = arith.constant 0 : index
    %38 = vector.load %arg9[%c1_35, %c0_36, %c0_37] : memref<6x72x128xf32, #tpu.memory_space<vmem>>, vector<1x72x128xf32>
    %39 = vector.shape_cast %38 : vector<1x72x128xf32> to vector<72x128xf32>
    %40 = arith.truncf %31 : vector<72x128xf32> to vector<72x128xbf16>
    %cst_38 = arith.constant dense<0.000000e+00> : vector<72x128xf32>
    %41 = tpu.matmul %40, %33, %cst_38 {dimension_numbers = #tpu.dot_dimension_numbers<[1], [0], [0], [1], [0, 0, 1, 1], [], []>} : vector<72x128xbf16>, vector<128x128xbf16>, vector<72x128xf32> -> vector<72x128xf32>
    %42 = arith.truncf %41 : vector<72x128xf32> to vector<72x128xbf16>
    %cst_39 = arith.constant dense<0.000000e+00> : vector<72x128xf32>
    %43 = tpu.matmul %35, %42, %cst_39 {dimension_numbers = #tpu.dot_dimension_numbers<[1], [0], [0], [1], [0, 0, 1, 1], [], []>} : vector<72x72xbf16>, vector<72x128xbf16>, vector<72x128xf32> -> vector<72x128xf32>
    %44 = arith.mulf %43, %37 : vector<72x128xf32>
    %45 = arith.addf %44, %39 : vector<72x128xf32>
    %46 = math.tanh %45 : vector<72x128xf32>
    %47 = arith.addf %46, %16 : vector<72x128xf32>
    %c0_40 = arith.constant 0 : index
    %c0_41 = arith.constant 0 : index
    %c0_42 = arith.constant 0 : index
    %48 = vector.load %arg10[%c0_40, %c0_41, %c0_42] : memref<3x128x128xbf16, #tpu.memory_space<vmem>>, vector<1x128x128xbf16>
    %49 = vector.shape_cast %48 : vector<1x128x128xbf16> to vector<128x128xbf16>
    %c0_43 = arith.constant 0 : index
    %c0_44 = arith.constant 0 : index
    %c0_45 = arith.constant 0 : index
    %50 = vector.load %arg11[%c0_43, %c0_44, %c0_45] : memref<3x72x72xbf16, #tpu.memory_space<vmem>>, vector<1x72x72xbf16>
    %51 = vector.shape_cast %50 : vector<1x72x72xbf16> to vector<72x72xbf16>
    %c0_46 = arith.constant 0 : index
    %c0_47 = arith.constant 0 : index
    %c0_48 = arith.constant 0 : index
    %52 = vector.load %arg12[%c0_46, %c0_47, %c0_48] : memref<3x72x128xf32, #tpu.memory_space<vmem>>, vector<1x72x128xf32>
    %53 = vector.shape_cast %52 : vector<1x72x128xf32> to vector<72x128xf32>
    %54 = arith.truncf %47 : vector<72x128xf32> to vector<72x128xbf16>
    %cst_49 = arith.constant dense<0.000000e+00> : vector<72x128xf32>
    %55 = tpu.matmul %54, %49, %cst_49 {dimension_numbers = #tpu.dot_dimension_numbers<[1], [0], [0], [1], [0, 0, 1, 1], [], []>} : vector<72x128xbf16>, vector<128x128xbf16>, vector<72x128xf32> -> vector<72x128xf32>
    %56 = arith.truncf %55 : vector<72x128xf32> to vector<72x128xbf16>
    %cst_50 = arith.constant dense<0.000000e+00> : vector<72x128xf32>
    %57 = tpu.matmul %51, %56, %cst_50 {dimension_numbers = #tpu.dot_dimension_numbers<[1], [0], [0], [1], [0, 0, 1, 1], [], []>} : vector<72x72xbf16>, vector<72x128xbf16>, vector<72x128xf32> -> vector<72x128xf32>
    %58 = arith.addf %57, %53 : vector<72x128xf32>
    %59 = arith.addf %58, %1 : vector<72x128xf32>
    %c0_51 = arith.constant 0 : index
    %c0_52 = arith.constant 0 : index
    %c0_53 = arith.constant 0 : index
    %c0_54 = arith.constant 0 : index
    %60 = vector.load %arg13[%c0_51, %c0_52, %c0_53, %c0_54] : memref<1x3x72x128xf32, #tpu.memory_space<vmem>>, vector<1x1x72x128xf32>
    %61 = vector.shape_cast %60 : vector<1x1x72x128xf32> to vector<72x128xf32>
    %62 = vector.shape_cast %59 : vector<72x128xf32> to vector<1x1x72x128xf32>
    tpu.vector_store %arg13[%c0_51, %c0_52, %c0_53, %c0_54], %62 {strides = array<i32>} : memref<1x3x72x128xf32, #tpu.memory_space<vmem>>, vector<1x1x72x128xf32>,
    %c2 = arith.constant 2 : index
    %c0_55 = arith.constant 0 : index
    %c0_56 = arith.constant 0 : index
    %63 = vector.load %arg6[%c2, %c0_55, %c0_56] : memref<6x128x128xbf16, #tpu.memory_space<vmem>>, vector<1x128x128xbf16>
    %64 = vector.shape_cast %63 : vector<1x128x128xbf16> to vector<128x128xbf16>
    %c2_57 = arith.constant 2 : index
    %c0_58 = arith.constant 0 : index
    %c0_59 = arith.constant 0 : index
    %65 = vector.load %arg7[%c2_57, %c0_58, %c0_59] : memref<6x72x72xbf16, #tpu.memory_space<vmem>>, vector<1x72x72xbf16>
    %66 = vector.shape_cast %65 : vector<1x72x72xbf16> to vector<72x72xbf16>
    %c2_60 = arith.constant 2 : index
    %c0_61 = arith.constant 0 : index
    %c0_62 = arith.constant 0 : index
    %67 = vector.load %arg8[%c2_60, %c0_61, %c0_62] : memref<6x72x128xf32, #tpu.memory_space<vmem>>, vector<1x72x128xf32>
    %68 = vector.shape_cast %67 : vector<1x72x128xf32> to vector<72x128xf32>
    %c2_63 = arith.constant 2 : index
    %c0_64 = arith.constant 0 : index
    %c0_65 = arith.constant 0 : index
    %69 = vector.load %arg9[%c2_63, %c0_64, %c0_65] : memref<6x72x128xf32, #tpu.memory_space<vmem>>, vector<1x72x128xf32>
    %70 = vector.shape_cast %69 : vector<1x72x128xf32> to vector<72x128xf32>
    %71 = arith.truncf %47 : vector<72x128xf32> to vector<72x128xbf16>
    %cst_66 = arith.constant dense<0.000000e+00> : vector<72x128xf32>
    %72 = tpu.matmul %71, %64, %cst_66 {dimension_numbers = #tpu.dot_dimension_numbers<[1], [0], [0], [1], [0, 0, 1, 1], [], []>} : vector<72x128xbf16>, vector<128x128xbf16>, vector<72x128xf32> -> vector<72x128xf32>
    %73 = arith.truncf %72 : vector<72x128xf32> to vector<72x128xbf16>
    %cst_67 = arith.constant dense<0.000000e+00> : vector<72x128xf32>
    %74 = tpu.matmul %66, %73, %cst_67 {dimension_numbers = #tpu.dot_dimension_numbers<[1], [0], [0], [1], [0, 0, 1, 1], [], []>} : vector<72x72xbf16>, vector<72x128xbf16>, vector<72x128xf32> -> vector<72x128xf32>
    %75 = arith.mulf %74, %68 : vector<72x128xf32>
    %76 = arith.addf %75, %70 : vector<72x128xf32>
    %77 = math.tanh %76 : vector<72x128xf32>
    %c3 = arith.constant 3 : index
    %c0_68 = arith.constant 0 : index
    %c0_69 = arith.constant 0 : index
    %78 = vector.load %arg6[%c3, %c0_68, %c0_69] : memref<6x128x128xbf16, #tpu.memory_space<vmem>>, vector<1x128x128xbf16>
    %79 = vector.shape_cast %78 : vector<1x128x128xbf16> to vector<128x128xbf16>
    %c3_70 = arith.constant 3 : index
    %c0_71 = arith.constant 0 : index
    %c0_72 = arith.constant 0 : index
    %80 = vector.load %arg7[%c3_70, %c0_71, %c0_72] : memref<6x72x72xbf16, #tpu.memory_space<vmem>>, vector<1x72x72xbf16>
    %81 = vector.shape_cast %80 : vector<1x72x72xbf16> to vector<72x72xbf16>
    %c3_73 = arith.constant 3 : index
    %c0_74 = arith.constant 0 : index
    %c0_75 = arith.constant 0 : index
    %82 = vector.load %arg8[%c3_73, %c0_74, %c0_75] : memref<6x72x128xf32, #tpu.memory_space<vmem>>, vector<1x72x128xf32>
    %83 = vector.shape_cast %82 : vector<1x72x128xf32> to vector<72x128xf32>
    %c3_76 = arith.constant 3 : index
    %c0_77 = arith.constant 0 : index
    %c0_78 = arith.constant 0 : index
    %84 = vector.load %arg9[%c3_76, %c0_77, %c0_78] : memref<6x72x128xf32, #tpu.memory_space<vmem>>, vector<1x72x128xf32>
    %85 = vector.shape_cast %84 : vector<1x72x128xf32> to vector<72x128xf32>
    %86 = arith.truncf %77 : vector<72x128xf32> to vector<72x128xbf16>
    %cst_79 = arith.constant dense<0.000000e+00> : vector<72x128xf32>
    %87 = tpu.matmul %86, %79, %cst_79 {dimension_numbers = #tpu.dot_dimension_numbers<[1], [0], [0], [1], [0, 0, 1, 1], [], []>} : vector<72x128xbf16>, vector<128x128xbf16>, vector<72x128xf32> -> vector<72x128xf32>
    %88 = arith.truncf %87 : vector<72x128xf32> to vector<72x128xbf16>
    %cst_80 = arith.constant dense<0.000000e+00> : vector<72x128xf32>
    %89 = tpu.matmul %81, %88, %cst_80 {dimension_numbers = #tpu.dot_dimension_numbers<[1], [0], [0], [1], [0, 0, 1, 1], [], []>} : vector<72x72xbf16>, vector<72x128xbf16>, vector<72x128xf32> -> vector<72x128xf32>
    %90 = arith.mulf %89, %83 : vector<72x128xf32>
    %91 = arith.addf %90, %85 : vector<72x128xf32>
    %92 = math.tanh %91 : vector<72x128xf32>
    %93 = arith.addf %92, %47 : vector<72x128xf32>
    %94 = arith.addf %47, %93 : vector<72x128xf32>
    %c1_81 = arith.constant 1 : index
    %c0_82 = arith.constant 0 : index
    %c0_83 = arith.constant 0 : index
    %95 = vector.load %arg10[%c1_81, %c0_82, %c0_83] : memref<3x128x128xbf16, #tpu.memory_space<vmem>>, vector<1x128x128xbf16>
    %96 = vector.shape_cast %95 : vector<1x128x128xbf16> to vector<128x128xbf16>
    %c1_84 = arith.constant 1 : index
    %c0_85 = arith.constant 0 : index
    %c0_86 = arith.constant 0 : index
    %97 = vector.load %arg11[%c1_84, %c0_85, %c0_86] : memref<3x72x72xbf16, #tpu.memory_space<vmem>>, vector<1x72x72xbf16>
    %98 = vector.shape_cast %97 : vector<1x72x72xbf16> to vector<72x72xbf16>
    %c1_87 = arith.constant 1 : index
    %c0_88 = arith.constant 0 : index
    %c0_89 = arith.constant 0 : index
    %99 = vector.load %arg12[%c1_87, %c0_88, %c0_89] : memref<3x72x128xf32, #tpu.memory_space<vmem>>, vector<1x72x128xf32>
    %100 = vector.shape_cast %99 : vector<1x72x128xf32> to vector<72x128xf32>
    %101 = arith.truncf %94 : vector<72x128xf32> to vector<72x128xbf16>
    %cst_90 = arith.constant dense<0.000000e+00> : vector<72x128xf32>
    %102 = tpu.matmul %101, %96, %cst_90 {dimension_numbers = #tpu.dot_dimension_numbers<[1], [0], [0], [1], [0, 0, 1, 1], [], []>} : vector<72x128xbf16>, vector<128x128xbf16>, vector<72x128xf32> -> vector<72x128xf32>
    %103 = arith.truncf %102 : vector<72x128xf32> to vector<72x128xbf16>
    %cst_91 = arith.constant dense<0.000000e+00> : vector<72x128xf32>
    %104 = tpu.matmul %98, %103, %cst_91 {dimension_numbers = #tpu.dot_dimension_numbers<[1], [0], [0], [1], [0, 0, 1, 1], [], []>} : vector<72x72xbf16>, vector<72x128xbf16>, vector<72x128xf32> -> vector<72x128xf32>
    %105 = arith.addf %104, %100 : vector<72x128xf32>
    %106 = arith.addf %105, %1 : vector<72x128xf32>
    %c0_92 = arith.constant 0 : index
    %c1_93 = arith.constant 1 : index
    %c0_94 = arith.constant 0 : index
    %c0_95 = arith.constant 0 : index
    %107 = vector.load %arg13[%c0_92, %c1_93, %c0_94, %c0_95] : memref<1x3x72x128xf32, #tpu.memory_space<vmem>>, vector<1x1x72x128xf32>
    %108 = vector.shape_cast %107 : vector<1x1x72x128xf32> to vector<72x128xf32>
    %109 = vector.shape_cast %106 : vector<72x128xf32> to vector<1x1x72x128xf32>
    tpu.vector_store %arg13[%c0_92, %c1_93, %c0_94, %c0_95], %109 {strides = array<i32>} : memref<1x3x72x128xf32, #tpu.memory_space<vmem>>, vector<1x1x72x128xf32>,
    %c4 = arith.constant 4 : index
    %c0_96 = arith.constant 0 : index
    %c0_97 = arith.constant 0 : index
    %110 = vector.load %arg6[%c4, %c0_96, %c0_97] : memref<6x128x128xbf16, #tpu.memory_space<vmem>>, vector<1x128x128xbf16>
    %111 = vector.shape_cast %110 : vector<1x128x128xbf16> to vector<128x128xbf16>
    %c4_98 = arith.constant 4 : index
    %c0_99 = arith.constant 0 : index
    %c0_100 = arith.constant 0 : index
    %112 = vector.load %arg7[%c4_98, %c0_99, %c0_100] : memref<6x72x72xbf16, #tpu.memory_space<vmem>>, vector<1x72x72xbf16>
    %113 = vector.shape_cast %112 : vector<1x72x72xbf16> to vector<72x72xbf16>
    %c4_101 = arith.constant 4 : index
    %c0_102 = arith.constant 0 : index
    %c0_103 = arith.constant 0 : index
    %114 = vector.load %arg8[%c4_101, %c0_102, %c0_103] : memref<6x72x128xf32, #tpu.memory_space<vmem>>, vector<1x72x128xf32>
    %115 = vector.shape_cast %114 : vector<1x72x128xf32> to vector<72x128xf32>
    %c4_104 = arith.constant 4 : index
    %c0_105 = arith.constant 0 : index
    %c0_106 = arith.constant 0 : index
    %116 = vector.load %arg9[%c4_104, %c0_105, %c0_106] : memref<6x72x128xf32, #tpu.memory_space<vmem>>, vector<1x72x128xf32>
    %117 = vector.shape_cast %116 : vector<1x72x128xf32> to vector<72x128xf32>
    %118 = arith.truncf %93 : vector<72x128xf32> to vector<72x128xbf16>
    %cst_107 = arith.constant dense<0.000000e+00> : vector<72x128xf32>
    %119 = tpu.matmul %118, %111, %cst_107 {dimension_numbers = #tpu.dot_dimension_numbers<[1], [0], [0], [1], [0, 0, 1, 1], [], []>} : vector<72x128xbf16>, vector<128x128xbf16>, vector<72x128xf32> -> vector<72x128xf32>
    %120 = arith.truncf %119 : vector<72x128xf32> to vector<72x128xbf16>
    %cst_108 = arith.constant dense<0.000000e+00> : vector<72x128xf32>
    %121 = tpu.matmul %113, %120, %cst_108 {dimension_numbers = #tpu.dot_dimension_numbers<[1], [0], [0], [1], [0, 0, 1, 1], [], []>} : vector<72x72xbf16>, vector<72x128xbf16>, vector<72x128xf32> -> vector<72x128xf32>
    %122 = arith.mulf %121, %115 : vector<72x128xf32>
    %123 = arith.addf %122, %117 : vector<72x128xf32>
    %124 = math.tanh %123 : vector<72x128xf32>
    %c5 = arith.constant 5 : index
    %c0_109 = arith.constant 0 : index
    %c0_110 = arith.constant 0 : index
    %125 = vector.load %arg6[%c5, %c0_109, %c0_110] : memref<6x128x128xbf16, #tpu.memory_space<vmem>>, vector<1x128x128xbf16>
    %126 = vector.shape_cast %125 : vector<1x128x128xbf16> to vector<128x128xbf16>
    %c5_111 = arith.constant 5 : index
    %c0_112 = arith.constant 0 : index
    %c0_113 = arith.constant 0 : index
    %127 = vector.load %arg7[%c5_111, %c0_112, %c0_113] : memref<6x72x72xbf16, #tpu.memory_space<vmem>>, vector<1x72x72xbf16>
    %128 = vector.shape_cast %127 : vector<1x72x72xbf16> to vector<72x72xbf16>
    %c5_114 = arith.constant 5 : index
    %c0_115 = arith.constant 0 : index
    %c0_116 = arith.constant 0 : index
    %129 = vector.load %arg8[%c5_114, %c0_115, %c0_116] : memref<6x72x128xf32, #tpu.memory_space<vmem>>, vector<1x72x128xf32>
    %130 = vector.shape_cast %129 : vector<1x72x128xf32> to vector<72x128xf32>
    %c5_117 = arith.constant 5 : index
    %c0_118 = arith.constant 0 : index
    %c0_119 = arith.constant 0 : index
    %131 = vector.load %arg9[%c5_117, %c0_118, %c0_119] : memref<6x72x128xf32, #tpu.memory_space<vmem>>, vector<1x72x128xf32>
    %132 = vector.shape_cast %131 : vector<1x72x128xf32> to vector<72x128xf32>
    %133 = arith.truncf %124 : vector<72x128xf32> to vector<72x128xbf16>
    %cst_120 = arith.constant dense<0.000000e+00> : vector<72x128xf32>
    %134 = tpu.matmul %133, %126, %cst_120 {dimension_numbers = #tpu.dot_dimension_numbers<[1], [0], [0], [1], [0, 0, 1, 1], [], []>} : vector<72x128xbf16>, vector<128x128xbf16>, vector<72x128xf32> -> vector<72x128xf32>
    %135 = arith.truncf %134 : vector<72x128xf32> to vector<72x128xbf16>
    %cst_121 = arith.constant dense<0.000000e+00> : vector<72x128xf32>
    %136 = tpu.matmul %128, %135, %cst_121 {dimension_numbers = #tpu.dot_dimension_numbers<[1], [0], [0], [1], [0, 0, 1, 1], [], []>} : vector<72x72xbf16>, vector<72x128xbf16>, vector<72x128xf32> -> vector<72x128xf32>
    %137 = arith.mulf %136, %130 : vector<72x128xf32>
    %138 = arith.addf %137, %132 : vector<72x128xf32>
    %139 = math.tanh %138 : vector<72x128xf32>
    %140 = arith.addf %139, %93 : vector<72x128xf32>
    %141 = arith.addf %94, %140 : vector<72x128xf32>
    %c2_122 = arith.constant 2 : index
    %c0_123 = arith.constant 0 : index
    %c0_124 = arith.constant 0 : index
    %142 = vector.load %arg10[%c2_122, %c0_123, %c0_124] : memref<3x128x128xbf16, #tpu.memory_space<vmem>>, vector<1x128x128xbf16>
    %143 = vector.shape_cast %142 : vector<1x128x128xbf16> to vector<128x128xbf16>
    %c2_125 = arith.constant 2 : index
    %c0_126 = arith.constant 0 : index
    %c0_127 = arith.constant 0 : index
    %144 = vector.load %arg11[%c2_125, %c0_126, %c0_127] : memref<3x72x72xbf16, #tpu.memory_space<vmem>>, vector<1x72x72xbf16>
    %145 = vector.shape_cast %144 : vector<1x72x72xbf16> to vector<72x72xbf16>
    %c2_128 = arith.constant 2 : index
    %c0_129 = arith.constant 0 : index
    %c0_130 = arith.constant 0 : index
    %146 = vector.load %arg12[%c2_128, %c0_129, %c0_130] : memref<3x72x128xf32, #tpu.memory_space<vmem>>, vector<1x72x128xf32>
    %147 = vector.shape_cast %146 : vector<1x72x128xf32> to vector<72x128xf32>
    %148 = arith.truncf %141 : vector<72x128xf32> to vector<72x128xbf16>
    %cst_131 = arith.constant dense<0.000000e+00> : vector<72x128xf32>
    %149 = tpu.matmul %148, %143, %cst_131 {dimension_numbers = #tpu.dot_dimension_numbers<[1], [0], [0], [1], [0, 0, 1, 1], [], []>} : vector<72x128xbf16>, vector<128x128xbf16>, vector<72x128xf32> -> vector<72x128xf32>
    %150 = arith.truncf %149 : vector<72x128xf32> to vector<72x128xbf16>
    %cst_132 = arith.constant dense<0.000000e+00> : vector<72x128xf32>
    %151 = tpu.matmul %145, %150, %cst_132 {dimension_numbers = #tpu.dot_dimension_numbers<[1], [0], [0], [1], [0, 0, 1, 1], [], []>} : vector<72x72xbf16>, vector<72x128xbf16>, vector<72x128xf32> -> vector<72x128xf32>
    %152 = arith.addf %151, %147 : vector<72x128xf32>
    %153 = arith.addf %152, %1 : vector<72x128xf32>
    %c0_133 = arith.constant 0 : index
    %c2_134 = arith.constant 2 : index
    %c0_135 = arith.constant 0 : index
    %c0_136 = arith.constant 0 : index
    %154 = vector.load %arg13[%c0_133, %c2_134, %c0_135, %c0_136] : memref<1x3x72x128xf32, #tpu.memory_space<vmem>>, vector<1x1x72x128xf32>
    %155 = vector.shape_cast %154 : vector<1x1x72x128xf32> to vector<72x128xf32>
    %156 = vector.shape_cast %153 : vector<72x128xf32> to vector<1x1x72x128xf32>
    tpu.vector_store %arg13[%c0_133, %c2_134, %c0_135, %c0_136], %156 {strides = array<i32>} : memref<1x3x72x128xf32, #tpu.memory_space<vmem>>, vector<1x1x72x128xf32>,
    return
  }
  func.func @transform_0(%arg0: i32) -> (i32, i32, i32) {
    %c0_i32 = arith.constant 0 : i32
    %c0_i32_0 = arith.constant 0 : i32
    %c0_i32_1 = arith.constant 0 : i32
    return %arg0, %c0_i32, %c0_i32_0 : i32, i32, i32
  }
  func.func @transform_1(%arg0: i32) -> (i32, i32) {
    %c0_i32 = arith.constant 0 : i32
    %c0_i32_0 = arith.constant 0 : i32
    %c0_i32_1 = arith.constant 0 : i32
    return %c0_i32, %c0_i32_0 : i32, i32
  }
  func.func @transform_2(%arg0: i32) -> (i32, i32) {
    %c0_i32 = arith.constant 0 : i32
    %c0_i32_0 = arith.constant 0 : i32
    %c0_i32_1 = arith.constant 0 : i32
    return %c0_i32, %c0_i32_0 : i32, i32
  }
  func.func @transform_3(%arg0: i32) -> (i32, i32) {
    %c0_i32 = arith.constant 0 : i32
    %c0_i32_0 = arith.constant 0 : i32
    %c0_i32_1 = arith.constant 0 : i32
    return %c0_i32, %c0_i32_0 : i32, i32
  }
  func.func @transform_4(%arg0: i32) -> (i32, i32) {
    %c0_i32 = arith.constant 0 : i32
    %c0_i32_0 = arith.constant 0 : i32
    %c0_i32_1 = arith.constant 0 : i32
    return %c0_i32, %c0_i32_0 : i32, i32
  }
  func.func @transform_5(%arg0: i32) -> (i32, i32, i32) {
    %c0_i32 = arith.constant 0 : i32
    %c0_i32_0 = arith.constant 0 : i32
    %c0_i32_1 = arith.constant 0 : i32
    %c0_i32_2 = arith.constant 0 : i32
    return %c0_i32, %c0_i32_0, %c0_i32_1 : i32, i32, i32
  }
  func.func @transform_6(%arg0: i32) -> (i32, i32, i32) {
    %c0_i32 = arith.constant 0 : i32
    %c0_i32_0 = arith.constant 0 : i32
    %c0_i32_1 = arith.constant 0 : i32
    %c0_i32_2 = arith.constant 0 : i32
    return %c0_i32, %c0_i32_0, %c0_i32_1 : i32, i32, i32
  }
  func.func @transform_7(%arg0: i32) -> (i32, i32, i32) {
    %c0_i32 = arith.constant 0 : i32
    %c0_i32_0 = arith.constant 0 : i32
    %c0_i32_1 = arith.constant 0 : i32
    %c0_i32_2 = arith.constant 0 : i32
    return %c0_i32, %c0_i32_0, %c0_i32_1 : i32, i32, i32
  }
  func.func @transform_8(%arg0: i32) -> (i32, i32, i32) {
    %c0_i32 = arith.constant 0 : i32
    %c0_i32_0 = arith.constant 0 : i32
    %c0_i32_1 = arith.constant 0 : i32
    %c0_i32_2 = arith.constant 0 : i32
    return %c0_i32, %c0_i32_0, %c0_i32_1 : i32, i32, i32
  }
  func.func @transform_9(%arg0: i32) -> (i32, i32, i32) {
    %c0_i32 = arith.constant 0 : i32
    %c0_i32_0 = arith.constant 0 : i32
    %c0_i32_1 = arith.constant 0 : i32
    %c0_i32_2 = arith.constant 0 : i32
    return %c0_i32, %c0_i32_0, %c0_i32_1 : i32, i32, i32
  }
  func.func @transform_10(%arg0: i32) -> (i32, i32, i32) {
    %c0_i32 = arith.constant 0 : i32
    %c0_i32_0 = arith.constant 0 : i32
    %c0_i32_1 = arith.constant 0 : i32
    %c0_i32_2 = arith.constant 0 : i32
    return %c0_i32, %c0_i32_0, %c0_i32_1 : i32, i32, i32
  }
  func.func @transform_11(%arg0: i32) -> (i32, i32, i32) {
    %c0_i32 = arith.constant 0 : i32
    %c0_i32_0 = arith.constant 0 : i32
    %c0_i32_1 = arith.constant 0 : i32
    %c0_i32_2 = arith.constant 0 : i32
    return %c0_i32, %c0_i32_0, %c0_i32_1 : i32, i32, i32
  }
  func.func @transform_12(%arg0: i32) -> (i32, i32, i32, i32) {
    %c0_i32 = arith.constant 0 : i32
    %c0_i32_0 = arith.constant 0 : i32
    %c0_i32_1 = arith.constant 0 : i32
    %c0_i32_2 = arith.constant 0 : i32
    return %arg0, %c0_i32, %c0_i32_0, %c0_i32_1 : i32, i32, i32, i32
  }
}

</mosaic_0001>

<bundles_post_ra>
// kernel: multi_gcn_forward.1
= control target key start
LH: loop header
LB: loop body
LE: loop exit
PB: predicated region body
PF: predicated region fallthrough
CT: control target
= control target key end

     0   :  { %17 = vsyncpa [#allocation3], 0  ;;  %s6084_s0 = inlined_call_operand.vmem [shape: f32[1,72,128], index: 0, kind: input, shape index: {}]   ;;  %s6085_s1 = inlined_call_operand.hbm [shape: bf16[128,128], index: 1, kind: input, shape index: {}]   ;;  %s6086_s2 = inlined_call_operand.hbm [shape: bf16[72,72], index: 2, kind: input, shape index: {}]   ;;  %s6087_s3 = inlined_call_operand.hbm [shape: f32[72,128], index: 3, kind: input, shape index: {}]   ;;  %s6088_s4 = inlined_call_operand.hbm [shape: f32[72,128], index: 4, kind: input, shape index: {}]   ;;  %s6089_s5 = inlined_call_operand.hbm [shape: bf16[6,128,128], index: 5, kind: input, shape index: {}]   ;;  %s6090_s6 = inlined_call_operand.vmem [shape: bf16[6,72,72], index: 6, kind: input, shape index: {}]   ;;  %s6091_s7 = inlined_call_operand.hbm [shape: f32[6,72,128], index: 7, kind: input, shape index: {}]   ;;  %s6092_s8 = inlined_call_operand.hbm [shape: f32[6,72,128], index: 8, kind: input, shape index: {}]   ;;  %s6093_s9 = inlined_call_operand.hbm [shape: bf16[3,128,128], index: 9, kind: input, shape index: {}]   ;;  %s6094_s10 = inlined_call_operand.vmem [shape: bf16[3,72,72], index: 10, kind: input, shape index: {}]   ;;  %s6095_s11 = inlined_call_operand.hbm [shape: f32[3,72,128], index: 11, kind: input, shape index: {}]   ;;  %s6096_s12 = inlined_call_operand.vmem [shape: f32[1,3,72,128], index: 12, kind: output, shape index: {}]  }
   0x1   :  { %18 = vsyncpa [#allocation5], 0 }
   0x2   :  { %19 = vsyncpa [#allocation8], 0 }
   0x3   :  { %20 = vsyncpa [#allocation11], 0 }
   0x4   :  { %21 = vsyncpa [#allocation14], 0  ;;  %s4976_s21 = smov [#allocation4]   ;;  %s4768_s25 = scalar_lea.hbm %s6086_s2, 576 }
   0x5   :  { %s41_s22 = sshll.u32 %s4976_s21, 4  ;;  %p4769_p0 = scmp.ne.s32.totalorder %s6086_s2, %s4768_s25  ;;  %s42_s22 = int_to_ptr.vmem [resolvable:$true] %s41_s22 }
   0x6   :  { %p4772_p1 = scmp.lt.u32.totalorder %s4768_s25, %s6086_s2 }
   0x8   :  { %p4774_p2 = pnand %p4772_p1, %p4769_p0 }
   0xa   :  { %4777 = shalt.err (!%p4774_p2)
}
   0xb   :  { %s4778_s30 = scalar_lea.vmem %s42_s22, 576  ;;  %p4783_p4 = scmp.lt.s32.totalorder %s42_s22, %s42_s22 }
   0xc   :  { %p4779_p3 = scmp.ne.s32.totalorder %s42_s22, %s4778_s30  ;;  %p4784_p5 = scmp.lt.s32.totalorder %s4778_s30, %s4778_s30 }
   0xe   :  { %p4785_p6 = por %p4784_p5, %p4783_p4 }
  0x10   :  { %p4786_p7 = pnand %p4785_p6, %p4779_p3 }
  0x12   :  { %4789 = shalt.err (!%p4786_p7)
}
  0x13   :  { %s4977_s13 = smov 64   ;;  %s4978_s14 = smov 4  }
  0x14   :  { %47 = dma.hbm_to_vmem [thread:$0]  %s6086_s2, 576, %s42_s22, [#allocation5], %s4977_s13, %s4977_s13, %s4978_s14  }
  0x15   :  { %s4979_s17 = smov [#allocation7]   ;;  %s4980_s19 = smov [#allocation10]  }
  0x16   :  { %s65_s18 = sshll.u32 %s4979_s17, 4  ;;  %s91_s20 = sshll.u32 %s4980_s19, 4  ;;  %s66_s18 = int_to_ptr.vmem [resolvable:$true] %s65_s18  ;;  %s92_s20 = int_to_ptr.vmem [resolvable:$true] %s91_s20 }
  0x17   :  { %s4790_s24 = scalar_lea.hbm %s6088_s4, 1152 }
  0x18   :  { %p4791_p8 = scmp.ne.s32.totalorder %s6088_s4, %s4790_s24  ;;  %p4794_p9 = scmp.lt.u32.totalorder %s4790_s24, %s6088_s4 }
  0x1a   :  { %p4796_p10 = pnand %p4794_p9, %p4791_p8 }
  0x1c   :  { %4799 = shalt.err (!%p4796_p10)
}
  0x1d   :  { %s4800_s2 = scalar_lea.vmem %s66_s18, 1152  ;;  %p4805_p12 = scmp.lt.s32.totalorder %s66_s18, %s66_s18 }
  0x1e   :  { %p4801_p11 = scmp.ne.s32.totalorder %s66_s18, %s4800_s2  ;;  %p4806_p13 = scmp.lt.s32.totalorder %s4800_s2, %s4800_s2 }
  0x20   :  { %p4807_p0 = por %p4806_p13, %p4805_p12 }
  0x22   :  { %p4808_p1 = pnand %p4807_p0, %p4801_p11 }
  0x24   :  { %4811 = shalt.err (!%p4808_p1)
}
  0x25   :  { %s4981_s22 = smov 128   ;;  %s4982_s29 = smov 8  }
  0x26   :  { %71 = dma.hbm_to_vmem [thread:$0]  %s6088_s4, 1152, %s66_s18, [#allocation8], %s4981_s22, %s4981_s22, %s4982_s29  }
  0x27   :  { %s4812_s19 = scalar_lea.hbm %s6091_s7, 6912 }
  0x28   :  { %p4813_p2 = scmp.ne.s32.totalorder %s6091_s7, %s4812_s19  ;;  %p4816_p3 = scmp.lt.u32.totalorder %s4812_s19, %s6091_s7 }
  0x2a   :  { %p4818_p4 = pnand %p4816_p3, %p4813_p2 }
  0x2c   :  { %4821 = shalt.err (!%p4818_p4)
}
  0x2d   :  { %s4822_s26 = scalar_lea.vmem %s92_s20, 6912  ;;  %p4827_p6 = scmp.lt.s32.totalorder %s92_s20, %s92_s20 }
  0x2e   :  { %p4823_p5 = scmp.ne.s32.totalorder %s92_s20, %s4822_s26  ;;  %p4828_p7 = scmp.lt.s32.totalorder %s4822_s26, %s4822_s26 }
  0x30   :  { %p4829_p8 = por %p4828_p7, %p4827_p6 }
  0x32   :  { %p4830_p9 = pnand %p4829_p8, %p4823_p5 }
  0x34   :  { %4833 = shalt.err (!%p4830_p9)
}
  0x35   :  { %97 = dma.hbm_to_vmem [thread:$0]  %s6091_s7, 6912, %s92_s20, [#allocation11], %s4981_s22, %s4981_s22, %s4982_s29  }
  0x36   :  { %s4983_s27 = smov [#allocation13]   ;;  %s4984_s2 = smov [#allocation2]  }
  0x37   :  { %s115_s28 = sshll.u32 %s4983_s27, 4  ;;  %s29_s30 = sshll.u32 %s4984_s2, 4  ;;  %s116_s28 = int_to_ptr.vmem [resolvable:$true] %s115_s28  ;;  %s30_s30 = int_to_ptr.vmem [resolvable:$true] %s29_s30 }
  0x38   :  { %s4834_s17 = scalar_lea.hbm %s6093_s9, 3072 }
  0x39   :  { %p4835_p10 = scmp.ne.s32.totalorder %s6093_s9, %s4834_s17  ;;  %p4838_p11 = scmp.lt.u32.totalorder %s4834_s17, %s6093_s9 }
  0x3b   :  { %p4840_p12 = pnand %p4838_p11, %p4835_p10 }
  0x3d   :  { %4843 = shalt.err (!%p4840_p12)
}
  0x3e   :  { %s4844_s7 = scalar_lea.vmem %s116_s28, 3072  ;;  %p4849_p0 = scmp.lt.s32.totalorder %s116_s28, %s116_s28 }
  0x3f   :  { %p4845_p13 = scmp.ne.s32.totalorder %s116_s28, %s4844_s7  ;;  %p4850_p1 = scmp.lt.s32.totalorder %s4844_s7, %s4844_s7 }
  0x41   :  { %p4851_p2 = por %p4850_p1, %p4849_p0 }
  0x43   :  { %p4852_p3 = pnand %p4851_p2, %p4845_p13 }
  0x45   :  { %4855 = shalt.err (!%p4852_p3)
}
  0x46   :  { %121 = dma.hbm_to_vmem [thread:$0]  %s6093_s9, 3072, %s116_s28, [#allocation14], %s4977_s13, %s4977_s13, %s4978_s14  }
  0x47   :  { %s4856_s18 = scalar_lea.hbm %s6085_s1, 1024 }
  0x48   :  { %p4857_p4 = scmp.ne.s32.totalorder %s6085_s1, %s4856_s18  ;;  %p4860_p5 = scmp.lt.u32.totalorder %s4856_s18, %s6085_s1 }
  0x4a   :  { %p4862_p6 = pnand %p4860_p5, %p4857_p4 }
  0x4c   :  { %4865 = shalt.err (!%p4862_p6)
}
  0x4d   :  { %s4866_s17 = scalar_lea.vmem %s30_s30, 1024  ;;  %p4871_p8 = scmp.lt.s32.totalorder %s30_s30, %s30_s30 }
  0x4e   :  { %p4867_p7 = scmp.ne.s32.totalorder %s30_s30, %s4866_s17  ;;  %p4872_p9 = scmp.lt.s32.totalorder %s4866_s17, %s4866_s17 }
  0x50   :  { %p4873_p10 = por %p4872_p9, %p4871_p8 }
  0x52   :  { %p4874_p11 = pnand %p4873_p10, %p4867_p7 }
  0x54   :  { %4877 = shalt.err (!%p4874_p11)
}
  0x55   :  { %35 = dma.hbm_to_vmem [thread:$0]  %s6085_s1, 1024, %s30_s30, [#allocation3], %s4977_s13, %s4977_s13, %s4978_s14  }
  0x56   :  { %s4985_s19 = smov [#allocation6]   ;;  %s4986_s23 = smov [#allocation9]  }
  0x57   :  { %s53_s21 = sshll.u32 %s4985_s19, 4  ;;  %s77_s24 = sshll.u32 %s4986_s23, 4  ;;  %s54_s21 = int_to_ptr.vmem [resolvable:$true] %s53_s21  ;;  %s78_s24 = int_to_ptr.vmem [resolvable:$true] %s77_s24 }
  0x58   :  { %s4878_s25 = scalar_lea.hbm %s6087_s3, 1152 }
  0x59   :  { %p4879_p12 = scmp.ne.s32.totalorder %s6087_s3, %s4878_s25  ;;  %p4882_p13 = scmp.lt.u32.totalorder %s4878_s25, %s6087_s3 }
  0x5b   :  { %p4884_p0 = pnand %p4882_p13, %p4879_p12 }
  0x5d   :  { %4887 = shalt.err (!%p4884_p0)
}
  0x5e   :  { %s4888_s1 = scalar_lea.vmem %s54_s21, 1152  ;;  %p4893_p2 = scmp.lt.s32.totalorder %s54_s21, %s54_s21 }
  0x5f   :  { %p4889_p1 = scmp.ne.s32.totalorder %s54_s21, %s4888_s1  ;;  %p4894_p3 = scmp.lt.s32.totalorder %s4888_s1, %s4888_s1 }
  0x61   :  { %p4895_p4 = por %p4894_p3, %p4893_p2 }
  0x63   :  { %p4896_p5 = pnand %p4895_p4, %p4889_p1 }
  0x65   :  { %4899 = shalt.err (!%p4896_p5)
}
  0x66   :  { %59 = dma.hbm_to_vmem [thread:$0]  %s6087_s3, 1152, %s54_s21, [#allocation5], %s4981_s22, %s4981_s22, %s4982_s29  }
  0x67   :  { %s4900_s17 = scalar_lea.hbm %s6089_s5, 6144 }
  0x68   :  { %p4901_p6 = scmp.ne.s32.totalorder %s6089_s5, %s4900_s17  ;;  %p4904_p7 = scmp.lt.u32.totalorder %s4900_s17, %s6089_s5 }
  0x6a   :  { %p4906_p8 = pnand %p4904_p7, %p4901_p6 }
  0x6c   :  { %4909 = shalt.err (!%p4906_p8)
}
  0x6d   :  { %s4910_s7 = scalar_lea.vmem %s78_s24, 6144  ;;  %p4915_p10 = scmp.lt.s32.totalorder %s78_s24, %s78_s24 }
  0x6e   :  { %p4911_p9 = scmp.ne.s32.totalorder %s78_s24, %s4910_s7  ;;  %p4916_p11 = scmp.lt.s32.totalorder %s4910_s7, %s4910_s7 }
  0x70   :  { %p4917_p12 = por %p4916_p11, %p4915_p10 }
  0x72   :  { %p4918_p13 = pnand %p4917_p12, %p4911_p9 }
  0x74   :  { %4921 = shalt.err (!%p4918_p13)
}
  0x75   :  { %83 = dma.hbm_to_vmem [thread:$0]  %s6089_s5, 6144, %s78_s24, [#allocation8], %s4977_s13, %s4977_s13, %s4978_s14  }
  0x76   :  { %s4987_s20 = smov [#allocation12]   ;;  %s4988_s26 = smov [#allocation15]  }
  0x77   :  { %s103_s25 = sshll.u32 %s4987_s20, 4  ;;  %s129_s4 = sshll.u32 %s4988_s26, 4  ;;  %s104_s25 = int_to_ptr.vmem [resolvable:$true] %s103_s25  ;;  %s130_s4 = int_to_ptr.vmem [resolvable:$true] %s129_s4 }
  0x78   :  { %s4922_s1 = scalar_lea.hbm %s6092_s8, 6912 }
  0x79   :  { %p4923_p0 = scmp.ne.s32.totalorder %s6092_s8, %s4922_s1  ;;  %p4926_p1 = scmp.lt.u32.totalorder %s4922_s1, %s6092_s8 }
  0x7b   :  { %p4928_p2 = pnand %p4926_p1, %p4923_p0 }
  0x7d   :  { %4931 = shalt.err (!%p4928_p2)
}
  0x7e   :  { %s4932_s5 = scalar_lea.vmem %s104_s25, 6912  ;;  %p4937_p4 = scmp.lt.s32.totalorder %s104_s25, %s104_s25 }
  0x7f   :  { %p4933_p3 = scmp.ne.s32.totalorder %s104_s25, %s4932_s5  ;;  %p4938_p5 = scmp.lt.s32.totalorder %s4932_s5, %s4932_s5 }
  0x81   :  { %p4939_p6 = por %p4938_p5, %p4937_p4 }
  0x83   :  { %p4940_p7 = pnand %p4939_p6, %p4933_p3 }
  0x85   :  { %4943 = shalt.err (!%p4940_p7)
}
  0x86   :  { %109 = dma.hbm_to_vmem [thread:$0]  %s6092_s8, 6912, %s104_s25, [#allocation11], %s4981_s22, %s4981_s22, %s4982_s29  }
  0x87   :  { %s4944_s9 = scalar_lea.hbm %s6095_s11, 3456 }
  0x88   :  { %p4945_p8 = scmp.ne.s32.totalorder %s6095_s11, %s4944_s9  ;;  %p4948_p9 = scmp.lt.u32.totalorder %s4944_s9, %s6095_s11 }
  0x8a   :  { %p4950_p10 = pnand %p4948_p9, %p4945_p8 }
  0x8c   :  { %4953 = shalt.err (!%p4950_p10)
}
  0x8d   :  { %s4954_s3 = scalar_lea.vmem %s130_s4, 3456  ;;  %p4959_p12 = scmp.lt.s32.totalorder %s130_s4, %s130_s4 }
  0x8e   :  { %p4955_p11 = scmp.ne.s32.totalorder %s130_s4, %s4954_s3  ;;  %p4960_p13 = scmp.lt.s32.totalorder %s4954_s3, %s4954_s3 }
  0x90   :  { %p4961_p0 = por %p4960_p13, %p4959_p12 }
  0x92   :  { %p4962_p1 = pnand %p4961_p0, %p4955_p11 }
  0x94   :  { %4965 = shalt.err (!%p4962_p1)
}
  0x95   :  { %135 = dma.hbm_to_vmem [thread:$0]  %s6095_s11, 3456, %s130_s4, [#allocation14], %s4981_s22, %s4981_s22, %s4982_s29  }
  0x96   :  { %4966 = dma.done.wait [#allocation3], 1024  }
  0x97   :  { %4967 = vsyncadd [#allocation3], 4294966272 }
  0x98   :  { %4968 = dma.done.wait [#allocation5], 1728  }
  0x99   :  { %4969 = vsyncadd [#allocation5], 4294965568 }
  0x9a   :  { %4970 = dma.done.wait [#allocation8], 7296  }
  0x9b   :  { %4971 = vsyncadd [#allocation8], 4294960000 }
  0x9c   :  { %4972 = dma.done.wait [#allocation11], 13824  }
  0x9d   :  { %4973 = vsyncadd [#allocation11], 4294953472 }
  0x9e   :  { %4974 = dma.done.wait [#allocation14], 6528  }
  0x9f   :  { %4975 = vsyncadd [#allocation14], 4294960768  ;;  %v4989_v0 = vmov 0.0   ;;  %vm4990_vm0 = vmmov 0   ;;  %v4512_v1 = vld [vmem:[#allocation2] sm:$0xff]   ;;  %v4513_v2 = vld [vmem:[#allocation2 + $0x8] sm:$0xff]  }
  0xa0   :  { %3837 = vmatprep.subr.bf16.mxu0 %v4989_v0  ;;  %3853 = vmatprep.mubr.msk.bf16.mxu0 %vm4990_vm0, %v4989_v0  ;;  %v4514_v3 = vld [vmem:[#allocation2 + $0x10] sm:$0xff]   ;;  %v4515_v4 = vld [vmem:[#allocation2 + $0x18] sm:$0xff]   ;;  %v4516_v5 = vld [vmem:[#allocation2 + $0x20] sm:$0xff]   ;;  %vm385_vm1 = vcmask 1043456   ;;  %vm369_vm2 = vcmask 588800  }
  0xa1   :  { %3873 = vmatprep.subr.bf16.mxu1 %v4989_v0  ;;  %3883 = vmatprep.mubr.msk.bf16.mxu1 %vm4990_vm0, %v4989_v0  ;;  %v4517_v6 = vld [vmem:[#allocation2 + $0x28] sm:$0xff]   ;;  %v4518_v7 = vld [vmem:[#allocation2 + $0x30] sm:$0xff]   ;;  %v4519_v8 = vld [vmem:[#allocation2 + $0x38] sm:$0xff]  }
  0xa2   :  { %3838 = vmatpush3.bf16.msra.mxu0 %v4512_v1  ;;  %v164_v9 = vld [vmem:[%s6084_s0] sm:$0xff]  ;;  %v165_v10 = vld [vmem:[%s6084_s0 + $0x8] sm:$0xff]  ;;  %v166_v12 = vld [vmem:[%s6084_s0 + $0x10] sm:$0xff] }
  0xa3   :  { %3839 = vmatprep.subr.bf16.mxu0 %v4989_v0  ;;  %v216_v11 = vpack.c.bf16 %v165_v10, %v164_v9  ;;  %v167_v13 = vld [vmem:[%s6084_s0 + $0x18] sm:$0xff]  ;;  %v168_v15 = vld [vmem:[%s6084_s0 + $0x20] sm:$0xff]  ;;  %v169_v16 = vld [vmem:[%s6084_s0 + $0x28] sm:$0xff] }
  0xa4   :  { %v217_v14 = vpack.c.bf16 %v167_v13, %v166_v12  ;;  %v218_v17 = vpack.c.bf16 %v169_v16, %v168_v15  ;;  %v170_v18 = vld [vmem:[%s6084_s0 + $0x30] sm:$0xff]  ;;  %v171_v19 = vld [vmem:[%s6084_s0 + $0x38] sm:$0xff]  ;;  %v172_v21 = vld [vmem:[%s6084_s0 + $0x40] sm:$0xff] }
  0xa5   :  { %v219_v20 = vpack.c.bf16 %v171_v19, %v170_v18  ;;  %v220_v22 = vpack.c.bf16 %v172_v21, %v172_v21  ;;  %v4520_v49 = vld [vmem:[#allocation4] sm:$0xff]   ;;  %v4525_v50 = vld [vmem:[#allocation9] sm:$0xff]   ;;  %v4521_v52 = vld [vmem:[#allocation4 + $0x8] sm:$0xff]  }
  0xa6   :  { %3840 = vmatpush3.bf16.msra.mxu0 %v4513_v2  ;;  %v4526_v51 = vld [vmem:[#allocation9 + $0x8] sm:$0xff]   ;;  %v4527_v53 = vld [vmem:[#allocation9 + $0x10] sm:$0xff]   ;;  %v4528_v54 = vld [vmem:[#allocation9 + $0x18] sm:$0xff]  }
  0xa7   :  { %3841 = vmatprep.subr.bf16.mxu0 %v4989_v0  ;;  %v4522_v55 = vld [vmem:[#allocation4 + $0x10] sm:$0xff]   ;;  %v4523_v57 = vld [vmem:[#allocation4 + $0x18] sm:$0xff]   ;;  %v4524_v58 = vld [vmem:[#allocation4 + $0x20] ss:$0 sps:$4 sm:$0xff]  }
  0xa8   :  { %v4529_v56 = vld [vmem:[#allocation9 + $0x20] sm:$0xff]   ;;  %v4530_v59 = vld [vmem:[#allocation9 + $0x28] sm:$0xff]   ;;  %v4531_v60 = vld [vmem:[#allocation9 + $0x30] sm:$0xff]  }
  0xa9   :  { %v4532_v61 = vld [vmem:[#allocation9 + $0x38] sm:$0xff]   ;;  %v198_v62 = vld [vmem:[#allocation6] sm:$0xff]  ;;  %v200_v12 = vld [vmem:[#allocation6 + $0x10] sm:$0xff] }
  0xaa   :  { %3842 = vmatpush3.bf16.msra.mxu0 %v4514_v3  ;;  %v207_v63 = vld [vmem:[#allocation7] sm:$0xff]  ;;  %v201_v16 = vld [vmem:[#allocation6 + $0x18] sm:$0xff] }
  0xab   :  { %3843 = vmatprep.subr.bf16.mxu0 %v4989_v0  ;;  %v199_v2 = vld [vmem:[#allocation6 + $0x8] sm:$0xff] }
  0xae   :  { %3844 = vmatpush3.bf16.msra.mxu0 %v4515_v4 }
  0xaf   :  { %3845 = vmatprep.subr.bf16.mxu0 %v4989_v0 }
  0xb2   :  { %3846 = vmatpush3.bf16.msra.mxu0 %v4516_v5  ;;  %v208_v5 = vld [vmem:[#allocation7 + $0x8] sm:$0xff] }
  0xb3   :  { %3847 = vmatprep.subr.bf16.mxu0 %v4989_v0 }
  0xb6   :  { %3848 = vmatpush3.bf16.msra.mxu0 %v4517_v6 }
  0xb7   :  { %3849 = vmatprep.subr.bf16.mxu0 %v4989_v0 }
  0xba   :  { %3850 = vmatpush3.bf16.msra.mxu0 %v4518_v7 }
  0xbb   :  { %3851 = vmatprep.subr.bf16.mxu0 %v4989_v0 }
  0xbe   :  { %3852 = vmatpush3.bf16.msra.mxu0 %v4519_v8 }
  0xbf   :  { %3939 = vmatprep.subr.bf16.mxu0 %v4989_v0 }
  0xc1   :  { %3854 = vmatmul.mubr.bf16.vlgmr.msra.gmra.mrb[0].mxu0 %v216_v11 }
  0xc2   :  { %3857 = vmatprep.mubr.msk.bf16.mxu0 %vm4990_vm0, %v4989_v0 }
  0xc9   :  { %3858 = vmatmul.mubr.bf16.gmra.mrb[4].mxu0 %v217_v14  ;;  %v209_v14 = vld [vmem:[#allocation7 + $0x10] sm:$0xff] }
  0xca   :  { %3861 = vmatprep.mubr.msk.bf16.mxu0 %vm4990_vm0, %v4989_v0 }
  0xd1   :  { %3862 = vmatmul.mubr.bf16.gmra.mrb[8].mxu0 %v218_v17 }
  0xd2   :  { %3865 = vmatprep.mubr.msk.bf16.mxu0 %vm4990_vm0, %v4989_v0 }
  0xd9   :  { %3866 = vmatmul.mubr.bf16.gmra.mrb[12].mxu0 %v219_v20 }
  0xda   :  { %3869 = vmatprep.mubr.msk.bf16.mxu0 %vm4990_vm0, %v4989_v0 }
  0xe1   :  { %3870 = vmatmul.mubr.bf16.gmra.mrb[16].mxu0 %v220_v22  ;;  %v210_v22 = vld [vmem:[#allocation7 + $0x18] sm:$0xff] }
  0xe2   :  { %3949 = vmatprep.mubr.msk.bf16.mxu0 %vm4990_vm0, %v4989_v0 }
 0x194   :  { %v303_v23 = vpop.f32.mrb[0].mxu0 }
 0x195   :  { %v3855_v24 = vpop.f32.mrb[1].mxu0 }
 0x196   :  { %v306_v25 = vpop.f32.mrb[2].mxu0 }
 0x197   :  { %v341_v26 = vpack.c.bf16 %v306_v25, %v303_v23  ;;  %v3856_v27 = vpop.f32.mrb[3].mxu0 }
 0x199   :  { %3874 = vmatpush3.bf16.msra.mxu1 %v341_v26 }
 0x19a   :  { %3875 = vmatprep.subr.bf16.mxu1 %v4989_v0 }
 0x19c   :  { %v311_v28 = vpop.f32.mrb[4].mxu0 }
 0x19d   :  { %v3859_v29 = vpop.f32.mrb[5].mxu0 }
 0x19e   :  { %v314_v30 = vpop.f32.mrb[6].mxu0  ;;  %v202_v29 = vld [vmem:[#allocation6 + $0x20] sm:$0xff] }
 0x19f   :  { %v342_v31 = vpack.c.bf16 %v314_v30, %v311_v28  ;;  %v3860_v32 = vpop.f32.mrb[7].mxu0 }
 0x1a1   :  { %3876 = vmatpush3.bf16.msra.mxu1 %v342_v31  ;;  %v211_v31 = vld [vmem:[#allocation7 + $0x20] sm:$0xff] }
 0x1a2   :  { %3877 = vmatprep.subr.bf16.mxu1 %v4989_v0 }
 0x1a4   :  { %v319_v33 = vpop.f32.mrb[8].mxu0 }
 0x1a5   :  { %v3863_v34 = vpop.f32.mrb[9].mxu0 }
 0x1a6   :  { %v322_v35 = vpop.f32.mrb[10].mxu0 }
 0x1a7   :  { %v343_v36 = vpack.c.bf16 %v322_v35, %v319_v33  ;;  %v3864_v37 = vpop.f32.mrb[11].mxu0  ;;  %v203_v33 = vld [vmem:[#allocation6 + $0x28] sm:$0xff] }
 0x1a9   :  { %3878 = vmatpush3.bf16.msra.mxu1 %v343_v36 }
 0x1aa   :  { %3879 = vmatprep.subr.bf16.mxu1 %v4989_v0 }
 0x1ac   :  { %v327_v38 = vpop.f32.mrb[12].mxu0 }
 0x1ad   :  { %v3867_v39 = vpop.f32.mrb[13].mxu0 }
 0x1ae   :  { %v330_v40 = vpop.f32.mrb[14].mxu0 }
 0x1af   :  { %v344_v41 = vpack.c.bf16 %v330_v40, %v327_v38  ;;  %v3868_v42 = vpop.f32.mrb[15].mxu0  ;;  %v212_v38 = vld [vmem:[#allocation7 + $0x28] sm:$0xff] }
 0x1b1   :  { %3880 = vmatpush3.bf16.msra.mxu1 %v344_v41 }
 0x1b2   :  { %3881 = vmatprep.subr.bf16.mxu1 %v4989_v0 }
 0x1b4   :  { %v335_v43 = vpop.f32.mrb[16].mxu0 }
 0x1b5   :  { %v345_v44 = vpack.c.bf16 %v335_v43, %v335_v43  ;;  %v3871_v45 = vpop.f32.mrb[17].mxu0 }
 0x1b6   :  { %v338_v46 = vpop.f32.mrb[18].mxu0 }
 0x1b7   :  { %v3872_v47 = vpop.f32.mrb[19].mxu0  ;;  %v387_v48 = vsel %vm385_vm1, %v345_v44, 0  ;;  %v204_v46 = vld [vmem:[#allocation6 + $0x30] sm:$0xff] }
 0x1b8   :  { %3882 = vmatpush3.bf16.msra.mxu1 %v387_v48  ;;  %v213_v48 = vld [vmem:[#allocation7 + $0x30] sm:$0xff] }
 0x1b9   :  { %3903 = vmatprep.subr.bf16.mxu1 %v4989_v0 }
 0x1bb   :  { %3884 = vmatmul.mubr.msk.bf16.vlgmr.msra.gmra.mrb[0].mxu1 %vm369_vm2, %v4520_v49 }
 0x1bc   :  { %3887 = vmatprep.mubr.msk.bf16.mxu1 %vm4990_vm0, %v4989_v0  ;;  %3904 = vmatpush3.bf16.msra.mxu1 %v4525_v50  ;;  %v205_v50 = vld [vmem:[#allocation6 + $0x38] sm:$0xff] }
 0x1bd   :  { %3905 = vmatprep.subr.bf16.mxu1 %v4989_v0 }
 0x1c0   :  { %3906 = vmatpush3.bf16.msra.mxu1 %v4526_v51 }
 0x1c1   :  { %3907 = vmatprep.subr.bf16.mxu1 %v4989_v0 }
 0x1c3   :  { %3888 = vmatmul.mubr.msk.bf16.gmra.mrb[4].mxu1 %vm369_vm2, %v4521_v52 }
 0x1c4   :  { %3891 = vmatprep.mubr.msk.bf16.mxu1 %vm4990_vm0, %v4989_v0  ;;  %3908 = vmatpush3.bf16.msra.mxu1 %v4527_v53 }
 0x1c5   :  { %3909 = vmatprep.subr.bf16.mxu1 %v4989_v0 }
 0x1c8   :  { %3910 = vmatpush3.bf16.msra.mxu1 %v4528_v54 }
 0x1c9   :  { %3911 = vmatprep.subr.bf16.mxu1 %v4989_v0 }
 0x1cb   :  { %3892 = vmatmul.mubr.msk.bf16.gmra.mrb[8].mxu1 %vm369_vm2, %v4522_v55  ;;  %v214_v55 = vld [vmem:[#allocation7 + $0x38] sm:$0xff] }
 0x1cc   :  { %3895 = vmatprep.mubr.msk.bf16.mxu1 %vm4990_vm0, %v4989_v0  ;;  %3912 = vmatpush3.bf16.msra.mxu1 %v4529_v56 }
 0x1cd   :  { %3913 = vmatprep.subr.bf16.mxu1 %v4989_v0 }
 0x1d0   :  { %3914 = vmatpush3.bf16.msra.mxu1 %v4530_v59 }
 0x1d1   :  { %3915 = vmatprep.subr.bf16.mxu1 %v4989_v0 }
 0x1d3   :  { %3896 = vmatmul.mubr.msk.bf16.gmra.mrb[12].mxu1 %vm369_vm2, %v4523_v57 }
 0x1d4   :  { %3899 = vmatprep.mubr.msk.bf16.mxu1 %vm4990_vm0, %v4989_v0  ;;  %3916 = vmatpush3.bf16.msra.mxu1 %v4531_v60 }
 0x1d5   :  { %3917 = vmatprep.subr.bf16.mxu1 %v4989_v0 }
 0x1d8   :  { %3918 = vmatpush3.bf16.msra.mxu1 %v4532_v61 }
 0x1d9   :  { %3969 = vmatprep.subr.bf16.mxu1 %v4989_v0 }
 0x1db   :  { %3900 = vmatmul.mubr.msk.bf16.gmra.mrb[16].mxu1 %vm369_vm2, %v4524_v58 }
 0x1dc   :  { %3919 = vmatprep.mubr.msk.bf16.mxu1 %vm4990_vm0, %v4989_v0 }
 0x28e   :  { %v423_v1 = vpop.f32.mrb[0].mxu1 }
 0x28f   :  { %v461_v3 = vmul.f32 %v423_v1, %v198_v62  ;;  %v3885_v4 = vpop.f32.mrb[1].mxu1 }
 0x290   :  { %v426_v6 = vpop.f32.mrb[2].mxu1 }
 0x291   :  { %v470_v7 = vadd.f32 %v461_v3, %v207_v63  ;;  %v462_v8 = vmul.f32 %v426_v6, %v199_v2  ;;  %v3886_v9 = vpop.f32.mrb[3].mxu1  ;;  %v206_v63 = vld [vmem:[#allocation6 + $0x40] sm:$0xff]  ;;  %v215_v2 = vld [vmem:[#allocation7 + $0x40] sm:$0xff] }
 0x293   :  { %v488_v10 = vmul.f32 0.01, %v470_v7  ;;  %v471_v11 = vadd.f32 %v462_v8, %v208_v5  ;;  %vm479_vm3 = vcmp.gt.f32.partialorder %v470_v7, 0.0 }
 0x295   :  { %vm480_vm4 = vcmp.gt.f32.partialorder %v471_v11, 0.0  ;;  %v489_v13 = vmul.f32 0.01, %v471_v11  ;;  %v5271_v17 = vsel %vm479_vm3, %v470_v7, %v488_v10 }
 0x296   :  { %v431_v15 = vpop.f32.mrb[4].mxu1 }
 0x297   :  { %v5273_v18 = vsel %vm480_vm4, %v471_v11, %v489_v13  ;;  %v463_v19 = vmul.f32 %v431_v15, %v200_v12  ;;  %v3889_v20 = vpop.f32.mrb[5].mxu1  ;;  %v4538_v15 = vld [vmem:[#allocation9 + $0x40] sm:$0xff]  }
 0x298   :  { %v549_v21 = vpack.c.bf16 %v5273_v18, %v5271_v17  ;;  %v434_v23 = vpop.f32.mrb[6].mxu1 }
 0x299   :  { %v472_v24 = vadd.f32 %v463_v19, %v209_v14  ;;  %v464_v25 = vmul.f32 %v434_v23, %v201_v16  ;;  %v3890_v26 = vpop.f32.mrb[7].mxu1  ;;  %v4539_v16 = vld [vmem:[#allocation9 + $0x48] sm:$0xff]   ;;  %v4540_v19 = vld [vmem:[#allocation9 + $0x50] sm:$0xff]  }
 0x29a   :  { %3920 = vmatmul.mubr.bf16.vlgmr.msra.gmra.mrb[20].mxu1 %v549_v21 }
 0x29b   :  { %v490_v27 = vmul.f32 0.01, %v472_v24  ;;  %v473_v28 = vadd.f32 %v464_v25, %v210_v22  ;;  %3923 = vmatprep.mubr.msk.bf16.mxu1 %vm4990_vm0, %v4989_v0  ;;  %vm481_vm5 = vcmp.gt.f32.partialorder %v472_v24, 0.0  ;;  %3970 = vmatpush3.bf16.msra.mxu1 %v4538_v15  ;;  %v534_v15 = vld [vmem:[#allocation10 + $0x18] sm:$0xff] }
 0x29c   :  { %3971 = vmatprep.subr.bf16.mxu1 %v4989_v0 }
 0x29d   :  { %vm482_vm6 = vcmp.gt.f32.partialorder %v473_v28, 0.0  ;;  %v491_v30 = vmul.f32 0.01, %v473_v28  ;;  %v5279_v36 = vsel %vm481_vm5, %v472_v24, %v490_v27 }
 0x29e   :  { %v439_v32 = vpop.f32.mrb[8].mxu1 }
 0x29f   :  { %v465_v34 = vmul.f32 %v439_v32, %v202_v29  ;;  %v3893_v35 = vpop.f32.mrb[9].mxu1  ;;  %v5281_v37 = vsel %vm482_vm6, %v473_v28, %v491_v30  ;;  %3972 = vmatpush3.bf16.msra.mxu1 %v4539_v16 }
 0x2a0   :  { %v442_v39 = vpop.f32.mrb[10].mxu1  ;;  %v550_v40 = vpack.c.bf16 %v5281_v37, %v5279_v36  ;;  %3973 = vmatprep.subr.bf16.mxu1 %v4989_v0 }
 0x2a1   :  { %v474_v41 = vadd.f32 %v465_v34, %v211_v31  ;;  %v466_v42 = vmul.f32 %v442_v39, %v203_v33  ;;  %v3894_v43 = vpop.f32.mrb[11].mxu1 }
 0x2a2   :  { %3924 = vmatmul.mubr.bf16.gmra.mrb[24].mxu1 %v550_v40 }
 0x2a3   :  { %v492_v44 = vmul.f32 0.01, %v474_v41  ;;  %v475_v45 = vadd.f32 %v466_v42, %v212_v38  ;;  %3927 = vmatprep.mubr.msk.bf16.mxu1 %vm4990_vm0, %v4989_v0  ;;  %vm483_vm7 = vcmp.gt.f32.partialorder %v474_v41, 0.0  ;;  %3974 = vmatpush3.bf16.msra.mxu1 %v4540_v19 }
 0x2a4   :  { %3975 = vmatprep.subr.bf16.mxu1 %v4989_v0 }
 0x2a5   :  { %vm484_vm8 = vcmp.gt.f32.partialorder %v475_v45, 0.0  ;;  %v493_v47 = vmul.f32 0.01, %v475_v45  ;;  %v5287_v53 = vsel %vm483_vm7, %v474_v41, %v492_v44 }
 0x2a6   :  { %v447_v49 = vpop.f32.mrb[12].mxu1 }
 0x2a7   :  { %v467_v51 = vmul.f32 %v447_v49, %v204_v46  ;;  %v3897_v52 = vpop.f32.mrb[13].mxu1  ;;  %v5289_v54 = vsel %vm484_vm8, %v475_v45, %v493_v47  ;;  %v4534_v49 = vld [vmem:[%s6090_s6 + $0x8] sm:$0xff]  }
 0x2a8   :  { %v450_v56 = vpop.f32.mrb[14].mxu1  ;;  %v551_v57 = vpack.c.bf16 %v5289_v54, %v5287_v53  ;;  %v4537_v52 = vld [vmem:[%s6090_s6 + $0x20] ss:$0 sps:$4 sm:$0xff]  }
 0x2a9   :  { %v476_v58 = vadd.f32 %v467_v51, %v213_v48  ;;  %v468_v59 = vmul.f32 %v450_v56, %v205_v50  ;;  %v3898_v60 = vpop.f32.mrb[15].mxu1  ;;  %v4533_v48 = vld [vmem:[%s6090_s6] sm:$0xff]   ;;  %v4535_v50 = vld [vmem:[%s6090_s6 + $0x10] sm:$0xff]   ;;  %v4536_v51 = vld [vmem:[%s6090_s6 + $0x18] sm:$0xff]  }
 0x2aa   :  { %3928 = vmatmul.mubr.bf16.gmra.mrb[28].mxu1 %v551_v57  ;;  %v4542_v56 = vld [vmem:[#allocation9 + $0x60] sm:$0xff]   ;;  %v4543_v57 = vld [vmem:[#allocation9 + $0x68] sm:$0xff]  }
 0x2ab   :  { %v494_v61 = vmul.f32 0.01, %v476_v58  ;;  %v477_v62 = vadd.f32 %v468_v59, %v214_v55  ;;  %3931 = vmatprep.mubr.msk.bf16.mxu1 %vm4990_vm0, %v4989_v0  ;;  %vm485_vm9 = vcmp.gt.f32.partialorder %v476_v58, 0.0  ;;  %v4541_v55 = vld [vmem:[#allocation9 + $0x58] sm:$0xff]   ;;  %v531_v60 = vld [vmem:[#allocation10] sm:$0xff] }
 0x2ac   :  { %3976 = vmatpush3.bf16.msra.mxu1 %v4541_v55  ;;  %v4545_v59 = vld [vmem:[#allocation9 + $0x78] sm:$0xff]  }
 0x2ad   :  { %vm486_vm10 = vcmp.gt.f32.partialorder %v477_v62, 0.0  ;;  %v495_v1 = vmul.f32 0.01, %v477_v62  ;;  %v5295_v6 = vsel %vm485_vm9, %v476_v58, %v494_v61  ;;  %3977 = vmatprep.subr.bf16.mxu1 %v4989_v0  ;;  %v4544_v58 = vld [vmem:[#allocation9 + $0x70] sm:$0xff]  }
 0x2ae   :  { %v455_v3 = vpop.f32.mrb[16].mxu1  ;;  %v540_v61 = vld [vmem:[#allocation12] sm:$0xff] }
 0x2af   :  { %v469_v4 = vmul.f32 %v455_v3, %v206_v63  ;;  %v3901_v5 = vpop.f32.mrb[17].mxu1  ;;  %v5297_v7 = vsel %vm486_vm10, %v477_v62, %v495_v1  ;;  %v532_v63 = vld [vmem:[#allocation10 + $0x8] sm:$0xff]  ;;  %v541_v3 = vld [vmem:[#allocation12 + $0x8] sm:$0xff] }
 0x2b0   :  { %v458_v8 = vpop.f32.mrb[18].mxu1  ;;  %v552_v9 = vpack.c.bf16 %v5297_v7, %v5295_v6  ;;  %3978 = vmatpush3.bf16.msra.mxu1 %v4542_v56 }
 0x2b1   :  { %v478_v10 = vadd.f32 %v469_v4, %v215_v2  ;;  %v3902_v11 = vpop.f32.mrb[19].mxu1  ;;  %3979 = vmatprep.subr.bf16.mxu1 %v4989_v0 }
 0x2b2   :  { %3932 = vmatmul.mubr.bf16.gmra.mrb[32].mxu1 %v552_v9  ;;  %v533_v11 = vld [vmem:[#allocation10 + $0x10] sm:$0xff] }
 0x2b3   :  { %vm487_vm11 = vcmp.gt.f32.partialorder %v478_v10, 0.0  ;;  %v496_v12 = vmul.f32 0.01, %v478_v10  ;;  %3935 = vmatprep.mubr.msk.bf16.mxu1 %vm4990_vm0, %v4989_v0 }
 0x2b4   :  { %3980 = vmatpush3.bf16.msra.mxu1 %v4543_v57 }
 0x2b5   :  { %v5303_v13 = vsel %vm487_vm11, %v478_v10, %v496_v12  ;;  %3981 = vmatprep.subr.bf16.mxu1 %v4989_v0  ;;  %v542_v12 = vld [vmem:[#allocation12 + $0x10] sm:$0xff] }
 0x2b6   :  { %v553_v14 = vpack.c.bf16 %v5303_v13, %v5303_v13 }
 0x2b8   :  { %3982 = vmatpush3.bf16.msra.mxu1 %v4544_v58 }
 0x2b9   :  { %3983 = vmatprep.subr.bf16.mxu1 %v4989_v0 }
 0x2ba   :  { %3936 = vmatmul.mubr.bf16.gmra.mrb[36].mxu1 %v553_v14 }
 0x2bb   :  { %3985 = vmatprep.mubr.msk.bf16.mxu1 %vm4990_vm0, %v4989_v0 }
 0x2bc   :  { %3984 = vmatpush3.bf16.msra.mxu1 %v4545_v59 }
 0x2bd   :  { %4035 = vmatprep.subr.bf16.mxu1 %v4989_v0 }
 0x36d   :  { %v636_v20 = vpop.f32.mrb[20].mxu1 }
 0x36e   :  { %v3921_v21 = vpop.f32.mrb[21].mxu1 }
 0x36f   :  { %v639_v22 = vpop.f32.mrb[22].mxu1 }
 0x370   :  { %v674_v23 = vpack.c.bf16 %v639_v22, %v636_v20  ;;  %v3922_v24 = vpop.f32.mrb[23].mxu1  ;;  %v543_v20 = vld [vmem:[#allocation12 + $0x18] sm:$0xff] }
 0x372   :  { %3940 = vmatpush3.bf16.msra.mxu0 %v674_v23 }
 0x373   :  { %3941 = vmatprep.subr.bf16.mxu0 %v4989_v0 }
 0x375   :  { %v644_v25 = vpop.f32.mrb[24].mxu1 }
 0x376   :  { %v3925_v26 = vpop.f32.mrb[25].mxu1 }
 0x377   :  { %v647_v27 = vpop.f32.mrb[26].mxu1  ;;  %v535_v26 = vld [vmem:[#allocation10 + $0x20] sm:$0xff] }
 0x378   :  { %v675_v28 = vpack.c.bf16 %v647_v27, %v644_v25  ;;  %v3926_v29 = vpop.f32.mrb[27].mxu1 }
 0x37a   :  { %3942 = vmatpush3.bf16.msra.mxu0 %v675_v28  ;;  %v544_v28 = vld [vmem:[#allocation12 + $0x20] sm:$0xff] }
 0x37b   :  { %3943 = vmatprep.subr.bf16.mxu0 %v4989_v0 }
 0x37d   :  { %v652_v30 = vpop.f32.mrb[28].mxu1 }
 0x37e   :  { %v3929_v31 = vpop.f32.mrb[29].mxu1 }
 0x37f   :  { %v655_v32 = vpop.f32.mrb[30].mxu1 }
 0x380   :  { %v676_v33 = vpack.c.bf16 %v655_v32, %v652_v30  ;;  %v3930_v34 = vpop.f32.mrb[31].mxu1  ;;  %v536_v30 = vld [vmem:[#allocation10 + $0x28] sm:$0xff] }
 0x381   :  { %v545_v34 = vld [vmem:[#allocation12 + $0x28] sm:$0xff] }
 0x382   :  { %3944 = vmatpush3.bf16.msra.mxu0 %v676_v33 }
 0x383   :  { %3945 = vmatprep.subr.bf16.mxu0 %v4989_v0 }
 0x385   :  { %v660_v35 = vpop.f32.mrb[32].mxu1 }
 0x386   :  { %v3933_v38 = vpop.f32.mrb[33].mxu1 }
 0x387   :  { %v663_v39 = vpop.f32.mrb[34].mxu1 }
 0x388   :  { %v677_v40 = vpack.c.bf16 %v663_v39, %v660_v35  ;;  %v3934_v41 = vpop.f32.mrb[35].mxu1 }
 0x38a   :  { %3946 = vmatpush3.bf16.msra.mxu0 %v677_v40 }
 0x38b   :  { %3947 = vmatprep.subr.bf16.mxu0 %v4989_v0 }
 0x38d   :  { %v668_v42 = vpop.f32.mrb[36].mxu1 }
 0x38e   :  { %v678_v43 = vpack.c.bf16 %v668_v42, %v668_v42  ;;  %v3937_v44 = vpop.f32.mrb[37].mxu1 }
 0x38f   :  { %v671_v45 = vpop.f32.mrb[38].mxu1 }
 0x390   :  { %v718_v46 = vsel %vm385_vm1, %v678_v43, 0  ;;  %v3938_v47 = vpop.f32.mrb[39].mxu1  ;;  %v537_v43 = vld [vmem:[#allocation10 + $0x30] sm:$0xff]  ;;  %v546_v45 = vld [vmem:[#allocation12 + $0x30] sm:$0xff] }
 0x391   :  { %3948 = vmatpush3.bf16.msra.mxu0 %v718_v46  ;;  %v538_v47 = vld [vmem:[#allocation10 + $0x38] sm:$0xff] }
 0x392   :  { %4005 = vmatprep.subr.bf16.mxu0 %v4989_v0 }
 0x394   :  { %3950 = vmatmul.mubr.msk.bf16.vlgmr.msra.gmra.mrb[20].mxu0 %vm369_vm2, %v4533_v48 }
 0x395   :  { %3953 = vmatprep.mubr.msk.bf16.mxu0 %vm4990_vm0, %v4989_v0 }
 0x39c   :  { %3954 = vmatmul.mubr.msk.bf16.gmra.mrb[24].mxu0 %vm369_vm2, %v4534_v49 }
 0x39d   :  { %3957 = vmatprep.mubr.msk.bf16.mxu0 %vm4990_vm0, %v4989_v0 }
 0x3a4   :  { %3958 = vmatmul.mubr.msk.bf16.gmra.mrb[28].mxu0 %vm369_vm2, %v4535_v50 }
 0x3a5   :  { %3961 = vmatprep.mubr.msk.bf16.mxu0 %vm4990_vm0, %v4989_v0 }
 0x3ac   :  { %3962 = vmatmul.mubr.msk.bf16.gmra.mrb[32].mxu0 %vm369_vm2, %v4536_v51  ;;  %v547_v51 = vld [vmem:[#allocation12 + $0x38] sm:$0xff] }
 0x3ad   :  { %3965 = vmatprep.mubr.msk.bf16.mxu0 %vm4990_vm0, %v4989_v0 }
 0x3b4   :  { %3966 = vmatmul.mubr.msk.bf16.gmra.mrb[36].mxu0 %vm369_vm2, %v4537_v52 }
 0x3b5   :  { %4015 = vmatprep.mubr.msk.bf16.mxu0 %vm4990_vm0, %v4989_v0 }
 0x467   :  { %v754_v62 = vpop.f32.mrb[20].mxu0 }
 0x468   :  { %v792_v1 = vmul.f32 %v754_v62, %v531_v60  ;;  %v3951_v2 = vpop.f32.mrb[21].mxu0  ;;  %v539_v60 = vld [vmem:[#allocation10 + $0x40] sm:$0xff]  ;;  %v548_v62 = vld [vmem:[#allocation12 + $0x40] sm:$0xff] }
 0x469   :  { %v757_v4 = vpop.f32.mrb[22].mxu0 }
 0x46a   :  { %v801_v5 = vadd.f32 %v792_v1, %v540_v61  ;;  %v793_v8 = vmul.f32 %v757_v4, %v532_v63  ;;  %v3952_v9 = vpop.f32.mrb[23].mxu0 }
 0x46c   :  { %v802_v10 = vadd.f32 %v793_v8, %v541_v3  ;;  %4642 = vtanh.f32 %v801_v5 }
 0x46e   :  { %4644 = vtanh.f32 %v802_v10 }
 0x46f   :  { %v762_v14 = vpop.f32.mrb[24].mxu0 }
 0x470   :  { %v794_v16 = vmul.f32 %v762_v14, %v533_v11  ;;  %v3955_v19 = vpop.f32.mrb[25].mxu0 }
 0x471   :  { %v765_v21 = vpop.f32.mrb[26].mxu0  ;;  %v4552_v19 = vld [vmem:[#allocation13 + $0x8] sm:$0xff]  }
 0x472   :  { %v803_v22 = vadd.f32 %v794_v16, %v542_v12  ;;  %v795_v23 = vmul.f32 %v765_v21, %v534_v15  ;;  %v3956_v24 = vpop.f32.mrb[27].mxu0  ;;  %v4551_v16 = vld [vmem:[#allocation13] sm:$0xff]  }
 0x474   :  { %v804_v25 = vadd.f32 %v795_v23, %v543_v20  ;;  %4646 = vtanh.f32 %v803_v22  ;;  %v4553_v20 = vld [vmem:[#allocation13 + $0x10] sm:$0xff]  }
 0x476   :  { %4648 = vtanh.f32 %v804_v25  ;;  %v4643_v27 = vpop.eup %4642 }
 0x477   :  { %v770_v29 = vpop.f32.mrb[28].mxu0 }
 0x478   :  { %v4645_v31 = vpop.eup %4644  ;;  %v796_v32 = vmul.f32 %v770_v29, %v535_v26  ;;  %v3959_v33 = vpop.f32.mrb[29].mxu0 }
 0x479   :  { %v773_v35 = vpop.f32.mrb[30].mxu0  ;;  %v866_v38 = vpack.c.bf16 %v4645_v31, %v4643_v27 }
 0x47a   :  { %v805_v39 = vadd.f32 %v796_v32, %v544_v28  ;;  %v797_v40 = vmul.f32 %v773_v35, %v536_v30  ;;  %v3960_v41 = vpop.f32.mrb[31].mxu0 }
 0x47b   :  { %3986 = vmatmul.mubr.bf16.vlgmr.msra.gmra.mrb[40].mxu1 %v866_v38 }
 0x47c   :  { %v806_v42 = vadd.f32 %v797_v40, %v545_v34  ;;  %3989 = vmatprep.mubr.msk.bf16.mxu1 %vm4990_vm0, %v4989_v0  ;;  %4650 = vtanh.f32 %v805_v39  ;;  %4036 = vmatpush3.bf16.msra.mxu1 %v4551_v16  ;;  %v850_v16 = vld [vmem:[#allocation10 + $0x60] sm:$0xff] }
 0x47d   :  { %4037 = vmatprep.subr.bf16.mxu1 %v4989_v0 }
 0x47e   :  { %4652 = vtanh.f32 %v806_v42  ;;  %v4647_v44 = vpop.eup %4646 }
 0x47f   :  { %v778_v46 = vpop.f32.mrb[32].mxu0 }
 0x480   :  { %v4649_v48 = vpop.eup %4648  ;;  %v798_v49 = vmul.f32 %v778_v46, %v537_v43  ;;  %v3963_v50 = vpop.f32.mrb[33].mxu0  ;;  %4038 = vmatpush3.bf16.msra.mxu1 %v4552_v19 }
 0x481   :  { %v781_v52 = vpop.f32.mrb[34].mxu0  ;;  %v867_v55 = vpack.c.bf16 %v4649_v48, %v4647_v44  ;;  %4039 = vmatprep.subr.bf16.mxu1 %v4989_v0  ;;  %v4547_v50 = vld [vmem:[%s6090_s6 + $0x2c] sm:$0xff]  }
 0x482   :  { %v807_v56 = vadd.f32 %v798_v49, %v546_v45  ;;  %v799_v57 = vmul.f32 %v781_v52, %v538_v47  ;;  %v3964_v58 = vpop.f32.mrb[35].mxu0  ;;  %v4546_v49 = vld [vmem:[%s6090_s6 + $0x24] sm:$0xff]   ;;  %v4549_v52 = vld [vmem:[%s6090_s6 + $0x3c] sm:$0xff]  }
 0x483   :  { %3990 = vmatmul.mubr.bf16.gmra.mrb[44].mxu1 %v867_v55  ;;  %v4550_v55 = vld [vmem:[%s6090_s6 + $0x44] ss:$0 sps:$4 sm:$0xff]   ;;  %v4556_v58 = vld [vmem:[#allocation13 + $0x28] sm:$0xff]  }
 0x484   :  { %v808_v59 = vadd.f32 %v799_v57, %v547_v51  ;;  %3993 = vmatprep.mubr.msk.bf16.mxu1 %vm4990_vm0, %v4989_v0  ;;  %4654 = vtanh.f32 %v807_v56  ;;  %4040 = vmatpush3.bf16.msra.mxu1 %v4553_v20  ;;  %v4548_v51 = vld [vmem:[%s6090_s6 + $0x34] sm:$0xff]   ;;  %v4554_v56 = vld [vmem:[#allocation13 + $0x18] sm:$0xff]  }
 0x485   :  { %4041 = vmatprep.subr.bf16.mxu1 %v4989_v0  ;;  %v4555_v57 = vld [vmem:[#allocation13 + $0x20] sm:$0xff]  }
 0x486   :  { %4656 = vtanh.f32 %v808_v59  ;;  %v4651_v61 = vpop.eup %4650  ;;  %v4557_v59 = vld [vmem:[#allocation13 + $0x30] sm:$0xff]  }
 0x487   :  { %v786_v63 = vpop.f32.mrb[36].mxu0 }
 0x488   :  { %v4653_v1 = vpop.eup %4652  ;;  %v800_v2 = vmul.f32 %v786_v63, %v539_v60  ;;  %v3967_v3 = vpop.f32.mrb[37].mxu0  ;;  %4042 = vmatpush3.bf16.msra.mxu1 %v4554_v56  ;;  %v4558_v60 = vld [vmem:[#allocation13 + $0x38] sm:$0xff]   ;;  %v864_v56 = vld [vmem:[#allocation12 + $0x80] sm:$0xff] }
 0x489   :  { %v789_v4 = vpop.f32.mrb[38].mxu0  ;;  %v868_v5 = vpack.c.bf16 %v4653_v1, %v4651_v61  ;;  %4043 = vmatprep.subr.bf16.mxu1 %v4989_v0  ;;  %v847_v61 = vld [vmem:[#allocation10 + $0x48] sm:$0xff]  ;;  %v848_v1 = vld [vmem:[#allocation10 + $0x50] sm:$0xff] }
 0x48a   :  { %v809_v8 = vadd.f32 %v800_v2, %v548_v62  ;;  %v3968_v9 = vpop.f32.mrb[39].mxu0  ;;  %v857_v62 = vld [vmem:[#allocation12 + $0x48] sm:$0xff]  ;;  %v858_v4 = vld [vmem:[#allocation12 + $0x50] sm:$0xff] }
 0x48b   :  { %3994 = vmatmul.mubr.bf16.gmra.mrb[48].mxu1 %v868_v5 }
 0x48c   :  { %4658 = vtanh.f32 %v809_v8  ;;  %3997 = vmatprep.mubr.msk.bf16.mxu1 %vm4990_vm0, %v4989_v0  ;;  %4044 = vmatpush3.bf16.msra.mxu1 %v4555_v57 }
 0x48d   :  { %4045 = vmatprep.subr.bf16.mxu1 %v4989_v0 }
 0x48e   :  { %v4655_v10 = vpop.eup %4654 }
 0x490   :  { %v4657_v11 = vpop.eup %4656  ;;  %4046 = vmatpush3.bf16.msra.mxu1 %v4556_v58 }
 0x491   :  { %v869_v12 = vpack.c.bf16 %v4657_v11, %v4655_v10  ;;  %4047 = vmatprep.subr.bf16.mxu1 %v4989_v0 }
 0x493   :  { %3998 = vmatmul.mubr.bf16.gmra.mrb[52].mxu1 %v869_v12  ;;  %v849_v12 = vld [vmem:[#allocation10 + $0x58] sm:$0xff] }
 0x494   :  { %4001 = vmatprep.mubr.msk.bf16.mxu1 %vm4990_vm0, %v4989_v0  ;;  %4048 = vmatpush3.bf16.msra.mxu1 %v4557_v59 }
 0x495   :  { %4049 = vmatprep.subr.bf16.mxu1 %v4989_v0 }
 0x496   :  { %v4659_v14 = vpop.eup %4658 }
 0x497   :  { %v870_v15 = vpack.c.bf16 %v4659_v14, %v4659_v14  ;;  %v859_v14 = vld [vmem:[#allocation12 + $0x58] sm:$0xff] }
 0x498   :  { %4050 = vmatpush3.bf16.msra.mxu1 %v4558_v60 }
 0x499   :  { %4101 = vmatprep.subr.bf16.mxu1 %v4989_v0 }
 0x49b   :  { %4002 = vmatmul.mubr.bf16.gmra.mrb[56].mxu1 %v870_v15 }
 0x49c   :  { %4051 = vmatprep.mubr.msk.bf16.mxu1 %vm4990_vm0, %v4989_v0 }
 0x54e   :  { %v953_v21 = vpop.f32.mrb[40].mxu1 }
 0x54f   :  { %v3987_v22 = vpop.f32.mrb[41].mxu1 }
 0x550   :  { %v956_v23 = vpop.f32.mrb[42].mxu1 }
 0x551   :  { %v991_v24 = vpack.c.bf16 %v956_v23, %v953_v21  ;;  %v3988_v25 = vpop.f32.mrb[43].mxu1  ;;  %v860_v21 = vld [vmem:[#allocation12 + $0x60] sm:$0xff] }
 0x553   :  { %4006 = vmatpush3.bf16.msra.mxu0 %v991_v24 }
 0x554   :  { %4007 = vmatprep.subr.bf16.mxu0 %v4989_v0 }
 0x556   :  { %v961_v26 = vpop.f32.mrb[44].mxu1 }
 0x557   :  { %v3991_v27 = vpop.f32.mrb[45].mxu1 }
 0x558   :  { %v964_v28 = vpop.f32.mrb[46].mxu1  ;;  %v851_v27 = vld [vmem:[#allocation10 + $0x68] sm:$0xff] }
 0x559   :  { %v992_v29 = vpack.c.bf16 %v964_v28, %v961_v26  ;;  %v3992_v30 = vpop.f32.mrb[47].mxu1 }
 0x55b   :  { %4008 = vmatpush3.bf16.msra.mxu0 %v992_v29  ;;  %v861_v29 = vld [vmem:[#allocation12 + $0x68] sm:$0xff] }
 0x55c   :  { %4009 = vmatprep.subr.bf16.mxu0 %v4989_v0 }
 0x55e   :  { %v969_v31 = vpop.f32.mrb[48].mxu1 }
 0x55f   :  { %v3995_v32 = vpop.f32.mrb[49].mxu1 }
 0x560   :  { %v972_v33 = vpop.f32.mrb[50].mxu1 }
 0x561   :  { %v993_v34 = vpack.c.bf16 %v972_v33, %v969_v31  ;;  %v3996_v35 = vpop.f32.mrb[51].mxu1  ;;  %v852_v31 = vld [vmem:[#allocation10 + $0x70] sm:$0xff] }
 0x563   :  { %4010 = vmatpush3.bf16.msra.mxu0 %v993_v34 }
 0x564   :  { %4011 = vmatprep.subr.bf16.mxu0 %v4989_v0 }
 0x566   :  { %v977_v38 = vpop.f32.mrb[52].mxu1 }
 0x567   :  { %v3999_v39 = vpop.f32.mrb[53].mxu1 }
 0x568   :  { %v980_v40 = vpop.f32.mrb[54].mxu1  ;;  %v862_v39 = vld [vmem:[#allocation12 + $0x70] sm:$0xff] }
 0x569   :  { %v994_v41 = vpack.c.bf16 %v980_v40, %v977_v38  ;;  %v4000_v42 = vpop.f32.mrb[55].mxu1 }
 0x56b   :  { %4012 = vmatpush3.bf16.msra.mxu0 %v994_v41 }
 0x56c   :  { %4013 = vmatprep.subr.bf16.mxu0 %v4989_v0 }
 0x56e   :  { %v985_v43 = vpop.f32.mrb[56].mxu1 }
 0x56f   :  { %v995_v44 = vpack.c.bf16 %v985_v43, %v985_v43  ;;  %v4003_v45 = vpop.f32.mrb[57].mxu1 }
 0x570   :  { %v988_v46 = vpop.f32.mrb[58].mxu1 }
 0x571   :  { %v1035_v47 = vsel %vm385_vm1, %v995_v44, 0  ;;  %v4004_v48 = vpop.f32.mrb[59].mxu1  ;;  %v4559_v44 = vld [vmem:[#allocation9 + $0x80] sm:$0xff]  }
 0x572   :  { %4014 = vmatpush3.bf16.msra.mxu0 %v1035_v47  ;;  %v853_v47 = vld [vmem:[#allocation10 + $0x78] sm:$0xff]  ;;  %v863_v48 = vld [vmem:[#allocation12 + $0x78] sm:$0xff] }
 0x573   :  { %4071 = vmatprep.subr.bf16.mxu0 %v4989_v0 }
 0x575   :  { %4016 = vmatmul.mubr.msk.bf16.vlgmr.msra.gmra.mrb[40].mxu0 %vm369_vm2, %v4546_v49 }
 0x576   :  { %4019 = vmatprep.mubr.msk.bf16.mxu0 %vm4990_vm0, %v4989_v0 }
 0x57d   :  { %4020 = vmatmul.mubr.msk.bf16.gmra.mrb[44].mxu0 %vm369_vm2, %v4547_v50  ;;  %v854_v50 = vld [vmem:[#allocation10 + $0x80] sm:$0xff] }
 0x57e   :  { %4023 = vmatprep.mubr.msk.bf16.mxu0 %vm4990_vm0, %v4989_v0 }
 0x585   :  { %4024 = vmatmul.mubr.msk.bf16.gmra.mrb[48].mxu0 %vm369_vm2, %v4548_v51 }
 0x586   :  { %4027 = vmatprep.mubr.msk.bf16.mxu0 %vm4990_vm0, %v4989_v0 }
 0x58d   :  { %4028 = vmatmul.mubr.msk.bf16.gmra.mrb[52].mxu0 %vm369_vm2, %v4549_v52 }
 0x58e   :  { %4031 = vmatprep.mubr.msk.bf16.mxu0 %vm4990_vm0, %v4989_v0 }
 0x595   :  { %4032 = vmatmul.mubr.msk.bf16.gmra.mrb[56].mxu0 %vm369_vm2, %v4550_v55 }
 0x596   :  { %4081 = vmatprep.mubr.msk.bf16.mxu0 %vm4990_vm0, %v4989_v0 }
 0x648   :  { %v1071_v63 = vpop.f32.mrb[40].mxu0 }
 0x649   :  { %v1109_v2 = vmul.f32 %v1071_v63, %v847_v61  ;;  %v4017_v3 = vpop.f32.mrb[41].mxu0  ;;  %v4561_v63 = vld [vmem:[#allocation9 + $0x90] sm:$0xff]  }
 0x64a   :  { %v1074_v5 = vpop.f32.mrb[42].mxu0  ;;  %v855_v3 = vld [vmem:[#allocation10 + $0x88] sm:$0xff] }
 0x64b   :  { %v1118_v8 = vadd.f32 %v1109_v2, %v857_v62  ;;  %v1110_v9 = vmul.f32 %v1074_v5, %v848_v1  ;;  %v4018_v10 = vpop.f32.mrb[43].mxu0 }
 0x64d   :  { %4660 = vtanh.f32 %v1118_v8  ;;  %v1119_v11 = vadd.f32 %v1110_v9, %v858_v4 }
 0x64f   :  { %4662 = vtanh.f32 %v1119_v11 }
 0x650   :  { %v1079_v15 = vpop.f32.mrb[44].mxu0 }
 0x651   :  { %v1111_v19 = vmul.f32 %v1079_v15, %v849_v12  ;;  %v4021_v20 = vpop.f32.mrb[45].mxu0 }
 0x652   :  { %v1082_v22 = vpop.f32.mrb[46].mxu0 }
 0x653   :  { %v1120_v23 = vadd.f32 %v1111_v19, %v859_v14  ;;  %v1112_v24 = vmul.f32 %v1082_v22, %v850_v16  ;;  %v4022_v25 = vpop.f32.mrb[47].mxu0  ;;  %v4563_v19 = vld [vmem:[#allocation9 + $0xa0] sm:$0xff]  }
 0x655   :  { %4664 = vtanh.f32 %v1120_v23  ;;  %v1121_v26 = vadd.f32 %v1112_v24, %v860_v21  ;;  %v4565_v24 = vld [vmem:[#allocation9 + $0xb0] sm:$0xff]  }
 0x657   :  { %v4661_v28 = vpop.eup %4660  ;;  %4666 = vtanh.f32 %v1121_v26 }
 0x658   :  { %v1087_v30 = vpop.f32.mrb[48].mxu0  ;;  %v5408_v35 = vadd.f32 %v4661_v28, %v5271_v17 }
 0x659   :  { %v4663_v32 = vpop.eup %4662  ;;  %v1113_v33 = vmul.f32 %v1087_v30, %v851_v27  ;;  %v4025_v34 = vpop.f32.mrb[49].mxu0  ;;  %v4566_v27 = vld [vmem:[#allocation9 + $0xb8] sm:$0xff]  }
 0x65a   :  { %v5411_v38 = vadd.f32 %v4663_v32, %v5273_v18  ;;  %v1090_v40 = vpop.f32.mrb[50].mxu0  ;;  %v4560_v18 = vld [vmem:[#allocation9 + $0x88] sm:$0xff]  }
 0x65b   :  { %v1122_v41 = vadd.f32 %v1113_v33, %v861_v29  ;;  %v1114_v42 = vmul.f32 %v1090_v40, %v852_v31  ;;  %v4026_v43 = vpop.f32.mrb[51].mxu0 }
 0x65c   :  { %v5415_v45 = vpack.c.bf16 %v5411_v38, %v5408_v35 }
 0x65d   :  { %4668 = vtanh.f32 %v1122_v41  ;;  %v1123_v46 = vadd.f32 %v1114_v42, %v862_v39 }
 0x65e   :  { %4052 = vmatmul.mubr.bf16.vlgmr.msra.gmra.mrb[60].mxu1 %v5415_v45 }
 0x65f   :  { %v4665_v17 = vpop.eup %4664  ;;  %4670 = vtanh.f32 %v1123_v46  ;;  %4102 = vmatpush3.bf16.msra.mxu1 %v4559_v44  ;;  %4055 = vmatprep.mubr.msk.bf16.mxu1 %vm4990_vm0, %v4989_v0 }
 0x660   :  { %v1095_v49 = vpop.f32.mrb[52].mxu0  ;;  %4103 = vmatprep.subr.bf16.mxu1 %v4989_v0  ;;  %v5422_v58 = vadd.f32 %v4665_v17, %v5279_v36  ;;  %v4562_v36 = vld [vmem:[#allocation9 + $0x98] sm:$0xff]  }
 0x661   :  { %v4667_v51 = vpop.eup %4666  ;;  %v1115_v52 = vmul.f32 %v1095_v49, %v853_v47  ;;  %v4029_v55 = vpop.f32.mrb[53].mxu0 }
 0x662   :  { %v1098_v57 = vpop.f32.mrb[54].mxu0  ;;  %v5425_v59 = vadd.f32 %v4667_v51, %v5281_v37  ;;  %v865_v37 = vld [vmem:[#allocation12 + $0x88] sm:$0xff] }
 0x663   :  { %v1124_v60 = vadd.f32 %v1115_v52, %v863_v48  ;;  %v1116_v61 = vmul.f32 %v1098_v57, %v854_v50  ;;  %v4030_v62 = vpop.f32.mrb[55].mxu0  ;;  %4104 = vmatpush3.bf16.msra.mxu1 %v4560_v18  ;;  %v4567_v57 = vld [vmem:[%s6094_s10] sm:$0xff]  }
 0x664   :  { %v1180_v1 = vpack.c.bf16 %v5425_v59, %v5422_v58  ;;  %4105 = vmatprep.subr.bf16.mxu1 %v4989_v0 }
 0x665   :  { %4672 = vtanh.f32 %v1124_v60  ;;  %v1125_v2 = vadd.f32 %v1116_v61, %v864_v56 }
 0x666   :  { %4056 = vmatmul.mubr.bf16.gmra.mrb[64].mxu1 %v1180_v1 }
 0x667   :  { %v4669_v4 = vpop.eup %4668  ;;  %4674 = vtanh.f32 %v1125_v2  ;;  %4059 = vmatprep.mubr.msk.bf16.mxu1 %vm4990_vm0, %v4989_v0  ;;  %4106 = vmatpush3.bf16.msra.mxu1 %v4561_v63  ;;  %v4568_v2 = vld [vmem:[%s6094_s10 + $0x8] sm:$0xff]  }
 0x668   :  { %v1103_v5 = vpop.f32.mrb[56].mxu0  ;;  %4107 = vmatprep.subr.bf16.mxu1 %v4989_v0  ;;  %v5434_v12 = vadd.f32 %v4669_v4, %v5287_v53  ;;  %v4564_v53 = vld [vmem:[#allocation9 + $0xa8] sm:$0xff]  }
 0x669   :  { %v4671_v8 = vpop.eup %4670  ;;  %v1117_v9 = vmul.f32 %v1103_v5, %v855_v3  ;;  %v4033_v10 = vpop.f32.mrb[57].mxu0 }
 0x66a   :  { %v1106_v11 = vpop.f32.mrb[58].mxu0  ;;  %v5437_v14 = vadd.f32 %v4671_v8, %v5289_v54  ;;  %v4569_v8 = vld [vmem:[%s6094_s10 + $0x10] sm:$0xff]  }
 0x66b   :  { %v1126_v15 = vadd.f32 %v1117_v9, %v865_v37  ;;  %v4034_v16 = vpop.f32.mrb[59].mxu0  ;;  %4108 = vmatpush3.bf16.msra.mxu1 %v4562_v36 }
 0x66c   :  { %v1181_v20 = vpack.c.bf16 %v5437_v14, %v5434_v12  ;;  %4109 = vmatprep.subr.bf16.mxu1 %v4989_v0 }
 0x66d   :  { %4676 = vtanh.f32 %v1126_v15 }
 0x66e   :  { %4060 = vmatmul.mubr.bf16.gmra.mrb[68].mxu1 %v1181_v20 }
 0x66f   :  { %v4673_v21 = vpop.eup %4672  ;;  %4063 = vmatprep.mubr.msk.bf16.mxu1 %vm4990_vm0, %v4989_v0  ;;  %4110 = vmatpush3.bf16.msra.mxu1 %v4563_v19  ;;  %v4570_v19 = vld [vmem:[%s6094_s10 + $0x18] sm:$0xff]  }
 0x670   :  { %4111 = vmatprep.subr.bf16.mxu1 %v4989_v0  ;;  %v5446_v22 = vadd.f32 %v4673_v21, %v5295_v6 }
 0x671   :  { %v4675_v54 = vpop.eup %4674 }
 0x672   :  { %v5449_v23 = vadd.f32 %v4675_v54, %v5297_v7 }
 0x673   :  { %4112 = vmatpush3.bf16.msra.mxu1 %v4564_v53 }
 0x674   :  { %v1182_v25 = vpack.c.bf16 %v5449_v23, %v5446_v22  ;;  %4113 = vmatprep.subr.bf16.mxu1 %v4989_v0 }
 0x676   :  { %4064 = vmatmul.mubr.bf16.gmra.mrb[72].mxu1 %v1182_v25 }
 0x677   :  { %v4677_v26 = vpop.eup %4676  ;;  %4067 = vmatprep.mubr.msk.bf16.mxu1 %vm4990_vm0, %v4989_v0  ;;  %4114 = vmatpush3.bf16.msra.mxu1 %v4565_v24 }
 0x678   :  { %v5457_v6 = vadd.f32 %v4677_v26, %v5303_v13  ;;  %4115 = vmatprep.subr.bf16.mxu1 %v4989_v0 }
 0x67a   :  { %v1183_v7 = vpack.c.bf16 %v5457_v6, %v5457_v6 }
 0x67b   :  { %4116 = vmatpush3.bf16.msra.mxu1 %v4566_v27 }
 0x67c   :  { %4167 = vmatprep.subr.bf16.mxu1 %v4989_v0 }
 0x67e   :  { %4068 = vmatmul.mubr.bf16.gmra.mrb[76].mxu1 %v1183_v7 }
 0x67f   :  { %4117 = vmatprep.mubr.msk.bf16.mxu1 %vm4990_vm0, %v4989_v0 }
 0x686   :  { %4118 = vmatmul.mubr.bf16.vlgmr.msra.gmra.mrb[80].mxu1 %v5415_v45 }
 0x687   :  { %4121 = vmatprep.mubr.msk.bf16.mxu1 %vm4990_vm0, %v4989_v0 }
 0x68e   :  { %4122 = vmatmul.mubr.bf16.gmra.mrb[84].mxu1 %v1180_v1 }
 0x68f   :  { %4125 = vmatprep.mubr.msk.bf16.mxu1 %vm4990_vm0, %v4989_v0 }
 0x696   :  { %4126 = vmatmul.mubr.bf16.gmra.mrb[88].mxu1 %v1181_v20 }
 0x697   :  { %4129 = vmatprep.mubr.msk.bf16.mxu1 %vm4990_vm0, %v4989_v0 }
 0x69e   :  { %4130 = vmatmul.mubr.bf16.gmra.mrb[92].mxu1 %v1182_v25  ;;  %v4571_v25 = vld [vmem:[%s6094_s10 + $0x20] ss:$0 sps:$4 sm:$0xff]  }
 0x69f   :  { %4133 = vmatprep.mubr.msk.bf16.mxu1 %vm4990_vm0, %v4989_v0 }
 0x6a6   :  { %4134 = vmatmul.mubr.bf16.gmra.mrb[96].mxu1 %v1183_v7 }
 0x6a7   :  { %4183 = vmatprep.mubr.msk.bf16.mxu1 %vm4990_vm0, %v4989_v0 }
 0x731   :  { %v1266_v13 = vpop.f32.mrb[60].mxu1 }
 0x732   :  { %v4053_v28 = vpop.f32.mrb[61].mxu1 }
 0x733   :  { %v1269_v29 = vpop.f32.mrb[62].mxu1 }
 0x734   :  { %v1304_v30 = vpack.c.bf16 %v1269_v29, %v1266_v13  ;;  %v4054_v31 = vpop.f32.mrb[63].mxu1 }
 0x735   :  { %v4573_v31 = vld [vmem:[%s6090_s6 + $0x50] sm:$0xff]  }
 0x736   :  { %4072 = vmatpush3.bf16.msra.mxu0 %v1304_v30  ;;  %v4572_v30 = vld [vmem:[%s6090_s6 + $0x48] sm:$0xff]  }
 0x737   :  { %4073 = vmatprep.subr.bf16.mxu0 %v4989_v0 }
 0x739   :  { %v1274_v32 = vpop.f32.mrb[64].mxu1 }
 0x73a   :  { %v4057_v33 = vpop.f32.mrb[65].mxu1 }
 0x73b   :  { %v1277_v34 = vpop.f32.mrb[66].mxu1  ;;  %v4575_v33 = vld [vmem:[%s6090_s6 + $0x60] sm:$0xff]  }
 0x73c   :  { %v1305_v39 = vpack.c.bf16 %v1277_v34, %v1274_v32  ;;  %v4058_v40 = vpop.f32.mrb[67].mxu1  ;;  %v4574_v32 = vld [vmem:[%s6090_s6 + $0x58] sm:$0xff]   ;;  %v4576_v34 = vld [vmem:[%s6090_s6 + $0x68] ss:$0 sps:$4 sm:$0xff]  }
 0x73d   :  { %v4578_v40 = vld [vmem:[#allocation9 + $0xc8] sm:$0xff]  }
 0x73e   :  { %4074 = vmatpush3.bf16.msra.mxu0 %v1305_v39  ;;  %v4577_v39 = vld [vmem:[#allocation9 + $0xc0] sm:$0xff]  }
 0x73f   :  { %4075 = vmatprep.subr.bf16.mxu0 %v4989_v0  ;;  %4168 = vmatpush3.bf16.msra.mxu1 %v4577_v39  ;;  %v5622_v39 = vld [vmem:[%s6084_s0 + $0x38] sm:$0xff] }
 0x740   :  { %4169 = vmatprep.subr.bf16.mxu1 %v4989_v0 }
 0x741   :  { %v1282_v41 = vpop.f32.mrb[68].mxu1 }
 0x742   :  { %v4061_v42 = vpop.f32.mrb[69].mxu1 }
 0x743   :  { %v1285_v43 = vpop.f32.mrb[70].mxu1  ;;  %4170 = vmatpush3.bf16.msra.mxu1 %v4578_v40  ;;  %v4580_v42 = vld [vmem:[#allocation9 + $0xd8] sm:$0xff]  }
 0x744   :  { %v1306_v44 = vpack.c.bf16 %v1285_v43, %v1282_v41  ;;  %v4062_v45 = vpop.f32.mrb[71].mxu1  ;;  %4171 = vmatprep.subr.bf16.mxu1 %v4989_v0  ;;  %v4579_v41 = vld [vmem:[#allocation9 + $0xd0] sm:$0xff]   ;;  %v4581_v43 = vld [vmem:[#allocation9 + $0xe0] sm:$0xff]  }
 0x745   :  { %v4583_v45 = vld [vmem:[#allocation9 + $0xf0] sm:$0xff]  }
 0x746   :  { %4076 = vmatpush3.bf16.msra.mxu0 %v1306_v44  ;;  %v4582_v44 = vld [vmem:[#allocation9 + $0xe8] sm:$0xff]  }
 0x747   :  { %4077 = vmatprep.subr.bf16.mxu0 %v4989_v0  ;;  %4172 = vmatpush3.bf16.msra.mxu1 %v4579_v41  ;;  %v1178_v41 = vld [vmem:[#allocation15 + $0x40] sm:$0xff] }
 0x748   :  { %4173 = vmatprep.subr.bf16.mxu1 %v4989_v0 }
 0x749   :  { %v1290_v46 = vpop.f32.mrb[72].mxu1 }
 0x74a   :  { %v4065_v47 = vpop.f32.mrb[73].mxu1 }
 0x74b   :  { %v1293_v17 = vpop.f32.mrb[74].mxu1  ;;  %4174 = vmatpush3.bf16.msra.mxu1 %v4580_v42  ;;  %v1170_v47 = vld [vmem:[#allocation15] sm:$0xff] }
 0x74c   :  { %v1307_v18 = vpack.c.bf16 %v1293_v17, %v1290_v46  ;;  %v4066_v48 = vpop.f32.mrb[75].mxu1  ;;  %4175 = vmatprep.subr.bf16.mxu1 %v4989_v0  ;;  %v4584_v46 = vld [vmem:[#allocation9 + $0xf8] sm:$0xff]  }
 0x74e   :  { %4078 = vmatpush3.bf16.msra.mxu0 %v1307_v18  ;;  %v1171_v18 = vld [vmem:[#allocation15 + $0x8] sm:$0xff] }
 0x74f   :  { %4079 = vmatprep.subr.bf16.mxu0 %v4989_v0  ;;  %4176 = vmatpush3.bf16.msra.mxu1 %v4581_v43 }
 0x750   :  { %4177 = vmatprep.subr.bf16.mxu1 %v4989_v0 }
 0x751   :  { %v1298_v49 = vpop.f32.mrb[76].mxu1 }
 0x752   :  { %v1308_v50 = vpack.c.bf16 %v1298_v49, %v1298_v49  ;;  %v4069_v51 = vpop.f32.mrb[77].mxu1 }
 0x753   :  { %v1301_v52 = vpop.f32.mrb[78].mxu1  ;;  %4178 = vmatpush3.bf16.msra.mxu1 %v4582_v44  ;;  %v5559_v51 = vld [vmem:[%s6084_s0] sm:$0xff] }
 0x754   :  { %v1348_v55 = vsel %vm385_vm1, %v1308_v50, 0  ;;  %v4070_v56 = vpop.f32.mrb[79].mxu1  ;;  %4179 = vmatprep.subr.bf16.mxu1 %v4989_v0 }
 0x755   :  { %4080 = vmatpush3.bf16.msra.mxu0 %v1348_v55 }
 0x756   :  { %4137 = vmatprep.subr.bf16.mxu0 %v4989_v0 }
 0x757   :  { %4180 = vmatpush3.bf16.msra.mxu1 %v4583_v45 }
 0x758   :  { %4082 = vmatmul.mubr.msk.bf16.vlgmr.msra.gmra.mrb[60].mxu0 %vm369_vm2, %v4567_v57  ;;  %4181 = vmatprep.subr.bf16.mxu1 %v4989_v0  ;;  %v5568_v57 = vld [vmem:[%s6084_s0 + $0x8] sm:$0xff] }
 0x759   :  { %v1569_v60 = vpop.f32.mrb[80].mxu1  ;;  %4085 = vmatprep.mubr.msk.bf16.mxu0 %vm4990_vm0, %v4989_v0 }
 0x75a   :  { %v4119_v61 = vpop.f32.mrb[81].mxu1 }
 0x75b   :  { %v1572_v62 = vpop.f32.mrb[82].mxu1  ;;  %4182 = vmatpush3.bf16.msra.mxu1 %v4584_v46  ;;  %v1172_v61 = vld [vmem:[#allocation15 + $0x10] sm:$0xff] }
 0x75c   :  { %v1607_v63 = vpack.c.bf16 %v1572_v62, %v1569_v60  ;;  %v4120_v1 = vpop.f32.mrb[83].mxu1  ;;  %4233 = vmatprep.subr.bf16.mxu1 %v4989_v0  ;;  %v5631_v46 = vld [vmem:[%s6084_s0 + $0x40] sm:$0xff] }
 0x75e   :  { %4138 = vmatpush3.bf16.msra.mxu0 %v1607_v63  ;;  %v1173_v63 = vld [vmem:[#allocation15 + $0x18] sm:$0xff] }
 0x75f   :  { %4139 = vmatprep.subr.bf16.mxu0 %v4989_v0 }
 0x760   :  { %4086 = vmatmul.mubr.msk.bf16.gmra.mrb[64].mxu0 %vm369_vm2, %v4568_v2 }
 0x761   :  { %v1577_v3 = vpop.f32.mrb[84].mxu1  ;;  %4089 = vmatprep.mubr.msk.bf16.mxu0 %vm4990_vm0, %v4989_v0 }
 0x762   :  { %v4123_v4 = vpop.f32.mrb[85].mxu1 }
 0x763   :  { %v1580_v36 = vpop.f32.mrb[86].mxu1  ;;  %v5577_v4 = vld [vmem:[%s6084_s0 + $0x10] sm:$0xff] }
 0x764   :  { %v1608_v37 = vpack.c.bf16 %v1580_v36, %v1577_v3  ;;  %v4124_v5 = vpop.f32.mrb[87].mxu1 }
 0x766   :  { %4140 = vmatpush3.bf16.msra.mxu0 %v1608_v37 }
 0x767   :  { %4141 = vmatprep.subr.bf16.mxu0 %v4989_v0 }
 0x768   :  { %4090 = vmatmul.mubr.msk.bf16.gmra.mrb[68].mxu0 %vm369_vm2, %v4569_v8  ;;  %v5586_v8 = vld [vmem:[%s6084_s0 + $0x18] sm:$0xff] }
 0x769   :  { %v1585_v9 = vpop.f32.mrb[88].mxu1  ;;  %4093 = vmatprep.mubr.msk.bf16.mxu0 %vm4990_vm0, %v4989_v0 }
 0x76a   :  { %v4127_v10 = vpop.f32.mrb[89].mxu1 }
 0x76b   :  { %v1588_v11 = vpop.f32.mrb[90].mxu1  ;;  %v1174_v10 = vld [vmem:[#allocation15 + $0x20] sm:$0xff] }
 0x76c   :  { %v1609_v15 = vpack.c.bf16 %v1588_v11, %v1585_v9  ;;  %v4128_v16 = vpop.f32.mrb[91].mxu1 }
 0x76e   :  { %4142 = vmatpush3.bf16.msra.mxu0 %v1609_v15  ;;  %v1175_v15 = vld [vmem:[#allocation15 + $0x28] sm:$0xff] }
 0x76f   :  { %4143 = vmatprep.subr.bf16.mxu0 %v4989_v0 }
 0x770   :  { %4094 = vmatmul.mubr.msk.bf16.gmra.mrb[72].mxu0 %vm369_vm2, %v4570_v19 }
 0x771   :  { %v1593_v20 = vpop.f32.mrb[92].mxu1  ;;  %4097 = vmatprep.mubr.msk.bf16.mxu0 %vm4990_vm0, %v4989_v0 }
 0x772   :  { %v4131_v21 = vpop.f32.mrb[93].mxu1 }
 0x773   :  { %v1596_v53 = vpop.f32.mrb[94].mxu1  ;;  %v5595_v21 = vld [vmem:[%s6084_s0 + $0x20] sm:$0xff] }
 0x774   :  { %v1610_v54 = vpack.c.bf16 %v1596_v53, %v1593_v20  ;;  %v4132_v24 = vpop.f32.mrb[95].mxu1 }
 0x776   :  { %4144 = vmatpush3.bf16.msra.mxu0 %v1610_v54 }
 0x777   :  { %4145 = vmatprep.subr.bf16.mxu0 %v4989_v0 }
 0x778   :  { %4098 = vmatmul.mubr.msk.bf16.gmra.mrb[76].mxu0 %vm369_vm2, %v4571_v25  ;;  %v5604_v25 = vld [vmem:[%s6084_s0 + $0x28] sm:$0xff] }
 0x779   :  { %v1601_v26 = vpop.f32.mrb[96].mxu1  ;;  %4147 = vmatprep.mubr.msk.bf16.mxu0 %vm4990_vm0, %v4989_v0 }
 0x77a   :  { %v1611_v27 = vpack.c.bf16 %v1601_v26, %v1601_v26  ;;  %v4135_v7 = vpop.f32.mrb[97].mxu1 }
 0x77b   :  { %v1604_v13 = vpop.f32.mrb[98].mxu1 }
 0x77c   :  { %v1651_v28 = vsel %vm385_vm1, %v1611_v27, 0  ;;  %v4136_v29 = vpop.f32.mrb[99].mxu1  ;;  %v1176_v27 = vld [vmem:[#allocation15 + $0x30] sm:$0xff]  ;;  %v1177_v13 = vld [vmem:[#allocation15 + $0x38] sm:$0xff] }
 0x77d   :  { %4146 = vmatpush3.bf16.msra.mxu0 %v1651_v28 }
 0x77e   :  { %4203 = vmatprep.subr.bf16.mxu0 %v4989_v0 }
 0x780   :  { %4148 = vmatmul.mubr.msk.bf16.vlgmr.msra.gmra.mrb[80].mxu0 %vm369_vm2, %v4572_v30 }
 0x781   :  { %4151 = vmatprep.mubr.msk.bf16.mxu0 %vm4990_vm0, %v4989_v0 }
 0x788   :  { %4152 = vmatmul.mubr.msk.bf16.gmra.mrb[84].mxu0 %vm369_vm2, %v4573_v31  ;;  %v5613_v31 = vld [vmem:[%s6084_s0 + $0x30] sm:$0xff] }
 0x789   :  { %4155 = vmatprep.mubr.msk.bf16.mxu0 %vm4990_vm0, %v4989_v0 }
 0x790   :  { %4156 = vmatmul.mubr.msk.bf16.gmra.mrb[88].mxu0 %vm369_vm2, %v4574_v32 }
 0x791   :  { %4159 = vmatprep.mubr.msk.bf16.mxu0 %vm4990_vm0, %v4989_v0 }
 0x798   :  { %4160 = vmatmul.mubr.msk.bf16.gmra.mrb[92].mxu0 %vm369_vm2, %v4575_v33 }
 0x799   :  { %4163 = vmatprep.mubr.msk.bf16.mxu0 %vm4990_vm0, %v4989_v0 }
 0x7a0   :  { %4164 = vmatmul.mubr.msk.bf16.gmra.mrb[96].mxu0 %vm369_vm2, %v4576_v34 }
 0x7a1   :  { %4213 = vmatprep.mubr.msk.bf16.mxu0 %vm4990_vm0, %v4989_v0 }
 0x82b   :  { %v1384_v17 = vpop.f32.mrb[60].mxu0 }
 0x82c   :  { %v1385_v48 = vadd.f32 %v1384_v17, %v1170_v47  ;;  %v4083_v49 = vpop.f32.mrb[61].mxu0 }
 0x82d   :  { %v1387_v50 = vpop.f32.mrb[62].mxu0 }
 0x82e   :  { %v1422_v52 = vadd.f32 %v5559_v51, %v1385_v48  ;;  %v1388_v55 = vadd.f32 %v1387_v50, %v1171_v18  ;;  %v4084_v56 = vpop.f32.mrb[63].mxu0  ;;  %v1468_v18 = vld [vmem:[#allocation10 + $0x90] sm:$0xff]  ;;  %v1478_v48 = vld [vmem:[#allocation12 + $0x90] sm:$0xff]  ;;  %v1469_v50 = vld [vmem:[#allocation10 + $0x98] sm:$0xff] }
 0x82f   :  { %v1479_v56 = vld [vmem:[#allocation12 + $0x98] sm:$0xff] }
 0x830   :  { %1431 = vst [vmem:[%s6096_s12] sm:$0xff] %v1422_v52  ;;  %v1423_v60 = vadd.f32 %v5568_v57, %v1388_v55 }
 0x832   :  { %1432 = vst [vmem:[%s6096_s12 + $0x8] sm:$0xff] %v1423_v60 }
 0x833   :  { %v1392_v62 = vpop.f32.mrb[64].mxu0 }
 0x834   :  { %v1393_v1 = vadd.f32 %v1392_v62, %v1172_v61  ;;  %v4087_v2 = vpop.f32.mrb[65].mxu0 }
 0x835   :  { %v1395_v3 = vpop.f32.mrb[66].mxu0  ;;  %v1470_v2 = vld [vmem:[#allocation10 + $0xa0] sm:$0xff] }
 0x836   :  { %v1424_v36 = vadd.f32 %v5577_v4, %v1393_v1  ;;  %v1396_v37 = vadd.f32 %v1395_v3, %v1173_v63  ;;  %v4088_v5 = vpop.f32.mrb[67].mxu0  ;;  %v1480_v3 = vld [vmem:[#allocation12 + $0xa0] sm:$0xff] }
 0x838   :  { %1433 = vst [vmem:[%s6096_s12 + $0x10] sm:$0xff] %v1424_v36  ;;  %v1425_v9 = vadd.f32 %v5586_v8, %v1396_v37  ;;  %v1471_v37 = vld [vmem:[#allocation10 + $0xa8] sm:$0xff] }
 0x83a   :  { %1434 = vst [vmem:[%s6096_s12 + $0x18] sm:$0xff] %v1425_v9 }
 0x83b   :  { %v1400_v11 = vpop.f32.mrb[68].mxu0 }
 0x83c   :  { %v1401_v16 = vadd.f32 %v1400_v11, %v1174_v10  ;;  %v4091_v19 = vpop.f32.mrb[69].mxu0  ;;  %v1481_v10 = vld [vmem:[#allocation12 + $0xa8] sm:$0xff] }
 0x83d   :  { %v1403_v20 = vpop.f32.mrb[70].mxu0 }
 0x83e   :  { %v1426_v53 = vadd.f32 %v5595_v21, %v1401_v16  ;;  %v1404_v54 = vadd.f32 %v1403_v20, %v1175_v15  ;;  %v4092_v24 = vpop.f32.mrb[71].mxu0 }
 0x83f   :  { %v1482_v24 = vld [vmem:[#allocation12 + $0xb0] sm:$0xff] }
 0x840   :  { %1435 = vst [vmem:[%s6096_s12 + $0x20] sm:$0xff] %v1426_v53  ;;  %v1427_v26 = vadd.f32 %v5604_v25, %v1404_v54  ;;  %v1472_v53 = vld [vmem:[#allocation10 + $0xb0] sm:$0xff] }
 0x842   :  { %1436 = vst [vmem:[%s6096_s12 + $0x28] sm:$0xff] %v1427_v26 }
 0x843   :  { %v1408_v7 = vpop.f32.mrb[72].mxu0 }
 0x844   :  { %v1409_v28 = vadd.f32 %v1408_v7, %v1176_v27  ;;  %v4095_v29 = vpop.f32.mrb[73].mxu0  ;;  %v1473_v27 = vld [vmem:[#allocation10 + $0xb8] sm:$0xff] }
 0x845   :  { %v1411_v30 = vpop.f32.mrb[74].mxu0  ;;  %v1483_v29 = vld [vmem:[#allocation12 + $0xb8] sm:$0xff] }
 0x846   :  { %v1428_v32 = vadd.f32 %v5613_v31, %v1409_v28  ;;  %v1412_v33 = vadd.f32 %v1411_v30, %v1177_v13  ;;  %v4096_v34 = vpop.f32.mrb[75].mxu0 }
 0x848   :  { %1437 = vst [vmem:[%s6096_s12 + $0x30] sm:$0xff] %v1428_v32  ;;  %v1429_v40 = vadd.f32 %v5622_v39, %v1412_v33 }
 0x84a   :  { %1438 = vst [vmem:[%s6096_s12 + $0x38] sm:$0xff] %v1429_v40 }
 0x84b   :  { %v1416_v42 = vpop.f32.mrb[76].mxu0 }
 0x84c   :  { %v1417_v43 = vadd.f32 %v1416_v42, %v1178_v41  ;;  %v4099_v44 = vpop.f32.mrb[77].mxu0  ;;  %v1474_v42 = vld [vmem:[#allocation10 + $0xc0] sm:$0xff] }
 0x84d   :  { %v1419_v45 = vpop.f32.mrb[78].mxu0  ;;  %v1484_v44 = vld [vmem:[#allocation12 + $0xc0] sm:$0xff] }
 0x84e   :  { %v1430_v47 = vadd.f32 %v5631_v46, %v1417_v43  ;;  %v4100_v17 = vpop.f32.mrb[79].mxu0 }
 0x850   :  { %1439 = vst [vmem:[%s6096_s12 + $0x40] sm:$0xff] %v1430_v47  ;;  %v1475_v47 = vld [vmem:[#allocation10 + $0xc8] sm:$0xff] }
 0x853   :  { %v1687_v49 = vpop.f32.mrb[80].mxu0 }
 0x854   :  { %v1725_v52 = vmul.f32 %v1687_v49, %v1468_v18  ;;  %v4149_v55 = vpop.f32.mrb[81].mxu0  ;;  %v1485_v49 = vld [vmem:[#allocation12 + $0xc8] sm:$0xff] }
 0x855   :  { %v1690_v60 = vpop.f32.mrb[82].mxu0 }
 0x856   :  { %v1734_v61 = vadd.f32 %v1725_v52, %v1478_v48  ;;  %v1726_v62 = vmul.f32 %v1690_v60, %v1469_v50  ;;  %v4150_v63 = vpop.f32.mrb[83].mxu0 }
 0x858   :  { %v1735_v1 = vadd.f32 %v1726_v62, %v1479_v56  ;;  %4678 = vtanh.f32 %v1734_v61  ;;  %v1476_v62 = vld [vmem:[#allocation10 + $0xd0] sm:$0xff] }
 0x85a   :  { %4680 = vtanh.f32 %v1735_v1  ;;  %v1486_v1 = vld [vmem:[#allocation12 + $0xd0] sm:$0xff] }
 0x85b   :  { %v1695_v36 = vpop.f32.mrb[84].mxu0 }
 0x85c   :  { %v1727_v5 = vmul.f32 %v1695_v36, %v1470_v2  ;;  %v4153_v9 = vpop.f32.mrb[85].mxu0 }
 0x85d   :  { %v1698_v11 = vpop.f32.mrb[86].mxu0 }
 0x85e   :  { %v1736_v15 = vadd.f32 %v1727_v5, %v1480_v3  ;;  %v1728_v16 = vmul.f32 %v1698_v11, %v1471_v37  ;;  %v4154_v19 = vpop.f32.mrb[87].mxu0 }
 0x860   :  { %v1737_v20 = vadd.f32 %v1728_v16, %v1481_v10  ;;  %4682 = vtanh.f32 %v1736_v15 }
 0x862   :  { %4684 = vtanh.f32 %v1737_v20  ;;  %v4679_v54 = vpop.eup %4678 }
 0x863   :  { %v1703_v26 = vpop.f32.mrb[88].mxu0 }
 0x864   :  { %v4681_v7 = vpop.eup %4680  ;;  %v1729_v13 = vmul.f32 %v1703_v26, %v1472_v53  ;;  %v4157_v28 = vpop.f32.mrb[89].mxu0 }
 0x865   :  { %v1706_v30 = vpop.f32.mrb[90].mxu0  ;;  %v1799_v32 = vpack.c.bf16 %v4681_v7, %v4679_v54  ;;  %v4590_v54 = vld [vmem:[#allocation13 + $0x40] sm:$0xff]  }
 0x866   :  { %v1738_v33 = vadd.f32 %v1729_v13, %v1482_v24  ;;  %v1730_v34 = vmul.f32 %v1706_v30, %v1473_v27  ;;  %v4158_v40 = vpop.f32.mrb[91].mxu0  ;;  %v4591_v24 = vld [vmem:[#allocation13 + $0x48] sm:$0xff]  }
 0x867   :  { %4184 = vmatmul.mubr.bf16.vlgmr.msra.gmra.mrb[100].mxu1 %v1799_v32 }
 0x868   :  { %v1739_v41 = vadd.f32 %v1730_v34, %v1483_v29  ;;  %4187 = vmatprep.mubr.msk.bf16.mxu1 %vm4990_vm0, %v4989_v0  ;;  %4686 = vtanh.f32 %v1738_v33  ;;  %4234 = vmatpush3.bf16.msra.mxu1 %v4590_v54  ;;  %v1791_v54 = vld [vmem:[#allocation12 + $0xe0] sm:$0xff] }
 0x869   :  { %4235 = vmatprep.subr.bf16.mxu1 %v4989_v0 }
 0x86a   :  { %4688 = vtanh.f32 %v1739_v41  ;;  %v4683_v43 = vpop.eup %4682 }
 0x86b   :  { %v1711_v45 = vpop.f32.mrb[92].mxu0 }
 0x86c   :  { %v4685_v17 = vpop.eup %4684  ;;  %v1731_v18 = vmul.f32 %v1711_v45, %v1474_v42  ;;  %v4161_v48 = vpop.f32.mrb[93].mxu0  ;;  %4236 = vmatpush3.bf16.msra.mxu1 %v4591_v24 }
 0x86d   :  { %v1714_v50 = vpop.f32.mrb[94].mxu0  ;;  %v1800_v52 = vpack.c.bf16 %v4685_v17, %v4683_v43  ;;  %4237 = vmatprep.subr.bf16.mxu1 %v4989_v0 }
 0x86e   :  { %v1740_v55 = vadd.f32 %v1731_v18, %v1484_v44  ;;  %v1732_v56 = vmul.f32 %v1714_v50, %v1475_v47  ;;  %v4162_v60 = vpop.f32.mrb[95].mxu0 }
 0x86f   :  { %4188 = vmatmul.mubr.bf16.gmra.mrb[104].mxu1 %v1800_v52 }
 0x870   :  { %v1741_v61 = vadd.f32 %v1732_v56, %v1485_v49  ;;  %4191 = vmatprep.mubr.msk.bf16.mxu1 %vm4990_vm0, %v4989_v0  ;;  %4690 = vtanh.f32 %v1740_v55 }
 0x872   :  { %4692 = vtanh.f32 %v1741_v61  ;;  %v4687_v63 = vpop.eup %4686  ;;  %v4585_v61 = vld [vmem:[%s6090_s6 + $0x6c] sm:$0xff]  }
 0x873   :  { %v1719_v2 = vpop.f32.mrb[96].mxu0 }
 0x874   :  { %v4689_v3 = vpop.eup %4688  ;;  %v1733_v36 = vmul.f32 %v1719_v2, %v1476_v62  ;;  %v4165_v37 = vpop.f32.mrb[97].mxu0  ;;  %v4586_v62 = vld [vmem:[%s6090_s6 + $0x74] sm:$0xff]   ;;  %v4589_v2 = vld [vmem:[%s6090_s6 + $0x8c] ss:$0 sps:$4 sm:$0xff]  }
 0x875   :  { %v1722_v5 = vpop.f32.mrb[98].mxu0  ;;  %v1801_v9 = vpack.c.bf16 %v4689_v3, %v4687_v63  ;;  %v4587_v63 = vld [vmem:[%s6090_s6 + $0x7c] sm:$0xff]   ;;  %v4592_v3 = vld [vmem:[#allocation13 + $0x50] sm:$0xff]   ;;  %v4594_v37 = vld [vmem:[#allocation13 + $0x60] sm:$0xff]  }
 0x876   :  { %v1742_v10 = vadd.f32 %v1733_v36, %v1486_v1  ;;  %v4166_v11 = vpop.f32.mrb[99].mxu0  ;;  %v4588_v1 = vld [vmem:[%s6090_s6 + $0x84] sm:$0xff]   ;;  %4238 = vmatpush3.bf16.msra.mxu1 %v4592_v3  ;;  %v4593_v36 = vld [vmem:[#allocation13 + $0x58] sm:$0xff]   ;;  %v4595_v5 = vld [vmem:[#allocation13 + $0x68] sm:$0xff]  }
 0x877   :  { %4192 = vmatmul.mubr.bf16.gmra.mrb[108].mxu1 %v1801_v9  ;;  %4239 = vmatprep.subr.bf16.mxu1 %v4989_v0  ;;  %v4596_v9 = vld [vmem:[#allocation13 + $0x70] sm:$0xff]   ;;  %v1780_v11 = vld [vmem:[#allocation10 + $0xd8] sm:$0xff] }
 0x878   :  { %4694 = vtanh.f32 %v1742_v10  ;;  %4195 = vmatprep.mubr.msk.bf16.mxu1 %vm4990_vm0, %v4989_v0  ;;  %v4597_v10 = vld [vmem:[#allocation13 + $0x78] sm:$0xff]  }
 0x87a   :  { %v4691_v15 = vpop.eup %4690  ;;  %4240 = vmatpush3.bf16.msra.mxu1 %v4593_v36 }
 0x87b   :  { %4241 = vmatprep.subr.bf16.mxu1 %v4989_v0 }
 0x87c   :  { %v4693_v16 = vpop.eup %4692 }
 0x87d   :  { %v1802_v19 = vpack.c.bf16 %v4693_v16, %v4691_v15  ;;  %v1790_v15 = vld [vmem:[#allocation12 + $0xd8] sm:$0xff] }
 0x87e   :  { %4242 = vmatpush3.bf16.msra.mxu1 %v4594_v37 }
 0x87f   :  { %4196 = vmatmul.mubr.bf16.gmra.mrb[112].mxu1 %v1802_v19  ;;  %4243 = vmatprep.subr.bf16.mxu1 %v4989_v0  ;;  %v1781_v19 = vld [vmem:[#allocation10 + $0xe0] sm:$0xff] }
 0x880   :  { %4199 = vmatprep.mubr.msk.bf16.mxu1 %vm4990_vm0, %v4989_v0 }
 0x882   :  { %v4695_v20 = vpop.eup %4694  ;;  %4244 = vmatpush3.bf16.msra.mxu1 %v4595_v5  ;;  %v4598_v5 = vld [vmem:[#allocation9 + $0x100] sm:$0xff]  }
 0x883   :  { %v1803_v53 = vpack.c.bf16 %v4695_v20, %v4695_v20  ;;  %4245 = vmatprep.subr.bf16.mxu1 %v4989_v0 }
 0x886   :  { %4246 = vmatpush3.bf16.msra.mxu1 %v4596_v9  ;;  %v1786_v9 = vld [vmem:[#allocation10 + $0x108] sm:$0xff] }
 0x887   :  { %4200 = vmatmul.mubr.bf16.gmra.mrb[116].mxu1 %v1803_v53  ;;  %4247 = vmatprep.subr.bf16.mxu1 %v4989_v0 }
 0x888   :  { %4249 = vmatprep.mubr.msk.bf16.mxu1 %vm4990_vm0, %v4989_v0 }
 0x88a   :  { %4248 = vmatpush3.bf16.msra.mxu1 %v4597_v10 }
 0x88b   :  { %4299 = vmatprep.subr.bf16.mxu1 %v4989_v0 }
 0x93a   :  { %v1886_v26 = vpop.f32.mrb[100].mxu1 }
 0x93b   :  { %v4185_v27 = vpop.f32.mrb[101].mxu1 }
 0x93c   :  { %v1889_v7 = vpop.f32.mrb[102].mxu1 }
 0x93d   :  { %v1924_v13 = vpack.c.bf16 %v1889_v7, %v1886_v26  ;;  %v4186_v28 = vpop.f32.mrb[103].mxu1 }
 0x93e   :  { %v1782_v28 = vld [vmem:[#allocation10 + $0xe8] sm:$0xff] }
 0x93f   :  { %4204 = vmatpush3.bf16.msra.mxu0 %v1924_v13 }
 0x940   :  { %4205 = vmatprep.subr.bf16.mxu0 %v4989_v0 }
 0x942   :  { %v1894_v29 = vpop.f32.mrb[104].mxu1 }
 0x943   :  { %v4189_v30 = vpop.f32.mrb[105].mxu1 }
 0x944   :  { %v1897_v32 = vpop.f32.mrb[106].mxu1 }
 0x945   :  { %v1925_v33 = vpack.c.bf16 %v1897_v32, %v1894_v29  ;;  %v4190_v34 = vpop.f32.mrb[107].mxu1  ;;  %v1792_v29 = vld [vmem:[#allocation12 + $0xe8] sm:$0xff]  ;;  %v1783_v32 = vld [vmem:[#allocation10 + $0xf0] sm:$0xff] }
 0x947   :  { %4206 = vmatpush3.bf16.msra.mxu0 %v1925_v33 }
 0x948   :  { %4207 = vmatprep.subr.bf16.mxu0 %v4989_v0 }
 0x94a   :  { %v1902_v40 = vpop.f32.mrb[108].mxu1 }
 0x94b   :  { %v4193_v41 = vpop.f32.mrb[109].mxu1 }
 0x94c   :  { %v1905_v42 = vpop.f32.mrb[110].mxu1 }
 0x94d   :  { %v1926_v43 = vpack.c.bf16 %v1905_v42, %v1902_v40  ;;  %v4194_v44 = vpop.f32.mrb[111].mxu1  ;;  %v1793_v40 = vld [vmem:[#allocation12 + $0xf0] sm:$0xff] }
 0x94f   :  { %4208 = vmatpush3.bf16.msra.mxu0 %v1926_v43 }
 0x950   :  { %4209 = vmatprep.subr.bf16.mxu0 %v4989_v0 }
 0x952   :  { %v1910_v45 = vpop.f32.mrb[112].mxu1 }
 0x953   :  { %v4197_v47 = vpop.f32.mrb[113].mxu1 }
 0x954   :  { %v1913_v17 = vpop.f32.mrb[114].mxu1  ;;  %v1784_v47 = vld [vmem:[#allocation10 + $0xf8] sm:$0xff] }
 0x955   :  { %v1927_v18 = vpack.c.bf16 %v1913_v17, %v1910_v45  ;;  %v4198_v48 = vpop.f32.mrb[115].mxu1 }
 0x956   :  { %v1794_v48 = vld [vmem:[#allocation12 + $0xf8] sm:$0xff] }
 0x957   :  { %4210 = vmatpush3.bf16.msra.mxu0 %v1927_v18 }
 0x958   :  { %4211 = vmatprep.subr.bf16.mxu0 %v4989_v0 }
 0x95a   :  { %v1918_v49 = vpop.f32.mrb[116].mxu1 }
 0x95b   :  { %v1928_v50 = vpack.c.bf16 %v1918_v49, %v1918_v49  ;;  %v4201_v52 = vpop.f32.mrb[117].mxu1 }
 0x95c   :  { %v1921_v55 = vpop.f32.mrb[118].mxu1 }
 0x95d   :  { %v1968_v56 = vsel %vm385_vm1, %v1928_v50, 0  ;;  %v4202_v60 = vpop.f32.mrb[119].mxu1  ;;  %v1785_v50 = vld [vmem:[#allocation10 + $0x100] sm:$0xff] }
 0x95e   :  { %4212 = vmatpush3.bf16.msra.mxu0 %v1968_v56 }
 0x95f   :  { %4269 = vmatprep.subr.bf16.mxu0 %v4989_v0 }
 0x961   :  { %4214 = vmatmul.mubr.msk.bf16.vlgmr.msra.gmra.mrb[100].mxu0 %vm369_vm2, %v4585_v61  ;;  %v1795_v61 = vld [vmem:[#allocation12 + $0x100] sm:$0xff] }
 0x962   :  { %4217 = vmatprep.mubr.msk.bf16.mxu0 %vm4990_vm0, %v4989_v0 }
 0x969   :  { %4218 = vmatmul.mubr.msk.bf16.gmra.mrb[104].mxu0 %vm369_vm2, %v4586_v62 }
 0x96a   :  { %4221 = vmatprep.mubr.msk.bf16.mxu0 %vm4990_vm0, %v4989_v0 }
 0x971   :  { %4222 = vmatmul.mubr.msk.bf16.gmra.mrb[108].mxu0 %vm369_vm2, %v4587_v63 }
 0x972   :  { %4225 = vmatprep.mubr.msk.bf16.mxu0 %vm4990_vm0, %v4989_v0 }
 0x979   :  { %4226 = vmatmul.mubr.msk.bf16.gmra.mrb[112].mxu0 %vm369_vm2, %v4588_v1 }
 0x97a   :  { %4229 = vmatprep.mubr.msk.bf16.mxu0 %vm4990_vm0, %v4989_v0 }
 0x981   :  { %4230 = vmatmul.mubr.msk.bf16.gmra.mrb[116].mxu0 %vm369_vm2, %v4589_v2 }
 0x982   :  { %4279 = vmatprep.mubr.msk.bf16.mxu0 %vm4990_vm0, %v4989_v0 }
 0xa34   :  { %v2004_v16 = vpop.f32.mrb[100].mxu0 }
 0xa35   :  { %v2042_v20 = vmul.f32 %v2004_v16, %v1780_v11  ;;  %v4215_v53 = vpop.f32.mrb[101].mxu0 }
 0xa36   :  { %v2007_v24 = vpop.f32.mrb[102].mxu0 }
 0xa37   :  { %v2051_v26 = vadd.f32 %v2042_v20, %v1790_v15  ;;  %v2043_v27 = vmul.f32 %v2007_v24, %v1781_v19  ;;  %v4216_v7 = vpop.f32.mrb[103].mxu0  ;;  %v1796_v15 = vld [vmem:[#allocation12 + $0x108] sm:$0xff]  ;;  %v1787_v19 = vld [vmem:[#allocation10 + $0x110] sm:$0xff]  ;;  %v1797_v24 = vld [vmem:[#allocation12 + $0x110] sm:$0xff] }
 0xa39   :  { %4696 = vtanh.f32 %v2051_v26  ;;  %v2052_v13 = vadd.f32 %v2043_v27, %v1791_v54  ;;  %v4599_v54 = vld [vmem:[#allocation9 + $0x108] sm:$0xff]  }
 0xa3b   :  { %4698 = vtanh.f32 %v2052_v13 }
 0xa3c   :  { %v2012_v30 = vpop.f32.mrb[104].mxu0 }
 0xa3d   :  { %v2044_v33 = vmul.f32 %v2012_v30, %v1782_v28  ;;  %v4219_v34 = vpop.f32.mrb[105].mxu0 }
 0xa3e   :  { %v2015_v41 = vpop.f32.mrb[106].mxu0  ;;  %v1788_v34 = vld [vmem:[#allocation10 + $0x118] sm:$0xff] }
 0xa3f   :  { %v2053_v42 = vadd.f32 %v2044_v33, %v1792_v29  ;;  %v2045_v43 = vmul.f32 %v2015_v41, %v1783_v32  ;;  %v4220_v44 = vpop.f32.mrb[107].mxu0  ;;  %v4600_v33 = vld [vmem:[#allocation9 + $0x110] sm:$0xff]  }
 0xa41   :  { %4700 = vtanh.f32 %v2053_v42  ;;  %v2054_v45 = vadd.f32 %v2045_v43, %v1793_v40  ;;  %v1798_v42 = vld [vmem:[#allocation12 + $0x118] sm:$0xff] }
 0xa43   :  { %v4697_v17 = vpop.eup %4696  ;;  %4702 = vtanh.f32 %v2054_v45 }
 0xa44   :  { %v5692_v18 = vadd.f32 %v4697_v17, %v5408_v35  ;;  %v2020_v49 = vpop.f32.mrb[108].mxu0 }
 0xa45   :  { %v4699_v52 = vpop.eup %4698  ;;  %v2046_v55 = vmul.f32 %v2020_v49, %v1784_v47  ;;  %v4223_v56 = vpop.f32.mrb[109].mxu0  ;;  %v4601_v47 = vld [vmem:[#allocation9 + $0x118] sm:$0xff]  }
 0xa46   :  { %v5695_v60 = vadd.f32 %v4699_v52, %v5411_v38  ;;  %v2023_v62 = vpop.f32.mrb[110].mxu0  ;;  %v5699_v3 = vadd.f32 %v5692_v18, %v5408_v35  ;;  %v4602_v56 = vld [vmem:[#allocation9 + $0x120] sm:$0xff]  }
 0xa47   :  { %v2055_v63 = vadd.f32 %v2046_v55, %v1794_v48  ;;  %v2047_v1 = vmul.f32 %v2023_v62, %v1785_v50  ;;  %v4224_v2 = vpop.f32.mrb[111].mxu0 }
 0xa48   :  { %v5703_v36 = vadd.f32 %v5695_v60, %v5411_v38 }
 0xa49   :  { %4704 = vtanh.f32 %v2055_v63  ;;  %v2056_v37 = vadd.f32 %v2047_v1, %v1795_v61 }
 0xa4a   :  { %v2124_v10 = vpack.c.bf16 %v5703_v36, %v5699_v3 }
 0xa4b   :  { %v4701_v11 = vpop.eup %4700  ;;  %4706 = vtanh.f32 %v2056_v37 }
 0xa4c   :  { %v2028_v16 = vpop.f32.mrb[112].mxu0  ;;  %4250 = vmatmul.mubr.bf16.vlgmr.msra.gmra.mrb[120].mxu1 %v2124_v10  ;;  %v5708_v35 = vadd.f32 %v4701_v11, %v5422_v58 }
 0xa4d   :  { %v4703_v20 = vpop.eup %4702  ;;  %v2048_v53 = vmul.f32 %v2028_v16, %v1786_v9  ;;  %v4227_v38 = vpop.f32.mrb[113].mxu0  ;;  %4300 = vmatpush3.bf16.msra.mxu1 %v4598_v5  ;;  %4253 = vmatprep.mubr.msk.bf16.mxu1 %vm4990_vm0, %v4989_v0  ;;  %v4604_v5 = vld [vmem:[#allocation9 + $0x130] sm:$0xff]   ;;  %v2433_v16 = vpack.c.bf16 %v5695_v60, %v5692_v18 }
 0xa4e   :  { %v2031_v26 = vpop.f32.mrb[114].mxu0  ;;  %v5713_v27 = vadd.f32 %v4703_v20, %v5425_v59  ;;  %4301 = vmatprep.subr.bf16.mxu1 %v4989_v0  ;;  %v5718_v29 = vadd.f32 %v5708_v35, %v5422_v58 }
 0xa4f   :  { %v2057_v7 = vadd.f32 %v2048_v53, %v1796_v15  ;;  %v2049_v13 = vmul.f32 %v2031_v26, %v1787_v19  ;;  %v4228_v28 = vpop.f32.mrb[115].mxu0 }
 0xa50   :  { %v5722_v30 = vadd.f32 %v5713_v27, %v5425_v59 }
 0xa51   :  { %4708 = vtanh.f32 %v2057_v7  ;;  %v2058_v32 = vadd.f32 %v2049_v13, %v1797_v24  ;;  %4302 = vmatpush3.bf16.msra.mxu1 %v4599_v54 }
 0xa52   :  { %v2125_v40 = vpack.c.bf16 %v5722_v30, %v5718_v29  ;;  %4303 = vmatprep.subr.bf16.mxu1 %v4989_v0 }
 0xa53   :  { %v4705_v41 = vpop.eup %4704  ;;  %4710 = vtanh.f32 %v2058_v32 }
 0xa54   :  { %v2036_v43 = vpop.f32.mrb[116].mxu0  ;;  %4254 = vmatmul.mubr.bf16.gmra.mrb[124].mxu1 %v2125_v40  ;;  %v5728_v58 = vadd.f32 %v4705_v41, %v5434_v12 }
 0xa55   :  { %v4707_v59 = vpop.eup %4706  ;;  %v2050_v44 = vmul.f32 %v2036_v43, %v1788_v34  ;;  %v4231_v45 = vpop.f32.mrb[117].mxu0  ;;  %4257 = vmatprep.mubr.msk.bf16.mxu1 %vm4990_vm0, %v4989_v0  ;;  %4304 = vmatpush3.bf16.msra.mxu1 %v4600_v33 }
 0xa56   :  { %v2039_v17 = vpop.f32.mrb[118].mxu0  ;;  %v5733_v48 = vadd.f32 %v4707_v59, %v5437_v14  ;;  %4305 = vmatprep.subr.bf16.mxu1 %v4989_v0  ;;  %v5738_v52 = vadd.f32 %v5728_v58, %v5434_v12  ;;  %v4603_v12 = vld [vmem:[#allocation9 + $0x128] sm:$0xff]  }
 0xa57   :  { %v2059_v49 = vadd.f32 %v2050_v44, %v1798_v42  ;;  %v4232_v50 = vpop.f32.mrb[119].mxu0 }
 0xa58   :  { %v5742_v55 = vadd.f32 %v5733_v48, %v5437_v14  ;;  %v2435_v19 = vpack.c.bf16 %v5733_v48, %v5728_v58 }
 0xa59   :  { %4712 = vtanh.f32 %v2059_v49  ;;  %4306 = vmatpush3.bf16.msra.mxu1 %v4601_v47 }
 0xa5a   :  { %v2126_v61 = vpack.c.bf16 %v5742_v55, %v5738_v52  ;;  %4307 = vmatprep.subr.bf16.mxu1 %v4989_v0 }
 0xa5b   :  { %v4709_v62 = vpop.eup %4708 }
 0xa5c   :  { %4258 = vmatmul.mubr.bf16.gmra.mrb[128].mxu1 %v2126_v61  ;;  %v5748_v63 = vadd.f32 %v4709_v62, %v5446_v22 }
 0xa5d   :  { %v4711_v1 = vpop.eup %4710  ;;  %4261 = vmatprep.mubr.msk.bf16.mxu1 %vm4990_vm0, %v4989_v0  ;;  %4308 = vmatpush3.bf16.msra.mxu1 %v4602_v56 }
 0xa5e   :  { %v5753_v14 = vadd.f32 %v4711_v1, %v5449_v23  ;;  %4309 = vmatprep.subr.bf16.mxu1 %v4989_v0  ;;  %v5758_v2 = vadd.f32 %v5748_v63, %v5446_v22  ;;  %v4605_v22 = vld [vmem:[#allocation9 + $0x138] sm:$0xff]  }
 0xa60   :  { %v5762_v37 = vadd.f32 %v5753_v14, %v5449_v23  ;;  %v2436_v20 = vpack.c.bf16 %v5753_v14, %v5748_v63 }
 0xa61   :  { %4310 = vmatpush3.bf16.msra.mxu1 %v4603_v12 }
 0xa62   :  { %v2127_v9 = vpack.c.bf16 %v5762_v37, %v5758_v2  ;;  %4311 = vmatprep.subr.bf16.mxu1 %v4989_v0 }
 0xa63   :  { %v4713_v10 = vpop.eup %4712 }
 0xa64   :  { %4262 = vmatmul.mubr.bf16.gmra.mrb[132].mxu1 %v2127_v9  ;;  %v5768_v11 = vadd.f32 %v4713_v10, %v5457_v6 }
 0xa65   :  { %4265 = vmatprep.mubr.msk.bf16.mxu1 %vm4990_vm0, %v4989_v0  ;;  %4312 = vmatpush3.bf16.msra.mxu1 %v4604_v5  ;;  %v4606_v5 = vld [vmem:[%s6094_s10 + $0x24] sm:$0xff]  }
 0xa66   :  { %v5774_v23 = vadd.f32 %v5768_v11, %v5457_v6  ;;  %4313 = vmatprep.subr.bf16.mxu1 %v4989_v0  ;;  %v2434_v6 = vpack.c.bf16 %v5713_v27, %v5708_v35  ;;  %v2437_v53 = vpack.c.bf16 %v5768_v11, %v5768_v11 }
 0xa68   :  { %v2128_v15 = vpack.c.bf16 %v5774_v23, %v5774_v23 }
 0xa69   :  { %4314 = vmatpush3.bf16.msra.mxu1 %v4605_v22 }
 0xa6a   :  { %4365 = vmatprep.subr.bf16.mxu1 %v4989_v0 }
 0xa6c   :  { %4266 = vmatmul.mubr.bf16.gmra.mrb[136].mxu1 %v2128_v15 }
 0xa6d   :  { %4315 = vmatprep.mubr.msk.bf16.mxu1 %vm4990_vm0, %v4989_v0 }
 0xa74   :  { %4316 = vmatmul.mubr.bf16.vlgmr.msra.gmra.mrb[140].mxu1 %v2433_v16 }
 0xa75   :  { %4319 = vmatprep.mubr.msk.bf16.mxu1 %vm4990_vm0, %v4989_v0 }
 0xa7c   :  { %4320 = vmatmul.mubr.bf16.gmra.mrb[144].mxu1 %v2434_v6  ;;  %v4607_v6 = vld [vmem:[%s6094_s10 + $0x2c] sm:$0xff]  }
 0xa7d   :  { %4323 = vmatprep.mubr.msk.bf16.mxu1 %vm4990_vm0, %v4989_v0 }
 0xa84   :  { %4324 = vmatmul.mubr.bf16.gmra.mrb[148].mxu1 %v2435_v19 }
 0xa85   :  { %4327 = vmatprep.mubr.msk.bf16.mxu1 %vm4990_vm0, %v4989_v0 }
 0xa8c   :  { %4328 = vmatmul.mubr.bf16.gmra.mrb[152].mxu1 %v2436_v20 }
 0xa8d   :  { %4331 = vmatprep.mubr.msk.bf16.mxu1 %vm4990_vm0, %v4989_v0 }
 0xa94   :  { %4332 = vmatmul.mubr.bf16.gmra.mrb[156].mxu1 %v2437_v53 }
 0xa95   :  { %4381 = vmatprep.mubr.msk.bf16.mxu1 %vm4990_vm0, %v4989_v0 }
 0xb1f   :  { %v2211_v38 = vpop.f32.mrb[120].mxu1 }
 0xb20   :  { %v4251_v54 = vpop.f32.mrb[121].mxu1 }
 0xb21   :  { %v2214_v24 = vpop.f32.mrb[122].mxu1 }
 0xb22   :  { %v2249_v26 = vpack.c.bf16 %v2214_v24, %v2211_v38  ;;  %v4252_v7 = vpop.f32.mrb[123].mxu1  ;;  %v4608_v24 = vld [vmem:[%s6094_s10 + $0x34] sm:$0xff]  }
 0xb24   :  { %4270 = vmatpush3.bf16.msra.mxu0 %v2249_v26 }
 0xb25   :  { %4271 = vmatprep.subr.bf16.mxu0 %v4989_v0 }
 0xb27   :  { %v2219_v13 = vpop.f32.mrb[124].mxu1 }
 0xb28   :  { %v4255_v28 = vpop.f32.mrb[125].mxu1 }
 0xb29   :  { %v2222_v32 = vpop.f32.mrb[126].mxu1 }
 0xb2a   :  { %v2250_v33 = vpack.c.bf16 %v2222_v32, %v2219_v13  ;;  %v4256_v34 = vpop.f32.mrb[127].mxu1 }
 0xb2c   :  { %4272 = vmatpush3.bf16.msra.mxu0 %v2250_v33  ;;  %v4609_v33 = vld [vmem:[%s6094_s10 + $0x3c] sm:$0xff]  }
 0xb2d   :  { %4273 = vmatprep.subr.bf16.mxu0 %v4989_v0 }
 0xb2f   :  { %v2227_v40 = vpop.f32.mrb[128].mxu1 }
 0xb30   :  { %v4259_v41 = vpop.f32.mrb[129].mxu1 }
 0xb31   :  { %v2230_v42 = vpop.f32.mrb[130].mxu1 }
 0xb32   :  { %v2251_v43 = vpack.c.bf16 %v2230_v42, %v2227_v40  ;;  %v4260_v59 = vpop.f32.mrb[131].mxu1 }
 0xb33   :  { %v4610_v59 = vld [vmem:[%s6094_s10 + $0x44] ss:$0 sps:$4 sm:$0xff]  }
 0xb34   :  { %4274 = vmatpush3.bf16.msra.mxu0 %v2251_v43 }
 0xb35   :  { %4275 = vmatprep.subr.bf16.mxu0 %v4989_v0 }
 0xb37   :  { %v2235_v44 = vpop.f32.mrb[132].mxu1 }
 0xb38   :  { %v4263_v45 = vpop.f32.mrb[133].mxu1 }
 0xb39   :  { %v2238_v47 = vpop.f32.mrb[134].mxu1 }
 0xb3a   :  { %v2252_v17 = vpack.c.bf16 %v2238_v47, %v2235_v44  ;;  %v4264_v49 = vpop.f32.mrb[135].mxu1 }
 0xb3c   :  { %4276 = vmatpush3.bf16.msra.mxu0 %v2252_v17 }
 0xb3d   :  { %4277 = vmatprep.subr.bf16.mxu0 %v4989_v0 }
 0xb3f   :  { %v2243_v50 = vpop.f32.mrb[136].mxu1 }
 0xb40   :  { %v2253_v56 = vpack.c.bf16 %v2243_v50, %v2243_v50  ;;  %v4267_v61 = vpop.f32.mrb[137].mxu1 }
 0xb41   :  { %v2246_v62 = vpop.f32.mrb[138].mxu1  ;;  %v4612_v61 = vld [vmem:[%s6090_s6 + $0x98] sm:$0xff]  }
 0xb42   :  { %v2293_v1 = vsel %vm385_vm1, %v2253_v56, 0  ;;  %v4268_v12 = vpop.f32.mrb[139].mxu1  ;;  %v4611_v56 = vld [vmem:[%s6090_s6 + $0x90] sm:$0xff]   ;;  %v4613_v62 = vld [vmem:[%s6090_s6 + $0xa0] sm:$0xff]  }
 0xb43   :  { %4278 = vmatpush3.bf16.msra.mxu0 %v2293_v1  ;;  %v4614_v1 = vld [vmem:[%s6090_s6 + $0xa8] sm:$0xff]   ;;  %v4615_v12 = vld [vmem:[%s6090_s6 + $0xb0] ss:$0 sps:$4 sm:$0xff]  }
 0xb44   :  { %4335 = vmatprep.subr.bf16.mxu0 %v4989_v0 }
 0xb46   :  { %4280 = vmatmul.mubr.msk.bf16.vlgmr.msra.gmra.mrb[120].mxu0 %vm369_vm2, %v4606_v5  ;;  %v4616_v5 = vld [vmem:[#allocation9 + $0x140] sm:$0xff]  }
 0xb47   :  { %v2520_v9 = vpop.f32.mrb[140].mxu1  ;;  %4283 = vmatprep.mubr.msk.bf16.mxu0 %vm4990_vm0, %v4989_v0  ;;  %4366 = vmatpush3.bf16.msra.mxu1 %v4616_v5  ;;  %v2122_v5 = vld [vmem:[#allocation15 + $0x80] sm:$0xff] }
 0xb48   :  { %v4317_v10 = vpop.f32.mrb[141].mxu1  ;;  %4367 = vmatprep.subr.bf16.mxu1 %v4989_v0 }
 0xb49   :  { %v2523_v22 = vpop.f32.mrb[142].mxu1  ;;  %v4618_v10 = vld [vmem:[#allocation9 + $0x150] sm:$0xff]  }
 0xb4a   :  { %v2558_v15 = vpack.c.bf16 %v2523_v22, %v2520_v9  ;;  %v4318_v16 = vpop.f32.mrb[143].mxu1  ;;  %v4617_v9 = vld [vmem:[#allocation9 + $0x148] sm:$0xff]   ;;  %v4619_v22 = vld [vmem:[#allocation9 + $0x158] sm:$0xff]  }
 0xb4b   :  { %4368 = vmatpush3.bf16.msra.mxu1 %v4617_v9  ;;  %v4621_v16 = vld [vmem:[#allocation9 + $0x168] sm:$0xff]  }
 0xb4c   :  { %4336 = vmatpush3.bf16.msra.mxu0 %v2558_v15  ;;  %4369 = vmatprep.subr.bf16.mxu1 %v4989_v0  ;;  %v4620_v15 = vld [vmem:[#allocation9 + $0x160] sm:$0xff]  }
 0xb4d   :  { %4337 = vmatprep.subr.bf16.mxu0 %v4989_v0 }
 0xb4e   :  { %4284 = vmatmul.mubr.msk.bf16.gmra.mrb[124].mxu0 %vm369_vm2, %v4607_v6  ;;  %v4622_v6 = vld [vmem:[#allocation9 + $0x170] sm:$0xff]  }
 0xb4f   :  { %v2528_v19 = vpop.f32.mrb[144].mxu1  ;;  %4287 = vmatprep.mubr.msk.bf16.mxu0 %vm4990_vm0, %v4989_v0  ;;  %4370 = vmatpush3.bf16.msra.mxu1 %v4618_v10 }
 0xb50   :  { %v4321_v20 = vpop.f32.mrb[145].mxu1  ;;  %4371 = vmatprep.subr.bf16.mxu1 %v4989_v0 }
 0xb51   :  { %v2531_v53 = vpop.f32.mrb[146].mxu1  ;;  %v2115_v20 = vld [vmem:[#allocation15 + $0x48] sm:$0xff] }
 0xb52   :  { %v2559_v38 = vpack.c.bf16 %v2531_v53, %v2528_v19  ;;  %v4322_v54 = vpop.f32.mrb[147].mxu1  ;;  %v4623_v19 = vld [vmem:[#allocation9 + $0x178] sm:$0xff]  }
 0xb53   :  { %4372 = vmatpush3.bf16.msra.mxu1 %v4619_v22 }
 0xb54   :  { %4338 = vmatpush3.bf16.msra.mxu0 %v2559_v38  ;;  %4373 = vmatprep.subr.bf16.mxu1 %v4989_v0  ;;  %v2116_v38 = vld [vmem:[#allocation15 + $0x50] sm:$0xff] }
 0xb55   :  { %4339 = vmatprep.subr.bf16.mxu0 %v4989_v0 }
 0xb56   :  { %4288 = vmatmul.mubr.msk.bf16.gmra.mrb[128].mxu0 %vm369_vm2, %v4608_v24 }
 0xb57   :  { %v2536_v26 = vpop.f32.mrb[148].mxu1  ;;  %4291 = vmatprep.mubr.msk.bf16.mxu0 %vm4990_vm0, %v4989_v0  ;;  %4374 = vmatpush3.bf16.msra.mxu1 %v4620_v15 }
 0xb58   :  { %v4325_v7 = vpop.f32.mrb[149].mxu1  ;;  %4375 = vmatprep.subr.bf16.mxu1 %v4989_v0 }
 0xb59   :  { %v2539_v13 = vpop.f32.mrb[150].mxu1 }
 0xb5a   :  { %v2560_v28 = vpack.c.bf16 %v2539_v13, %v2536_v26  ;;  %v4326_v32 = vpop.f32.mrb[151].mxu1 }
 0xb5b   :  { %4376 = vmatpush3.bf16.msra.mxu1 %v4621_v16 }
 0xb5c   :  { %4340 = vmatpush3.bf16.msra.mxu0 %v2560_v28  ;;  %4377 = vmatprep.subr.bf16.mxu1 %v4989_v0 }
 0xb5d   :  { %4341 = vmatprep.subr.bf16.mxu0 %v4989_v0 }
 0xb5e   :  { %4292 = vmatmul.mubr.msk.bf16.gmra.mrb[132].mxu0 %vm369_vm2, %v4609_v33  ;;  %v2117_v33 = vld [vmem:[#allocation15 + $0x58] sm:$0xff] }
 0xb5f   :  { %v2544_v34 = vpop.f32.mrb[152].mxu1  ;;  %4295 = vmatprep.mubr.msk.bf16.mxu0 %vm4990_vm0, %v4989_v0  ;;  %4378 = vmatpush3.bf16.msra.mxu1 %v4622_v6  ;;  %v2123_v6 = vld [vmem:[#allocation15 + $0x88] sm:$0xff] }
 0xb60   :  { %v4329_v40 = vpop.f32.mrb[153].mxu1  ;;  %4379 = vmatprep.subr.bf16.mxu1 %v4989_v0 }
 0xb61   :  { %v2547_v41 = vpop.f32.mrb[154].mxu1  ;;  %v2118_v40 = vld [vmem:[#allocation15 + $0x60] sm:$0xff] }
 0xb62   :  { %v2561_v42 = vpack.c.bf16 %v2547_v41, %v2544_v34  ;;  %v4330_v43 = vpop.f32.mrb[155].mxu1 }
 0xb63   :  { %4380 = vmatpush3.bf16.msra.mxu1 %v4623_v19 }
 0xb64   :  { %4342 = vmatpush3.bf16.msra.mxu0 %v2561_v42  ;;  %4431 = vmatprep.subr.bf16.mxu1 %v4989_v0 }
 0xb65   :  { %4343 = vmatprep.subr.bf16.mxu0 %v4989_v0 }
 0xb66   :  { %4296 = vmatmul.mubr.msk.bf16.gmra.mrb[136].mxu0 %vm369_vm2, %v4610_v59 }
 0xb67   :  { %v2552_v44 = vpop.f32.mrb[156].mxu1  ;;  %4345 = vmatprep.mubr.msk.bf16.mxu0 %vm4990_vm0, %v4989_v0 }
 0xb68   :  { %v2562_v45 = vpack.c.bf16 %v2552_v44, %v2552_v44  ;;  %v4333_v47 = vpop.f32.mrb[157].mxu1 }
 0xb69   :  { %v2555_v17 = vpop.f32.mrb[158].mxu1 }
 0xb6a   :  { %v2602_v49 = vsel %vm385_vm1, %v2562_v45, 0  ;;  %v4334_v50 = vpop.f32.mrb[159].mxu1  ;;  %v2119_v45 = vld [vmem:[#allocation15 + $0x68] sm:$0xff]  ;;  %v2120_v17 = vld [vmem:[#allocation15 + $0x70] sm:$0xff] }
 0xb6b   :  { %4344 = vmatpush3.bf16.msra.mxu0 %v2602_v49 }
 0xb6c   :  { %4401 = vmatprep.subr.bf16.mxu0 %v4989_v0 }
 0xb6e   :  { %4346 = vmatmul.mubr.msk.bf16.vlgmr.msra.gmra.mrb[140].mxu0 %vm369_vm2, %v4611_v56 }
 0xb6f   :  { %4349 = vmatprep.mubr.msk.bf16.mxu0 %vm4990_vm0, %v4989_v0 }
 0xb76   :  { %4350 = vmatmul.mubr.msk.bf16.gmra.mrb[144].mxu0 %vm369_vm2, %v4612_v61 }
 0xb77   :  { %4353 = vmatprep.mubr.msk.bf16.mxu0 %vm4990_vm0, %v4989_v0 }
 0xb7e   :  { %4354 = vmatmul.mubr.msk.bf16.gmra.mrb[148].mxu0 %vm369_vm2, %v4613_v62 }
 0xb7f   :  { %4357 = vmatprep.mubr.msk.bf16.mxu0 %vm4990_vm0, %v4989_v0 }
 0xb86   :  { %4358 = vmatmul.mubr.msk.bf16.gmra.mrb[152].mxu0 %vm369_vm2, %v4614_v1  ;;  %v2121_v1 = vld [vmem:[#allocation15 + $0x78] sm:$0xff] }
 0xb87   :  { %4361 = vmatprep.mubr.msk.bf16.mxu0 %vm4990_vm0, %v4989_v0 }
 0xb8e   :  { %4362 = vmatmul.mubr.msk.bf16.gmra.mrb[156].mxu0 %vm369_vm2, %v4615_v12 }
 0xb8f   :  { %4411 = vmatprep.mubr.msk.bf16.mxu0 %vm4990_vm0, %v4989_v0 }
 0xc19   :  { %v2329_v53 = vpop.f32.mrb[120].mxu0 }
 0xc1a   :  { %v2330_v54 = vadd.f32 %v2329_v53, %v2115_v20  ;;  %v4281_v24 = vpop.f32.mrb[121].mxu0 }
 0xc1b   :  { %v2332_v26 = vpop.f32.mrb[122].mxu0  ;;  %v2414_v24 = vld [vmem:[#allocation10 + $0x120] sm:$0xff] }
 0xc1c   :  { %v2367_v7 = vadd.f32 %v5559_v51, %v2330_v54  ;;  %v2333_v13 = vadd.f32 %v2332_v26, %v2116_v38  ;;  %v4282_v28 = vpop.f32.mrb[123].mxu0  ;;  %v2424_v26 = vld [vmem:[#allocation12 + $0x120] sm:$0xff] }
 0xc1e   :  { %3508 = vst [vmem:[%s6096_s12 + $0x48] sm:$0xff] %v2367_v7  ;;  %v2368_v32 = vadd.f32 %v5568_v57, %v2333_v13 }
 0xc20   :  { %3509 = vst [vmem:[%s6096_s12 + $0x50] sm:$0xff] %v2368_v32  ;;  %v2425_v32 = vld [vmem:[#allocation12 + $0x128] sm:$0xff] }
 0xc21   :  { %v2337_v34 = vpop.f32.mrb[124].mxu0 }
 0xc22   :  { %v2338_v41 = vadd.f32 %v2337_v34, %v2117_v33  ;;  %v4285_v42 = vpop.f32.mrb[125].mxu0 }
 0xc23   :  { %v2340_v43 = vpop.f32.mrb[126].mxu0 }
 0xc24   :  { %v2369_v51 = vadd.f32 %v5577_v4, %v2338_v41  ;;  %v2341_v59 = vadd.f32 %v2340_v43, %v2118_v40  ;;  %v4286_v44 = vpop.f32.mrb[127].mxu0  ;;  %v2416_v43 = vld [vmem:[#allocation10 + $0x130] sm:$0xff] }
 0xc26   :  { %3510 = vst [vmem:[%s6096_s12 + $0x58] sm:$0xff] %v2369_v51  ;;  %v2370_v57 = vadd.f32 %v5586_v8, %v2341_v59  ;;  %v2417_v59 = vld [vmem:[#allocation10 + $0x138] sm:$0xff] }
 0xc28   :  { %3511 = vst [vmem:[%s6096_s12 + $0x60] sm:$0xff] %v2370_v57 }
 0xc29   :  { %v2345_v47 = vpop.f32.mrb[128].mxu0 }
 0xc2a   :  { %v2346_v49 = vadd.f32 %v2345_v47, %v2119_v45  ;;  %v4289_v50 = vpop.f32.mrb[129].mxu0  ;;  %v2427_v45 = vld [vmem:[#allocation12 + $0x138] sm:$0xff] }
 0xc2b   :  { %v2348_v56 = vpop.f32.mrb[130].mxu0 }
 0xc2c   :  { %v2371_v4 = vadd.f32 %v5595_v21, %v2346_v49  ;;  %v2349_v61 = vadd.f32 %v2348_v56, %v2120_v17  ;;  %v4290_v62 = vpop.f32.mrb[131].mxu0 }
 0xc2d   :  { %v2428_v62 = vld [vmem:[#allocation12 + $0x140] sm:$0xff] }
 0xc2e   :  { %3512 = vst [vmem:[%s6096_s12 + $0x68] sm:$0xff] %v2371_v4  ;;  %v2372_v8 = vadd.f32 %v5604_v25, %v2349_v61  ;;  %v2418_v4 = vld [vmem:[#allocation10 + $0x140] sm:$0xff] }
 0xc30   :  { %3513 = vst [vmem:[%s6096_s12 + $0x70] sm:$0xff] %v2372_v8 }
 0xc31   :  { %v2353_v12 = vpop.f32.mrb[132].mxu0 }
 0xc32   :  { %v2354_v9 = vadd.f32 %v2353_v12, %v2121_v1  ;;  %v4293_v10 = vpop.f32.mrb[133].mxu0  ;;  %v2419_v1 = vld [vmem:[#allocation10 + $0x148] sm:$0xff] }
 0xc33   :  { %v2356_v22 = vpop.f32.mrb[134].mxu0  ;;  %v2429_v10 = vld [vmem:[#allocation12 + $0x148] sm:$0xff] }
 0xc34   :  { %v2373_v21 = vadd.f32 %v5613_v31, %v2354_v9  ;;  %v2357_v15 = vadd.f32 %v2356_v22, %v2122_v5  ;;  %v4294_v16 = vpop.f32.mrb[135].mxu0 }
 0xc36   :  { %3514 = vst [vmem:[%s6096_s12 + $0x78] sm:$0xff] %v2373_v21  ;;  %v2374_v25 = vadd.f32 %v5622_v39, %v2357_v15  ;;  %v2415_v39 = vld [vmem:[#allocation10 + $0x128] sm:$0xff] }
 0xc38   :  { %3515 = vst [vmem:[%s6096_s12 + $0x80] sm:$0xff] %v2374_v25 }
 0xc39   :  { %v2361_v19 = vpop.f32.mrb[136].mxu0 }
 0xc3a   :  { %v2362_v20 = vadd.f32 %v2361_v19, %v2123_v6  ;;  %v4297_v53 = vpop.f32.mrb[137].mxu0  ;;  %v2420_v19 = vld [vmem:[#allocation10 + $0x150] sm:$0xff] }
 0xc3b   :  { %v2364_v38 = vpop.f32.mrb[138].mxu0  ;;  %v2430_v53 = vld [vmem:[#allocation12 + $0x150] sm:$0xff] }
 0xc3c   :  { %v2375_v54 = vadd.f32 %v5631_v46, %v2362_v20  ;;  %v4298_v31 = vpop.f32.mrb[139].mxu0  ;;  %v2426_v46 = vld [vmem:[#allocation12 + $0x130] sm:$0xff] }
 0xc3e   :  { %3516 = vst [vmem:[%s6096_s12 + $0x88] sm:$0xff] %v2375_v54  ;;  %v2421_v54 = vld [vmem:[#allocation10 + $0x158] sm:$0xff] }
 0xc41   :  { %v2638_v7 = vpop.f32.mrb[140].mxu0 }
 0xc42   :  { %v2676_v13 = vmul.f32 %v2638_v7, %v2414_v24  ;;  %v4347_v28 = vpop.f32.mrb[141].mxu0  ;;  %v2431_v7 = vld [vmem:[#allocation12 + $0x158] sm:$0xff] }
 0xc43   :  { %v2641_v33 = vpop.f32.mrb[142].mxu0 }
 0xc44   :  { %v2685_v34 = vadd.f32 %v2676_v13, %v2424_v26  ;;  %v2677_v40 = vmul.f32 %v2641_v33, %v2415_v39  ;;  %v4348_v41 = vpop.f32.mrb[143].mxu0 }
 0xc46   :  { %v2686_v42 = vadd.f32 %v2677_v40, %v2425_v32  ;;  %4714 = vtanh.f32 %v2685_v34  ;;  %v2422_v40 = vld [vmem:[#allocation10 + $0x160] sm:$0xff] }
 0xc48   :  { %4716 = vtanh.f32 %v2686_v42  ;;  %v2432_v42 = vld [vmem:[#allocation12 + $0x160] sm:$0xff] }
 0xc49   :  { %v2646_v51 = vpop.f32.mrb[144].mxu0 }
 0xc4a   :  { %v2678_v44 = vmul.f32 %v2646_v51, %v2416_v43  ;;  %v4351_v57 = vpop.f32.mrb[145].mxu0 }
 0xc4b   :  { %v2649_v47 = vpop.f32.mrb[146].mxu0 }
 0xc4c   :  { %v2687_v17 = vadd.f32 %v2678_v44, %v2426_v46  ;;  %v2679_v49 = vmul.f32 %v2649_v47, %v2417_v59  ;;  %v4352_v50 = vpop.f32.mrb[147].mxu0 }
 0xc4e   :  { %v2688_v56 = vadd.f32 %v2679_v49, %v2427_v45  ;;  %4718 = vtanh.f32 %v2687_v17 }
 0xc50   :  { %4720 = vtanh.f32 %v2688_v56  ;;  %v4715_v61 = vpop.eup %4714 }
 0xc51   :  { %v2654_v8 = vpop.f32.mrb[148].mxu0 }
 0xc52   :  { %v4717_v12 = vpop.eup %4716  ;;  %v2680_v5 = vmul.f32 %v2654_v8, %v2418_v4  ;;  %v4355_v9 = vpop.f32.mrb[149].mxu0 }
 0xc53   :  { %v2657_v22 = vpop.f32.mrb[150].mxu0  ;;  %v2750_v21 = vpack.c.bf16 %v4717_v12, %v4715_v61  ;;  %v4629_v61 = vld [vmem:[#allocation13 + $0x80] sm:$0xff]  }
 0xc54   :  { %v2689_v15 = vadd.f32 %v2680_v5, %v2428_v62  ;;  %v2681_v16 = vmul.f32 %v2657_v22, %v2419_v1  ;;  %v4356_v25 = vpop.f32.mrb[151].mxu0  ;;  %v4630_v62 = vld [vmem:[#allocation13 + $0x88] sm:$0xff]  }
 0xc55   :  { %4382 = vmatmul.mubr.bf16.vlgmr.msra.gmra.mrb[160].mxu1 %v2750_v21 }
 0xc56   :  { %v2690_v6 = vadd.f32 %v2681_v16, %v2429_v10  ;;  %4385 = vmatprep.mubr.msk.bf16.mxu1 %vm4990_vm0, %v4989_v0  ;;  %4722 = vtanh.f32 %v2689_v15  ;;  %4432 = vmatpush3.bf16.msra.mxu1 %v4629_v61  ;;  %v2742_v61 = vld [vmem:[#allocation12 + $0x170] sm:$0xff] }
 0xc57   :  { %4433 = vmatprep.subr.bf16.mxu1 %v4989_v0 }
 0xc58   :  { %4724 = vtanh.f32 %v2690_v6  ;;  %v4719_v20 = vpop.eup %4718 }
 0xc59   :  { %v2662_v38 = vpop.f32.mrb[152].mxu0 }
 0xc5a   :  { %v4721_v31 = vpop.eup %4720  ;;  %v2682_v24 = vmul.f32 %v2662_v38, %v2420_v19  ;;  %v4359_v26 = vpop.f32.mrb[153].mxu0  ;;  %4434 = vmatpush3.bf16.msra.mxu1 %v4630_v62 }
 0xc5b   :  { %v2665_v39 = vpop.f32.mrb[154].mxu0  ;;  %v2751_v13 = vpack.c.bf16 %v4721_v31, %v4719_v20  ;;  %4435 = vmatprep.subr.bf16.mxu1 %v4989_v0 }
 0xc5c   :  { %v2691_v28 = vadd.f32 %v2682_v24, %v2430_v53  ;;  %v2683_v32 = vmul.f32 %v2665_v39, %v2421_v54  ;;  %v4360_v33 = vpop.f32.mrb[155].mxu0 }
 0xc5d   :  { %4386 = vmatmul.mubr.bf16.gmra.mrb[164].mxu1 %v2751_v13 }
 0xc5e   :  { %v2692_v34 = vadd.f32 %v2683_v32, %v2431_v7  ;;  %4389 = vmatprep.mubr.msk.bf16.mxu1 %vm4990_vm0, %v4989_v0  ;;  %4726 = vtanh.f32 %v2691_v28 }
 0xc60   :  { %4728 = vtanh.f32 %v2692_v34  ;;  %v4723_v41 = vpop.eup %4722  ;;  %v4624_v34 = vld [vmem:[%s6090_s6 + $0xb4] sm:$0xff]  }
 0xc61   :  { %v2670_v43 = vpop.f32.mrb[156].mxu0 }
 0xc62   :  { %v4725_v46 = vpop.eup %4724  ;;  %v2684_v51 = vmul.f32 %v2670_v43, %v2422_v40  ;;  %v4363_v59 = vpop.f32.mrb[157].mxu0  ;;  %v4625_v40 = vld [vmem:[%s6090_s6 + $0xbc] sm:$0xff]   ;;  %v4628_v43 = vld [vmem:[%s6090_s6 + $0xd4] ss:$0 sps:$4 sm:$0xff]  }
 0xc63   :  { %v2673_v44 = vpop.f32.mrb[158].mxu0  ;;  %v2752_v57 = vpack.c.bf16 %v4725_v46, %v4723_v41  ;;  %v4626_v41 = vld [vmem:[%s6090_s6 + $0xc4] sm:$0xff]   ;;  %v4633_v59 = vld [vmem:[#allocation13 + $0xa0] sm:$0xff]  }
 0xc64   :  { %v2693_v45 = vadd.f32 %v2684_v51, %v2432_v42  ;;  %v4364_v47 = vpop.f32.mrb[159].mxu0  ;;  %v4627_v42 = vld [vmem:[%s6090_s6 + $0xcc] sm:$0xff]   ;;  %v4631_v46 = vld [vmem:[#allocation13 + $0x90] sm:$0xff]   ;;  %v4634_v44 = vld [vmem:[#allocation13 + $0xa8] sm:$0xff]  }
 0xc65   :  { %4390 = vmatmul.mubr.bf16.gmra.mrb[168].mxu1 %v2752_v57  ;;  %v4632_v51 = vld [vmem:[#allocation13 + $0x98] sm:$0xff]   ;;  %v4635_v57 = vld [vmem:[#allocation13 + $0xb0] sm:$0xff]   ;;  %v2731_v47 = vld [vmem:[#allocation10 + $0x168] sm:$0xff] }
 0xc66   :  { %4730 = vtanh.f32 %v2693_v45  ;;  %4393 = vmatprep.mubr.msk.bf16.mxu1 %vm4990_vm0, %v4989_v0  ;;  %4436 = vmatpush3.bf16.msra.mxu1 %v4631_v46  ;;  %v4636_v45 = vld [vmem:[#allocation13 + $0xb8] sm:$0xff]  }
 0xc67   :  { %4437 = vmatprep.subr.bf16.mxu1 %v4989_v0 }
 0xc68   :  { %v4727_v17 = vpop.eup %4726 }
 0xc6a   :  { %v4729_v49 = vpop.eup %4728  ;;  %4438 = vmatpush3.bf16.msra.mxu1 %v4632_v51 }
 0xc6b   :  { %v2753_v50 = vpack.c.bf16 %v4729_v49, %v4727_v17  ;;  %4439 = vmatprep.subr.bf16.mxu1 %v4989_v0  ;;  %v2741_v17 = vld [vmem:[#allocation12 + $0x168] sm:$0xff] }
 0xc6d   :  { %4394 = vmatmul.mubr.bf16.gmra.mrb[172].mxu1 %v2753_v50  ;;  %v2732_v50 = vld [vmem:[#allocation10 + $0x170] sm:$0xff] }
 0xc6e   :  { %4397 = vmatprep.mubr.msk.bf16.mxu1 %vm4990_vm0, %v4989_v0  ;;  %4440 = vmatpush3.bf16.msra.mxu1 %v4633_v59 }
 0xc6f   :  { %4441 = vmatprep.subr.bf16.mxu1 %v4989_v0 }
 0xc70   :  { %v4731_v56 = vpop.eup %4730 }
 0xc71   :  { %v2754_v4 = vpack.c.bf16 %v4731_v56, %v4731_v56 }
 0xc72   :  { %4442 = vmatpush3.bf16.msra.mxu1 %v4634_v44 }
 0xc73   :  { %4443 = vmatprep.subr.bf16.mxu1 %v4989_v0 }
 0xc75   :  { %4398 = vmatmul.mubr.bf16.gmra.mrb[176].mxu1 %v2754_v4 }
 0xc76   :  { %4447 = vmatprep.mubr.msk.bf16.mxu1 %vm4990_vm0, %v4989_v0  ;;  %4444 = vmatpush3.bf16.msra.mxu1 %v4635_v57 }
 0xc77   :  { %4445 = vmatprep.subr.bf16.mxu1 %v4989_v0 }
 0xc7a   :  { %4446 = vmatpush3.bf16.msra.mxu1 %v4636_v45  ;;  %v2747_v45 = vld [vmem:[#allocation12 + $0x198] sm:$0xff] }
 0xd28   :  { %v2837_v8 = vpop.f32.mrb[160].mxu1 }
 0xd29   :  { %v4383_v1 = vpop.f32.mrb[161].mxu1 }
 0xd2a   :  { %v2840_v12 = vpop.f32.mrb[162].mxu1 }
 0xd2b   :  { %v2875_v5 = vpack.c.bf16 %v2840_v12, %v2837_v8  ;;  %v4384_v9 = vpop.f32.mrb[163].mxu1 }
 0xd2c   :  { %v2733_v9 = vld [vmem:[#allocation10 + $0x178] sm:$0xff] }
 0xd2d   :  { %4402 = vmatpush3.bf16.msra.mxu0 %v2875_v5 }
 0xd2e   :  { %4403 = vmatprep.subr.bf16.mxu0 %v4989_v0 }
 0xd30   :  { %v2845_v10 = vpop.f32.mrb[164].mxu1 }
 0xd31   :  { %v4387_v22 = vpop.f32.mrb[165].mxu1 }
 0xd32   :  { %v2848_v21 = vpop.f32.mrb[166].mxu1 }
 0xd33   :  { %v2876_v15 = vpack.c.bf16 %v2848_v21, %v2845_v10  ;;  %v4388_v16 = vpop.f32.mrb[167].mxu1  ;;  %v2743_v10 = vld [vmem:[#allocation12 + $0x178] sm:$0xff]  ;;  %v2734_v21 = vld [vmem:[#allocation10 + $0x180] sm:$0xff] }
 0xd35   :  { %4404 = vmatpush3.bf16.msra.mxu0 %v2876_v15 }
 0xd36   :  { %4405 = vmatprep.subr.bf16.mxu0 %v4989_v0 }
 0xd38   :  { %v2853_v25 = vpop.f32.mrb[168].mxu1 }
 0xd39   :  { %v4391_v6 = vpop.f32.mrb[169].mxu1 }
 0xd3a   :  { %v2856_v19 = vpop.f32.mrb[170].mxu1 }
 0xd3b   :  { %v2877_v20 = vpack.c.bf16 %v2856_v19, %v2853_v25  ;;  %v4392_v53 = vpop.f32.mrb[171].mxu1  ;;  %v2744_v25 = vld [vmem:[#allocation12 + $0x180] sm:$0xff] }
 0xd3d   :  { %4406 = vmatpush3.bf16.msra.mxu0 %v2877_v20 }
 0xd3e   :  { %4407 = vmatprep.subr.bf16.mxu0 %v4989_v0 }
 0xd40   :  { %v2861_v38 = vpop.f32.mrb[172].mxu1 }
 0xd41   :  { %v4395_v54 = vpop.f32.mrb[173].mxu1 }
 0xd42   :  { %v2864_v31 = vpop.f32.mrb[174].mxu1  ;;  %v2735_v54 = vld [vmem:[#allocation10 + $0x188] sm:$0xff] }
 0xd43   :  { %v2878_v24 = vpack.c.bf16 %v2864_v31, %v2861_v38  ;;  %v4396_v26 = vpop.f32.mrb[175].mxu1 }
 0xd44   :  { %v2745_v26 = vld [vmem:[#allocation12 + $0x188] sm:$0xff] }
 0xd45   :  { %4408 = vmatpush3.bf16.msra.mxu0 %v2878_v24 }
 0xd46   :  { %4409 = vmatprep.subr.bf16.mxu0 %v4989_v0 }
 0xd48   :  { %v2869_v7 = vpop.f32.mrb[176].mxu1 }
 0xd49   :  { %v2879_v39 = vpack.c.bf16 %v2869_v7, %v2869_v7  ;;  %v4399_v13 = vpop.f32.mrb[177].mxu1 }
 0xd4a   :  { %v2872_v28 = vpop.f32.mrb[178].mxu1 }
 0xd4b   :  { %v2919_v32 = vsel %vm385_vm1, %v2879_v39, 0  ;;  %v4400_v33 = vpop.f32.mrb[179].mxu1  ;;  %v2736_v39 = vld [vmem:[#allocation10 + $0x190] sm:$0xff] }
 0xd4c   :  { %4410 = vmatpush3.bf16.msra.mxu0 %v2919_v32 }
 0xd4d   :  { %4467 = vmatprep.subr.bf16.mxu0 %v4989_v0 }
 0xd4f   :  { %4412 = vmatmul.mubr.msk.bf16.vlgmr.msra.gmra.mrb[160].mxu0 %vm369_vm2, %v4624_v34  ;;  %v2746_v34 = vld [vmem:[#allocation12 + $0x190] sm:$0xff] }
 0xd50   :  { %4415 = vmatprep.mubr.msk.bf16.mxu0 %vm4990_vm0, %v4989_v0 }
 0xd57   :  { %4416 = vmatmul.mubr.msk.bf16.gmra.mrb[164].mxu0 %vm369_vm2, %v4625_v40 }
 0xd58   :  { %4419 = vmatprep.mubr.msk.bf16.mxu0 %vm4990_vm0, %v4989_v0 }
 0xd5f   :  { %4420 = vmatmul.mubr.msk.bf16.gmra.mrb[168].mxu0 %vm369_vm2, %v4626_v41 }
 0xd60   :  { %4423 = vmatprep.mubr.msk.bf16.mxu0 %vm4990_vm0, %v4989_v0 }
 0xd67   :  { %4424 = vmatmul.mubr.msk.bf16.gmra.mrb[172].mxu0 %vm369_vm2, %v4627_v42 }
 0xd68   :  { %4427 = vmatprep.mubr.msk.bf16.mxu0 %vm4990_vm0, %v4989_v0 }
 0xd6f   :  { %4428 = vmatmul.mubr.msk.bf16.gmra.mrb[176].mxu0 %vm369_vm2, %v4628_v43 }
 0xd70   :  { %4477 = vmatprep.mubr.msk.bf16.mxu0 %vm4990_vm0, %v4989_v0 }
 0xe22   :  { %v2955_v49 = vpop.f32.mrb[160].mxu0 }
 0xe23   :  { %v2993_v56 = vmul.f32 %v2955_v49, %v2731_v47  ;;  %v4413_v4 = vpop.f32.mrb[161].mxu0 }
 0xe24   :  { %v2958_v62 = vpop.f32.mrb[162].mxu0 }
 0xe25   :  { %v3002_v8 = vadd.f32 %v2993_v56, %v2741_v17  ;;  %v2994_v1 = vmul.f32 %v2958_v62, %v2732_v50  ;;  %v4414_v12 = vpop.f32.mrb[163].mxu0  ;;  %v2738_v17 = vld [vmem:[#allocation10 + $0x1a0] sm:$0xff] }
 0xe27   :  { %4732 = vtanh.f32 %v3002_v8  ;;  %v3003_v5 = vadd.f32 %v2994_v1, %v2742_v61 }
 0xe29   :  { %4734 = vtanh.f32 %v3003_v5 }
 0xe2a   :  { %v2963_v22 = vpop.f32.mrb[164].mxu0 }
 0xe2b   :  { %v2995_v15 = vmul.f32 %v2963_v22, %v2733_v9  ;;  %v4417_v16 = vpop.f32.mrb[165].mxu0  ;;  %v2749_v22 = vld [vmem:[#allocation12 + $0x1a8] sm:$0xff] }
 0xe2c   :  { %v2966_v6 = vpop.f32.mrb[166].mxu0 }
 0xe2d   :  { %v3004_v19 = vadd.f32 %v2995_v15, %v2743_v10  ;;  %v2996_v20 = vmul.f32 %v2966_v6, %v2734_v21  ;;  %v4418_v53 = vpop.f32.mrb[167].mxu0 }
 0xe2f   :  { %4736 = vtanh.f32 %v3004_v19  ;;  %v3005_v38 = vadd.f32 %v2996_v20, %v2744_v25 }
 0xe31   :  { %v4733_v31 = vpop.eup %4732  ;;  %4738 = vtanh.f32 %v3005_v38 }
 0xe32   :  { %v3020_v24 = vadd.f32 %v4733_v31, %v5692_v18  ;;  %v2971_v7 = vpop.f32.mrb[168].mxu0  ;;  %v2737_v18 = vld [vmem:[#allocation10 + $0x198] sm:$0xff] }
 0xe33   :  { %v4735_v13 = vpop.eup %4734  ;;  %v2997_v28 = vmul.f32 %v2971_v7, %v2735_v54  ;;  %v4421_v32 = vpop.f32.mrb[169].mxu0 }
 0xe34   :  { %v3021_v33 = vadd.f32 %v4735_v13, %v5695_v60  ;;  %v2974_v40 = vpop.f32.mrb[170].mxu0  ;;  %v3029_v46 = vadd.f32 %v3020_v24, %v5699_v3  ;;  %v2748_v3 = vld [vmem:[#allocation12 + $0x1a0] sm:$0xff] }
 0xe35   :  { %v3006_v41 = vadd.f32 %v2997_v28, %v2745_v26  ;;  %v2998_v42 = vmul.f32 %v2974_v40, %v2736_v39  ;;  %v4422_v43 = vpop.f32.mrb[171].mxu0 }
 0xe36   :  { %v3030_v51 = vadd.f32 %v3021_v33, %v5703_v36 }
 0xe37   :  { %4740 = vtanh.f32 %v3006_v41  ;;  %v3007_v59 = vadd.f32 %v2998_v42, %v2746_v34 }
 0xe38   :  { %v3075_v44 = vpack.c.bf16 %v3030_v51, %v3029_v46 }
 0xe39   :  { %v4737_v57 = vpop.eup %4736  ;;  %4742 = vtanh.f32 %v3007_v59 }
 0xe3a   :  { %v2979_v47 = vpop.f32.mrb[172].mxu0  ;;  %4448 = vmatmul.mubr.bf16.vlgmr.msra.gmra.mrb[180].mxu1 %v3075_v44  ;;  %v3022_v60 = vadd.f32 %v4737_v57, %v5708_v35  ;;  %v2739_v35 = vld [vmem:[#allocation10 + $0x1a8] sm:$0xff] }
 0xe3b   :  { %v4739_v49 = vpop.eup %4738  ;;  %v2999_v50 = vmul.f32 %v2979_v47, %v2737_v18  ;;  %v4425_v56 = vpop.f32.mrb[173].mxu0  ;;  %4451 = vmatprep.mubr.msk.bf16.mxu1 %vm4990_vm0, %v4989_v0 }
 0xe3c   :  { %v2982_v36 = vpop.f32.mrb[174].mxu0  ;;  %v3023_v4 = vadd.f32 %v4739_v49, %v5713_v27  ;;  %v3031_v1 = vadd.f32 %v3022_v60, %v5718_v29  ;;  %v4637_v56 = vld [vmem:[%s6094_s10 + $0x48] sm:$0xff]  }
 0xe3d   :  { %v3008_v61 = vadd.f32 %v2999_v50, %v2747_v45  ;;  %v3000_v62 = vmul.f32 %v2982_v36, %v2738_v17  ;;  %v4426_v8 = vpop.f32.mrb[175].mxu0  ;;  %v4639_v36 = vld [vmem:[%s6094_s10 + $0x58] sm:$0xff]  }
 0xe3e   :  { %v3032_v12 = vadd.f32 %v3023_v4, %v5722_v30  ;;  %v4640_v4 = vld [vmem:[%s6094_s10 + $0x60] sm:$0xff]  }
 0xe3f   :  { %4744 = vtanh.f32 %v3008_v61  ;;  %v3009_v5 = vadd.f32 %v3000_v62, %v2748_v3  ;;  %v4638_v3 = vld [vmem:[%s6094_s10 + $0x50] sm:$0xff]   ;;  %v4641_v61 = vld [vmem:[%s6094_s10 + $0x68] ss:$0 sps:$4 sm:$0xff]  }
 0xe40   :  { %v3076_v9 = vpack.c.bf16 %v3032_v12, %v3031_v1  ;;  %v3066_v62 = vld [vmem:[#allocation15 + $0x90] sm:$0xff]  ;;  %v3067_v1 = vld [vmem:[#allocation15 + $0x98] sm:$0xff] }
 0xe41   :  { %v4741_v10 = vpop.eup %4740  ;;  %4746 = vtanh.f32 %v3009_v5 }
 0xe42   :  { %v2987_v21 = vpop.f32.mrb[176].mxu0  ;;  %4452 = vmatmul.mubr.bf16.gmra.mrb[184].mxu1 %v3076_v9  ;;  %v3024_v15 = vadd.f32 %v4741_v10, %v5728_v58  ;;  %v4759_v9 = vld [vmem:[%s6084_s0] sm:$0xff] }
 0xe43   :  { %v4743_v16 = vpop.eup %4742  ;;  %v3001_v27 = vmul.f32 %v2987_v21, %v2739_v35  ;;  %v4429_v25 = vpop.f32.mrb[177].mxu0  ;;  %4455 = vmatprep.mubr.msk.bf16.mxu1 %vm4990_vm0, %v4989_v0 }
 0xe44   :  { %v2990_v29 = vpop.f32.mrb[178].mxu0  ;;  %v3025_v30 = vadd.f32 %v4743_v16, %v5733_v48  ;;  %v3033_v20 = vadd.f32 %v3024_v15, %v5738_v52  ;;  %v3068_v16 = vld [vmem:[#allocation15 + $0xa0] sm:$0xff]  ;;  %v3069_v25 = vld [vmem:[#allocation15 + $0xa8] sm:$0xff] }
 0xe45   :  { %v3010_v6 = vadd.f32 %v3001_v27, %v2749_v22  ;;  %v4430_v19 = vpop.f32.mrb[179].mxu0 }
 0xe46   :  { %v3034_v53 = vadd.f32 %v3025_v30, %v5742_v55  ;;  %v4761_v19 = vld [vmem:[%s6084_s0 + $0x10] sm:$0xff] }
 0xe47   :  { %4748 = vtanh.f32 %v3010_v6 }
 0xe48   :  { %v3077_v38 = vpack.c.bf16 %v3034_v53, %v3033_v20 }
 0xe49   :  { %v4745_v54 = vpop.eup %4744 }
 0xe4a   :  { %4456 = vmatmul.mubr.bf16.gmra.mrb[188].mxu1 %v3077_v38  ;;  %v3026_v58 = vadd.f32 %v4745_v54, %v5748_v63  ;;  %v4762_v54 = vld [vmem:[%s6084_s0 + $0x18] sm:$0xff] }
 0xe4b   :  { %v4747_v31 = vpop.eup %4746  ;;  %4459 = vmatprep.mubr.msk.bf16.mxu1 %vm4990_vm0, %v4989_v0 }
 0xe4c   :  { %v3027_v24 = vadd.f32 %v4747_v31, %v5753_v14  ;;  %v3035_v48 = vadd.f32 %v3026_v58, %v5758_v2  ;;  %v3070_v31 = vld [vmem:[#allocation15 + $0xb0] sm:$0xff] }
 0xe4e   :  { %v3036_v26 = vadd.f32 %v3027_v24, %v5762_v37 }
 0xe50   :  { %v3078_v7 = vpack.c.bf16 %v3036_v26, %v3035_v48  ;;  %v3071_v48 = vld [vmem:[#allocation15 + $0xb8] sm:$0xff] }
 0xe51   :  { %v4749_v52 = vpop.eup %4748 }
 0xe52   :  { %4460 = vmatmul.mubr.bf16.gmra.mrb[192].mxu1 %v3078_v7  ;;  %v3028_v55 = vadd.f32 %v4749_v52, %v5768_v11 }
 0xe53   :  { %4463 = vmatprep.mubr.msk.bf16.mxu1 %vm4990_vm0, %v4989_v0 }
 0xe54   :  { %v3037_v63 = vadd.f32 %v3028_v55, %v5774_v23  ;;  %v4763_v55 = vld [vmem:[%s6084_s0 + $0x20] sm:$0xff] }
 0xe56   :  { %v3079_v39 = vpack.c.bf16 %v3037_v63, %v3037_v63 }
 0xe5a   :  { %4464 = vmatmul.mubr.bf16.gmra.mrb[196].mxu1 %v3079_v39 }
 0xf0d   :  { %v3162_v13 = vpop.f32.mrb[180].mxu1 }
 0xf0e   :  { %v4449_v28 = vpop.f32.mrb[181].mxu1 }
 0xf0f   :  { %v3165_v32 = vpop.f32.mrb[182].mxu1  ;;  %v4764_v28 = vld [vmem:[%s6084_s0 + $0x28] sm:$0xff] }
 0xf10   :  { %v3200_v14 = vpack.c.bf16 %v3165_v32, %v3162_v13  ;;  %v4450_v33 = vpop.f32.mrb[183].mxu1 }
 0xf12   :  { %4468 = vmatpush3.bf16.msra.mxu0 %v3200_v14  ;;  %v3072_v14 = vld [vmem:[#allocation15 + $0xc0] sm:$0xff] }
 0xf13   :  { %4469 = vmatprep.subr.bf16.mxu0 %v4989_v0 }
 0xf15   :  { %v3170_v2 = vpop.f32.mrb[184].mxu1 }
 0xf16   :  { %v4453_v37 = vpop.f32.mrb[185].mxu1 }
 0xf17   :  { %v3173_v34 = vpop.f32.mrb[186].mxu1 }
 0xf18   :  { %v3201_v40 = vpack.c.bf16 %v3173_v34, %v3170_v2  ;;  %v4454_v11 = vpop.f32.mrb[187].mxu1  ;;  %v3073_v2 = vld [vmem:[#allocation15 + $0xc8] sm:$0xff] }
 0xf19   :  { %v4765_v11 = vld [vmem:[%s6084_s0 + $0x30] sm:$0xff] }
 0xf1a   :  { %4470 = vmatpush3.bf16.msra.mxu0 %v3201_v40 }
 0xf1b   :  { %4471 = vmatprep.subr.bf16.mxu0 %v4989_v0 }
 0xf1d   :  { %v3178_v41 = vpop.f32.mrb[188].mxu1 }
 0xf1e   :  { %v4457_v23 = vpop.f32.mrb[189].mxu1 }
 0xf1f   :  { %v3181_v42 = vpop.f32.mrb[190].mxu1 }
 0xf20   :  { %v3202_v43 = vpack.c.bf16 %v3181_v42, %v3178_v41  ;;  %v4458_v46 = vpop.f32.mrb[191].mxu1 }
 0xf22   :  { %4472 = vmatpush3.bf16.msra.mxu0 %v3202_v43  ;;  %v4766_v43 = vld [vmem:[%s6084_s0 + $0x38] sm:$0xff] }
 0xf23   :  { %4473 = vmatprep.subr.bf16.mxu0 %v4989_v0 }
 0xf25   :  { %v3186_v51 = vpop.f32.mrb[192].mxu1 }
 0xf26   :  { %v4461_v59 = vpop.f32.mrb[193].mxu1 }
 0xf27   :  { %v3189_v18 = vpop.f32.mrb[194].mxu1 }
 0xf28   :  { %v3203_v44 = vpack.c.bf16 %v3189_v18, %v3186_v51  ;;  %v4462_v57 = vpop.f32.mrb[195].mxu1  ;;  %v3074_v51 = vld [vmem:[#allocation15 + $0xd0] sm:$0xff] }
 0xf2a   :  { %4474 = vmatpush3.bf16.msra.mxu0 %v3203_v44 }
 0xf2b   :  { %4475 = vmatprep.subr.bf16.mxu0 %v4989_v0 }
 0xf2d   :  { %v3194_v45 = vpop.f32.mrb[196].mxu1 }
 0xf2e   :  { %v3204_v47 = vpack.c.bf16 %v3194_v45, %v3194_v45  ;;  %v4465_v17 = vpop.f32.mrb[197].mxu1  ;;  %v4767_v45 = vld [vmem:[%s6084_s0 + $0x40] sm:$0xff] }
 0xf2f   :  { %v3197_v60 = vpop.f32.mrb[198].mxu1 }
 0xf30   :  { %v3244_v49 = vsel %vm385_vm1, %v3204_v47, 0  ;;  %v4466_v50 = vpop.f32.mrb[199].mxu1 }
 0xf31   :  { %4476 = vmatpush3.bf16.msra.mxu0 %v3244_v49 }
 0xf34   :  { %4478 = vmatmul.mubr.msk.bf16.vlgmr.msra.gmra.mrb[180].mxu0 %vm369_vm2, %v4637_v56 }
 0xf35   :  { %4481 = vmatprep.mubr.msk.bf16.mxu0 %vm4990_vm0, %v4989_v0 }
 0xf3c   :  { %4482 = vmatmul.mubr.msk.bf16.gmra.mrb[184].mxu0 %vm369_vm2, %v4638_v3 }
 0xf3d   :  { %4485 = vmatprep.mubr.msk.bf16.mxu0 %vm4990_vm0, %v4989_v0 }
 0xf44   :  { %4486 = vmatmul.mubr.msk.bf16.gmra.mrb[188].mxu0 %vm369_vm2, %v4639_v36 }
 0xf45   :  { %4489 = vmatprep.mubr.msk.bf16.mxu0 %vm4990_vm0, %v4989_v0 }
 0xf4c   :  { %4490 = vmatmul.mubr.msk.bf16.gmra.mrb[192].mxu0 %vm369_vm2, %v4640_v4 }
 0xf4d   :  { %4493 = vmatprep.mubr.msk.bf16.mxu0 %vm4990_vm0, %v4989_v0  ;;  %v4760_v0 = vld [vmem:[%s6084_s0 + $0x8] sm:$0xff] }
 0xf54   :  { %4494 = vmatmul.mubr.msk.bf16.gmra.mrb[196].mxu0 %vm369_vm2, %v4641_v61 }
0x1007   :  { %v3280_v8 = vpop.f32.mrb[180].mxu0 }
0x1008   :  { %v3281_v12 = vadd.f32 %v3280_v8, %v3066_v62  ;;  %v4479_v5 = vpop.f32.mrb[181].mxu0 }
0x1009   :  { %v3283_v35 = vpop.f32.mrb[182].mxu0 }
0x100a   :  { %v3318_v10 = vadd.f32 %v4759_v9, %v3281_v12  ;;  %v3284_v22 = vadd.f32 %v3283_v35, %v3067_v1  ;;  %v4480_v21 = vpop.f32.mrb[183].mxu0 }
0x100c   :  { %3598 = vst [vmem:[%s6096_s12 + $0x90] sm:$0xff] %v3318_v10  ;;  %v3319_v15 = vadd.f32 %v4760_v0, %v3284_v22 }
0x100e   :  { %3599 = vst [vmem:[%s6096_s12 + $0x98] sm:$0xff] %v3319_v15 }
0x100f   :  { %v3288_v27 = vpop.f32.mrb[184].mxu0 }
0x1010   :  { %v3289_v29 = vadd.f32 %v3288_v27, %v3068_v16  ;;  %v4483_v30 = vpop.f32.mrb[185].mxu0 }
0x1011   :  { %v3291_v6 = vpop.f32.mrb[186].mxu0 }
0x1012   :  { %v3320_v20 = vadd.f32 %v4761_v19, %v3289_v29  ;;  %v3292_v53 = vadd.f32 %v3291_v6, %v3069_v25  ;;  %v4484_v38 = vpop.f32.mrb[187].mxu0 }
0x1014   :  { %3600 = vst [vmem:[%s6096_s12 + $0xa0] sm:$0xff] %v3320_v20  ;;  %v3321_v58 = vadd.f32 %v4762_v54, %v3292_v53 }
0x1016   :  { %3601 = vst [vmem:[%s6096_s12 + $0xa8] sm:$0xff] %v3321_v58 }
0x1017   :  { %v3296_v24 = vpop.f32.mrb[188].mxu0 }
0x1018   :  { %v3297_v26 = vadd.f32 %v3296_v24, %v3070_v31  ;;  %v4487_v7 = vpop.f32.mrb[189].mxu0 }
0x1019   :  { %v3299_v52 = vpop.f32.mrb[190].mxu0 }
0x101a   :  { %v3322_v63 = vadd.f32 %v4763_v55, %v3297_v26  ;;  %v3300_v39 = vadd.f32 %v3299_v52, %v3071_v48  ;;  %v4488_v13 = vpop.f32.mrb[191].mxu0 }
0x101c   :  { %3602 = vst [vmem:[%s6096_s12 + $0xb0] sm:$0xff] %v3322_v63  ;;  %v3323_v32 = vadd.f32 %v4764_v28, %v3300_v39 }
0x101e   :  { %3603 = vst [vmem:[%s6096_s12 + $0xb8] sm:$0xff] %v3323_v32 }
0x101f   :  { %v3304_v33 = vpop.f32.mrb[192].mxu0 }
0x1020   :  { %v3305_v37 = vadd.f32 %v3304_v33, %v3072_v14  ;;  %v4491_v34 = vpop.f32.mrb[193].mxu0 }
0x1021   :  { %v3307_v40 = vpop.f32.mrb[194].mxu0 }
0x1022   :  { %v3324_v41 = vadd.f32 %v4765_v11, %v3305_v37  ;;  %v3308_v23 = vadd.f32 %v3307_v40, %v3073_v2  ;;  %v4492_v42 = vpop.f32.mrb[195].mxu0 }
0x1024   :  { %3604 = vst [vmem:[%s6096_s12 + $0xc0] sm:$0xff] %v3324_v41  ;;  %v3325_v46 = vadd.f32 %v4766_v43, %v3308_v23 }
0x1026   :  { %3605 = vst [vmem:[%s6096_s12 + $0xc8] sm:$0xff] %v3325_v46 }
0x1027   :  { %v3312_v59 = vpop.f32.mrb[196].mxu0 }
0x1028   :  { %v3313_v18 = vadd.f32 %v3312_v59, %v3074_v51  ;;  %v4495_v44 = vpop.f32.mrb[197].mxu0 }
0x1029   :  { %v3315_v57 = vpop.f32.mrb[198].mxu0 }
0x102a   :  { %v3326_v47 = vadd.f32 %v4767_v45, %v3313_v18  ;;  %v4496_v17 = vpop.f32.mrb[199].mxu0 }
0x102c   :  { %3606 = vst [vmem:[%s6096_s12 + $0xd0] sm:$0xff] %v3326_v47 }
0x102d   :  { %3341 = vsyncpa [#allocation3], 1 }
0x102e   :  { %3342 = vsyncpa [#allocation5], 1 }
0x102f   :  { %3343 = vsyncpa [#allocation8], 1 }
0x1030   :  { %3344 = vsyncpa [#allocation11], 1 }
0x1031   :  { %3345 = vsyncpa [#allocation14], 1 }

</bundles_post_ra>
